<compile_context>
chip_gen: v7x
topology: tpu7x:2x2x1
jax: 0.10.0
libtpu: 0.0.40
codegen_flags: <defaults>
</compile_context>

<pallas_src>
import jax
import jax.numpy as jnp
from jax.experimental import pallas as pl
from jax.experimental.pallas import tpu as pltpu


# ----------------------------- Pallas kernels ------------------------------ #

def encoder_gru_kernel(gir_ref, giz_ref, gin_ref,       # [S, B, H] f32 per gate
                       whr_ref, whz_ref, whn_ref,       # [H, H] bf16 per gate
                       bhr_ref, bhz_ref, bhn_ref,       # [1, H] f32 per gate
                       hfinal_ref):                     # [B, H] f32 final hidden
    """Whole-sequence GRU recurrence in one grid step (everything VMEM resident).

    The input projection gi_t = x_t @ W_ih + b_ih is precomputed in the wrapper
    (one dense matmul over all timesteps) and arrives split per gate so the hot
    recurrence never slices inside a 128-lane vreg."""
    S, B, H = gir_ref.shape

    # Hoisted invariants (recurrent weights / biases stay in vregs).
    whr = whr_ref[...]; whz = whz_ref[...]; whn = whn_ref[...]
    bhr = bhr_ref[...]; bhz = bhz_ref[...]; bhn = bhn_ref[...]

    def step(t, h):
        hb = h.astype(whr.dtype)                         # bf16 MXU operand
        ghr = jnp.dot(hb, whr, preferred_element_type=jnp.float32) + bhr
        ghz = jnp.dot(hb, whz, preferred_element_type=jnp.float32) + bhz
        ghn = jnp.dot(hb, whn, preferred_element_type=jnp.float32) + bhn
        r = jax.nn.sigmoid(gir_ref[t] + ghr)
        z = jax.nn.sigmoid(giz_ref[t] + ghz)
        n = jnp.tanh(gin_ref[t] + r * ghn)
        return (1.0 - z) * n + z * h

    h0 = jnp.zeros((B, H), jnp.float32)
    unroll = True if S <= 16 else 8                      # bound vreg pressure at scale
    hfinal_ref[...] = jax.lax.fori_loop(0, S, step, h0, unroll=unroll)


def decoder_fused_kernel(tf_ref,                          # SMEM [T] int32 TF mask
                         gtr_ref, gtz_ref, gtn_ref,       # [T, B, H] f32 teacher gi rows
                         ptr_ref, ptz_ref, ptn_ref,       # [OP, H] bf16 padded gi tables
                         whr_ref, whz_ref, whn_ref,       # [H, H] bf16 recurrent weights
                         bhr_ref, bhz_ref, bhn_ref,       # [1, H] f32 recurrent biases
                         h_ref,                           # [B, H] f32 encoder hidden
                         wout_ref,                        # [H, OP] bf16 head (lane padded)
                         bout_ref,                        # [1, OP] f32 bias (pads = -1e30)
                         out_ref):                        # [T, B, OP] f32 logits
    """Whole decoder loop in one grid step.

    The hidden state fed to the GRU cell never changes in the reference forward
    (always encoder_hidden), so gh = h @ W_hh + b_hh is computed ONCE in the
    prologue.  The loop carry is the per-gate input projection of the current
    token (gi rows), blended between the teacher-forced row (gathered in the
    wrapper) and the greedy row (one-hot @ padded gi table) each step."""
    T, B, H = gtr_ref.shape
    OP = wout_ref.shape[1]

    # ---- prologue: hoist every loop invariant -------------------------------
    h = h_ref[...]                                        # [B, H] f32 (constant)
    hb = h.astype(whr_ref.dtype)
    ghr = jnp.dot(hb, whr_ref[...], preferred_element_type=jnp.float32) + bhr_ref[...]
    ghz = jnp.dot(hb, whz_ref[...], preferred_element_type=jnp.float32) + bhz_ref[...]
    ghn = jnp.dot(hb, whn_ref[...], preferred_element_type=jnp.float32) + bhn_ref[...]

    ptr = ptr_ref[...]; ptz = ptz_ref[...]; ptn = ptn_ref[...]
    wout = wout_ref[...]
    bout = bout_ref[...]
    col = jax.lax.broadcasted_iota(jnp.int32, (B, OP), 1).astype(jnp.float32)

    out_ref[0] = jnp.zeros((B, OP), jnp.float32)          # outputs[0] stays zero

    def step(i, carry):
        gir, giz, gin = carry                             # [B, H] each (current input)
        t = i + 1

        # --- GRU cell with constant hidden state (recurrent term hoisted) ---
        r = jax.nn.sigmoid(gir + ghr)
        z = jax.nn.sigmoid(giz + ghz)
        n = jnp.tanh(gin + r * ghn)
        h_new = (1.0 - z) * n + z * h                     # [B, H]

        # --- lane-dense output head (padded columns carry -1e30 bias) ---
        logits = (jnp.dot(h_new.astype(wout.dtype), wout,
                          preferred_element_type=jnp.float32) + bout)   # [B, OP]
        out_ref[t] = logits

        # --- greedy argmax (first max wins, matches argmax tie-break) ---
        mx = jnp.max(logits, axis=-1, keepdims=True)
        neg_col = jnp.where(logits >= mx, -col, -jnp.float32(OP))
        pred_col = -jnp.max(neg_col, axis=-1, keepdims=True)            # [B, 1]
        pred_oh = (col == pred_col).astype(ptr.dtype)                   # [B, OP] bf16

        pr = jnp.dot(pred_oh, ptr, preferred_element_type=jnp.float32)  # [B, H]
        pz = jnp.dot(pred_oh, ptz, preferred_element_type=jnp.float32)
        pn = jnp.dot(pred_oh, ptn, preferred_element_type=jnp.float32)

        # --- teacher-forcing select for the next step's input ---
        w = tf_ref[t].astype(jnp.float32)                 # scalar 0/1 from SMEM
        gir_n = w * gtr_ref[t] + (1.0 - w) * pr
        giz_n = w * gtz_ref[t] + (1.0 - w) * pz
        gin_n = w * gtn_ref[t] + (1.0 - w) * pn
        return (gir_n, giz_n, gin_n)

    init = (gtr_ref[0], gtz_ref[0], gtn_ref[0])           # start = target[0]
    unroll = True if (T - 1) <= 16 else 8
    jax.lax.fori_loop(0, T - 1, step, init, unroll=unroll)


# ------------------------------ wrappers ----------------------------------- #

_VMEM_LIMIT = 32 * 1024 * 1024


def _pad_to(n, m):
    return ((n + m - 1) // m) * m


def encoder_forward(gir, giz, gin, whr, whz, whn, bhr, bhz, bhn):
    S, B, H = gir.shape
    return pl.pallas_call(
        encoder_gru_kernel,
        out_shape=jax.ShapeDtypeStruct((B, H), jnp.float32),
        grid=(1,),
        in_specs=[
            pl.BlockSpec((S, B, H), lambda i: (0, 0, 0)),
            pl.BlockSpec((S, B, H), lambda i: (0, 0, 0)),
            pl.BlockSpec((S, B, H), lambda i: (0, 0, 0)),
            pl.BlockSpec((H, H), lambda i: (0, 0)),
            pl.BlockSpec((H, H), lambda i: (0, 0)),
            pl.BlockSpec((H, H), lambda i: (0, 0)),
            pl.BlockSpec((1, H), lambda i: (0, 0)),
            pl.BlockSpec((1, H), lambda i: (0, 0)),
            pl.BlockSpec((1, H), lambda i: (0, 0)),
        ],
        out_specs=pl.BlockSpec((B, H), lambda i: (0, 0)),
        compiler_params=pltpu.CompilerParams(
            dimension_semantics=("arbitrary",),
            vmem_limit_bytes=_VMEM_LIMIT),
    )(gir, giz, gin, whr, whz, whn, bhr, bhz, bhn)


def decoder_forward(tf_mask, gtr, gtz, gtn, ptr, ptz, ptn,
                    whr, whz, whn, bhr, bhz, bhn, h, wout_pad, bout_pad):
    T, B, H = gtr.shape
    OP = wout_pad.shape[1]
    return pl.pallas_call(
        decoder_fused_kernel,
        out_shape=jax.ShapeDtypeStruct((T, B, OP), jnp.float32),
        grid_spec=pltpu.PrefetchScalarGridSpec(
            num_scalar_prefetch=1,
            grid=(1,),
            in_specs=[
                pl.BlockSpec((T, B, H), lambda i, tf: (0, 0, 0)),
                pl.BlockSpec((T, B, H), lambda i, tf: (0, 0, 0)),
                pl.BlockSpec((T, B, H), lambda i, tf: (0, 0, 0)),
                pl.BlockSpec((OP, H), lambda i, tf: (0, 0)),
                pl.BlockSpec((OP, H), lambda i, tf: (0, 0)),
                pl.BlockSpec((OP, H), lambda i, tf: (0, 0)),
                pl.BlockSpec((H, H), lambda i, tf: (0, 0)),
                pl.BlockSpec((H, H), lambda i, tf: (0, 0)),
                pl.BlockSpec((H, H), lambda i, tf: (0, 0)),
                pl.BlockSpec((1, H), lambda i, tf: (0, 0)),
                pl.BlockSpec((1, H), lambda i, tf: (0, 0)),
                pl.BlockSpec((1, H), lambda i, tf: (0, 0)),
                pl.BlockSpec((B, H), lambda i, tf: (0, 0)),
                pl.BlockSpec((H, OP), lambda i, tf: (0, 0)),
                pl.BlockSpec((1, OP), lambda i, tf: (0, 0)),
            ],
            out_specs=pl.BlockSpec((T, B, OP), lambda i, tf: (0, 0, 0)),
        ),
        compiler_params=pltpu.CompilerParams(
            dimension_semantics=("arbitrary",),
            vmem_limit_bytes=_VMEM_LIMIT),
    )(tf_mask, gtr, gtz, gtn, ptr, ptz, ptn,
      whr, whz, whn, bhr, bhz, bhn, h, wout_pad, bout_pad)


# ------------------------------ Seq2Seq ------------------------------------ #

@jax.jit
def seq2seq_forward(source, target, params, tf_key, tfr=0.5):
    """source: [src_len, B] int32; target: [tgt_len, B] int32.
    Returns outputs: [tgt_len, B, output_size] float32 (outputs[0] == 0)."""
    enc, dec = params["encoder"], params["decoder"]
    H = enc["whh_T"].shape[0]
    T, B = target.shape
    O = dec["wout_T"].shape[1]
    V = dec["emb"].shape[0]                      # decoder vocab == output_size
    OP = _pad_to(max(O, V), 128)                 # lane-dense padded head / table width
    bf16 = jnp.bfloat16

    # ---- Encoder: hoist the input projection out of the recurrence (one matmul),
    #      split per gate, then run the recurrence in a single Pallas call.
    src_emb = jnp.take(enc["emb"], source, axis=0)                          # [S, B, E]
    gi_all = jnp.einsum("sbe,eg->sbg", src_emb, enc["wih_T"]) + enc["bih"]  # [S, B, 3H]
    gir, giz, gin = (gi_all[..., :H], gi_all[..., H:2 * H], gi_all[..., 2 * H:])
    ewhr = enc["whh_T"][:, :H].astype(bf16)
    ewhz = enc["whh_T"][:, H:2 * H].astype(bf16)
    ewhn = enc["whh_T"][:, 2 * H:].astype(bf16)
    ebhr, ebhz, ebhn = (enc["bhh"][:, :H], enc["bhh"][:, H:2 * H], enc["bhh"][:, 2 * H:])
    encoder_hidden = encoder_forward(gir, giz, gin, ewhr, ewhz, ewhn,
                                     ebhr, ebhz, ebhn)                      # [B, H]

    # ---- Decoder one-time precomputes (h never changes in the reference forward):
    gi_tab = dec["emb"] @ dec["wih_T"] + dec["bih"]                         # [V, 3H]
    gi_tgt = jnp.take(gi_tab, target, axis=0)                               # [T, B, 3H]
    gtr, gtz, gtn = (gi_tgt[..., :H], gi_tgt[..., H:2 * H], gi_tgt[..., 2 * H:])
    # Greedy-path gi table, row-padded to OP so a [B, OP] argmax one-hot can hit it.
    ptr = jnp.zeros((OP, H), jnp.float32).at[:V].set(gi_tab[:, :H]).astype(bf16)
    ptz = jnp.zeros((OP, H), jnp.float32).at[:V].set(gi_tab[:, H:2 * H]).astype(bf16)
    ptn = jnp.zeros((OP, H), jnp.float32).at[:V].set(gi_tab[:, 2 * H:]).astype(bf16)
    dwhr = dec["whh_T"][:, :H].astype(bf16)
    dwhz = dec["whh_T"][:, H:2 * H].astype(bf16)
    dwhn = dec["whh_T"][:, 2 * H:].astype(bf16)
    dbhr, dbhz, dbhn = (dec["bhh"][:, :H], dec["bhh"][:, H:2 * H], dec["bhh"][:, 2 * H:])
    wout_pad = jnp.zeros((H, OP), jnp.float32).at[:, :O].set(dec["wout_T"]).astype(bf16)
    bout_pad = jnp.full((1, OP), -1e30, jnp.float32).at[:, :O].set(dec["bout"])

    # TODO(synk): torch.rand([1]) per step is nondeterministic; replicated here as
    # deterministic per-step Bernoulli(tfr) draws from tf_key.
    tf_mask = (jax.random.uniform(tf_key, (T,)) < tfr).astype(jnp.int32)    # [T]

    logits_full = decoder_forward(tf_mask, gtr, gtz, gtn, ptr, ptz, ptn,
                                  dwhr, dwhz, dwhn, dbhr, dbhz, dbhn,
                                  encoder_hidden, wout_pad, bout_pad)       # [T, B, OP]
    return logits_full[:, :, :O]                                            # [T, B, O]


# ------------------------ pure-JAX reference (check) ------------------------ #

def seq2seq_reference(source, target, params, tf_key, tfr=0.5):
    enc, dec = params["encoder"], params["decoder"]
    H = enc["whh_T"].shape[0]
    T, B = target.shape
    O = dec["wout_T"].shape[1]

    def gru_cell(x, h, wih_T, whh_T, bih, bhh):
        gi = x @ wih_T + bih
        gh = h @ whh_T + bhh
        r = jax.nn.sigmoid(gi[:, :H] + gh[:, :H])
        z = jax.nn.sigmoid(gi[:, H:2 * H] + gh[:, H:2 * H])
        n = jnp.tanh(gi[:, 2 * H:] + r * gh[:, 2 * H:])
        return (1.0 - z) * n + z * h

    h = jnp.zeros((B, H), jnp.float32)
    src_emb = jnp.take(enc["emb"], source, axis=0)
    for s in range(source.shape[0]):
        h = gru_cell(src_emb[s], h, enc["wih_T"], enc["whh_T"], enc["bih"], enc["bhh"])
    encoder_hidden = h

    tf_mask = jax.random.uniform(tf_key, (T,)) < tfr
    outputs = jnp.zeros((T, B, O), jnp.float32)
    start = target[0]
    for t in range(1, T):
        x = jnp.take(dec["emb"], start, axis=0)
        h_new = gru_cell(x, encoder_hidden, dec["wih_T"], dec["whh_T"],
                         dec["bih"], dec["bhh"])
        logits = h_new @ dec["wout_T"] + dec["bout"]
        outputs = outputs.at[t].set(logits)
        top_pred = jnp.argmax(logits, axis=1).astype(target.dtype)
        start = jnp.where(tf_mask[t], target[t], top_pred)
    return outputs


# --------------------------- parameter init -------------------------------- #

def init_params(key, src_vocab, output_size, emb_dim, hidden):
    ks = jax.random.split(key, 12)
    u = lambda k, shape, s: jax.random.uniform(k, shape, jnp.float32, -s, s)
    sh = 1.0 / jnp.sqrt(hidden)
    enc = dict(
        emb=u(ks[0], (src_vocab, emb_dim), 1.0),
        wih_T=u(ks[1], (emb_dim, 3 * hidden), sh),   # transposed PyTorch W_ih [3H,E]
        whh_T=u(ks[2], (hidden, 3 * hidden), sh),
        bih=u(ks[3], (1, 3 * hidden), sh),
        bhh=u(ks[4], (1, 3 * hidden), sh),
    )
    dec = dict(
        emb=u(ks[5], (output_size, emb_dim), 1.0),
        wih_T=u(ks[6], (emb_dim, 3 * hidden), sh),
        whh_T=u(ks[7], (hidden, 3 * hidden), sh),
        bih=u(ks[8], (1, 3 * hidden), sh),
        bhh=u(ks[9], (1, 3 * hidden), sh),
        wout_T=u(ks[10], (hidden, output_size), sh),
        bout=u(ks[11], (1, output_size), sh),
    )
    return dict(encoder=enc, decoder=dec)


# --------------------------------- main ------------------------------------ #

if __name__ == "__main__":
    SRC_VOCAB, OUTPUT_SIZE = 10, 12
    EMB, HIDDEN = 16, 32
    SRC_LEN, TGT_LEN, BATCH = 7, 8, 2

    key = jax.random.PRNGKey(0)
    k_src, k_tgt, k_par = jax.random.split(key, 3)
    source = jax.random.randint(k_src, (SRC_LEN, BATCH), 0, SRC_VOCAB, jnp.int32)
    target = jax.random.randint(k_tgt, (TGT_LEN, BATCH), 0, OUTPUT_SIZE, jnp.int32)
    params = init_params(k_par, SRC_VOCAB, OUTPUT_SIZE, EMB, HIDDEN)
    tf_key = jax.random.PRNGKey(42)

    # Numerical check against a pure-JAX reference under full teacher forcing
    # (token path is then data-independent; tolerance covers bf16 MXU operands).
    out_tf = jax.block_until_ready(seq2seq_forward(source, target, params, tf_key, 1.0))
    ref_tf = seq2seq_reference(source, target, params, tf_key, 1.0)
    assert out_tf.shape == (TGT_LEN, BATCH, OUTPUT_SIZE)
    assert bool(jnp.allclose(out_tf, ref_tf, rtol=5e-2, atol=5e-2)), (
        "max|diff| = %e" % float(jnp.max(jnp.abs(out_tf - ref_tf))))

    # Real run with tfr=0.5 (deterministic Bernoulli draws), exercising the
    # in-kernel argmax + teacher-forcing select path.
    outputs = jax.block_until_ready(seq2seq_forward(source, target, params, tf_key, 0.5))
    assert outputs.shape == (TGT_LEN, BATCH, OUTPUT_SIZE)
    assert bool(jnp.all(outputs[0] == 0.0))
    assert bool(jnp.all(jnp.isfinite(outputs)))
    print("KERNEL_OK")
</pallas_src>

<mosaic_0001>
module attributes {stable_mosaic.version = 11 : i64} {
  func.func @encoder_gru_kernel(%arg0: i32, %arg1: memref<7x2x32xf32, #tpu.memory_space<vmem>>, %arg2: memref<7x2x32xf32, #tpu.memory_space<vmem>>, %arg3: memref<7x2x32xf32, #tpu.memory_space<vmem>>, %arg4: memref<32x32xbf16, #tpu.memory_space<vmem>>, %arg5: memref<32x32xbf16, #tpu.memory_space<vmem>>, %arg6: memref<32x32xbf16, #tpu.memory_space<vmem>>, %arg7: memref<1x32xf32, #tpu.memory_space<vmem>>, %arg8: memref<1x32xf32, #tpu.memory_space<vmem>>, %arg9: memref<1x32xf32, #tpu.memory_space<vmem>>, %arg10: memref<2x32xf32, #tpu.memory_space<vmem>>) attributes {dimension_semantics = [#tpu.dimension_semantics<arbitrary>], iteration_bounds = array<i64: 1>, scalar_prefetch = 0 : i64, scratch_operands = 0 : i64, tpu.core_type = #tpu.core_type<tc>, window_params = [{pipeline_mode = #tpu.pipeline_mode<synchronous>, transform_indices = @transform_0, window_bounds = array<i64: 7, 2, 32>}, {pipeline_mode = #tpu.pipeline_mode<synchronous>, transform_indices = @transform_1, window_bounds = array<i64: 7, 2, 32>}, {pipeline_mode = #tpu.pipeline_mode<synchronous>, transform_indices = @transform_2, window_bounds = array<i64: 7, 2, 32>}, {pipeline_mode = #tpu.pipeline_mode<synchronous>, transform_indices = @transform_3, window_bounds = array<i64: 32, 32>}, {pipeline_mode = #tpu.pipeline_mode<synchronous>, transform_indices = @transform_4, window_bounds = array<i64: 32, 32>}, {pipeline_mode = #tpu.pipeline_mode<synchronous>, transform_indices = @transform_5, window_bounds = array<i64: 32, 32>}, {pipeline_mode = #tpu.pipeline_mode<synchronous>, transform_indices = @transform_6, window_bounds = array<i64: 1, 32>}, {pipeline_mode = #tpu.pipeline_mode<synchronous>, transform_indices = @transform_7, window_bounds = array<i64: 1, 32>}, {pipeline_mode = #tpu.pipeline_mode<synchronous>, transform_indices = @transform_8, window_bounds = array<i64: 1, 32>}, {pipeline_mode = #tpu.pipeline_mode<synchronous>, transform_indices = @transform_9, window_bounds = array<i64: 2, 32>}]} {
    %c0 = arith.constant 0 : index
    %c0_0 = arith.constant 0 : index
    %0 = vector.load %arg4[%c0, %c0_0] : memref<32x32xbf16, #tpu.memory_space<vmem>>, vector<32x32xbf16>
    %c0_1 = arith.constant 0 : index
    %c0_2 = arith.constant 0 : index
    %1 = vector.load %arg5[%c0_1, %c0_2] : memref<32x32xbf16, #tpu.memory_space<vmem>>, vector<32x32xbf16>
    %c0_3 = arith.constant 0 : index
    %c0_4 = arith.constant 0 : index
    %2 = vector.load %arg6[%c0_3, %c0_4] : memref<32x32xbf16, #tpu.memory_space<vmem>>, vector<32x32xbf16>
    %c0_5 = arith.constant 0 : index
    %c0_6 = arith.constant 0 : index
    %3 = vector.load %arg7[%c0_5, %c0_6] : memref<1x32xf32, #tpu.memory_space<vmem>>, vector<1x32xf32>
    %c0_7 = arith.constant 0 : index
    %c0_8 = arith.constant 0 : index
    %4 = vector.load %arg8[%c0_7, %c0_8] : memref<1x32xf32, #tpu.memory_space<vmem>>, vector<1x32xf32>
    %c0_9 = arith.constant 0 : index
    %c0_10 = arith.constant 0 : index
    %5 = vector.load %arg9[%c0_9, %c0_10] : memref<1x32xf32, #tpu.memory_space<vmem>>, vector<1x32xf32>
    %cst = arith.constant 0.000000e+00 : f32
    %6 = vector.broadcast %cst : f32 to vector<2x32xf32>
    %c0_i32 = arith.constant 0 : i32
    %7 = arith.truncf %6 : vector<2x32xf32> to vector<2x32xbf16>
    %cst_11 = arith.constant dense<0.000000e+00> : vector<2x32xf32>
    %8 = tpu.matmul %7, %0, %cst_11 {dimension_numbers = #tpu.dot_dimension_numbers<[1], [0], [0], [1], [0, 0, 1, 1], [], []>} : vector<2x32xbf16>, vector<32x32xbf16>, vector<2x32xf32> -> vector<2x32xf32>
    %9 = vector.broadcast %3 : vector<1x32xf32> to vector<2x32xf32>
    %10 = arith.addf %8, %9 : vector<2x32xf32>
    %cst_12 = arith.constant dense<0.000000e+00> : vector<2x32xf32>
    %11 = tpu.matmul %7, %1, %cst_12 {dimension_numbers = #tpu.dot_dimension_numbers<[1], [0], [0], [1], [0, 0, 1, 1], [], []>} : vector<2x32xbf16>, vector<32x32xbf16>, vector<2x32xf32> -> vector<2x32xf32>
    %12 = vector.broadcast %4 : vector<1x32xf32> to vector<2x32xf32>
    %13 = arith.addf %11, %12 : vector<2x32xf32>
    %cst_13 = arith.constant dense<0.000000e+00> : vector<2x32xf32>
    %14 = tpu.matmul %7, %2, %cst_13 {dimension_numbers = #tpu.dot_dimension_numbers<[1], [0], [0], [1], [0, 0, 1, 1], [], []>} : vector<2x32xbf16>, vector<32x32xbf16>, vector<2x32xf32> -> vector<2x32xf32>
    %15 = vector.broadcast %5 : vector<1x32xf32> to vector<2x32xf32>
    %16 = arith.addf %14, %15 : vector<2x32xf32>
    %17 = arith.index_cast %c0_i32 : i32 to index
    %c0_14 = arith.constant 0 : index
    %c0_15 = arith.constant 0 : index
    %18 = vector.load %arg1[%17, %c0_14, %c0_15] : memref<7x2x32xf32, #tpu.memory_space<vmem>>, vector<1x2x32xf32>
    %19 = vector.shape_cast %18 : vector<1x2x32xf32> to vector<2x32xf32>
    %20 = arith.addf %19, %10 : vector<2x32xf32>
    %21 = arith.negf %20 : vector<2x32xf32>
    %22 = math.exp %21 : vector<2x32xf32>
    %cst_16 = arith.constant 1.000000e+00 : f32
    %23 = vector.broadcast %cst_16 : f32 to vector<2x32xf32>
    %24 = arith.addf %23, %22 : vector<2x32xf32>
    %25 = arith.divf %23, %24 : vector<2x32xf32>
    %26 = arith.index_cast %c0_i32 : i32 to index
    %c0_17 = arith.constant 0 : index
    %c0_18 = arith.constant 0 : index
    %27 = vector.load %arg2[%26, %c0_17, %c0_18] : memref<7x2x32xf32, #tpu.memory_space<vmem>>, vector<1x2x32xf32>
    %28 = vector.shape_cast %27 : vector<1x2x32xf32> to vector<2x32xf32>
    %29 = arith.addf %28, %13 : vector<2x32xf32>
    %30 = arith.negf %29 : vector<2x32xf32>
    %31 = math.exp %30 : vector<2x32xf32>
    %cst_19 = arith.constant 1.000000e+00 : f32
    %32 = vector.broadcast %cst_19 : f32 to vector<2x32xf32>
    %33 = arith.addf %32, %31 : vector<2x32xf32>
    %34 = arith.divf %32, %33 : vector<2x32xf32>
    %35 = arith.index_cast %c0_i32 : i32 to index
    %c0_20 = arith.constant 0 : index
    %c0_21 = arith.constant 0 : index
    %36 = vector.load %arg3[%35, %c0_20, %c0_21] : memref<7x2x32xf32, #tpu.memory_space<vmem>>, vector<1x2x32xf32>
    %37 = vector.shape_cast %36 : vector<1x2x32xf32> to vector<2x32xf32>
    %38 = arith.mulf %25, %16 : vector<2x32xf32>
    %39 = arith.addf %37, %38 : vector<2x32xf32>
    %40 = math.tanh %39 : vector<2x32xf32>
    %cst_22 = arith.constant 1.000000e+00 : f32
    %41 = vector.broadcast %cst_22 : f32 to vector<2x32xf32>
    %42 = arith.subf %41, %34 : vector<2x32xf32>
    %43 = arith.mulf %42, %40 : vector<2x32xf32>
    %44 = arith.mulf %34, %6 : vector<2x32xf32>
    %45 = arith.addf %43, %44 : vector<2x32xf32>
    %c1_i32 = arith.constant 1 : i32
    %46 = arith.truncf %45 : vector<2x32xf32> to vector<2x32xbf16>
    %cst_23 = arith.constant dense<0.000000e+00> : vector<2x32xf32>
    %47 = tpu.matmul %46, %0, %cst_23 {dimension_numbers = #tpu.dot_dimension_numbers<[1], [0], [0], [1], [0, 0, 1, 1], [], []>} : vector<2x32xbf16>, vector<32x32xbf16>, vector<2x32xf32> -> vector<2x32xf32>
    %48 = vector.broadcast %3 : vector<1x32xf32> to vector<2x32xf32>
    %49 = arith.addf %47, %48 : vector<2x32xf32>
    %cst_24 = arith.constant dense<0.000000e+00> : vector<2x32xf32>
    %50 = tpu.matmul %46, %1, %cst_24 {dimension_numbers = #tpu.dot_dimension_numbers<[1], [0], [0], [1], [0, 0, 1, 1], [], []>} : vector<2x32xbf16>, vector<32x32xbf16>, vector<2x32xf32> -> vector<2x32xf32>
    %51 = vector.broadcast %4 : vector<1x32xf32> to vector<2x32xf32>
    %52 = arith.addf %50, %51 : vector<2x32xf32>
    %cst_25 = arith.constant dense<0.000000e+00> : vector<2x32xf32>
    %53 = tpu.matmul %46, %2, %cst_25 {dimension_numbers = #tpu.dot_dimension_numbers<[1], [0], [0], [1], [0, 0, 1, 1], [], []>} : vector<2x32xbf16>, vector<32x32xbf16>, vector<2x32xf32> -> vector<2x32xf32>
    %54 = vector.broadcast %5 : vector<1x32xf32> to vector<2x32xf32>
    %55 = arith.addf %53, %54 : vector<2x32xf32>
    %56 = arith.index_cast %c1_i32 : i32 to index
    %c0_26 = arith.constant 0 : index
    %c0_27 = arith.constant 0 : index
    %57 = vector.load %arg1[%56, %c0_26, %c0_27] : memref<7x2x32xf32, #tpu.memory_space<vmem>>, vector<1x2x32xf32>
    %58 = vector.shape_cast %57 : vector<1x2x32xf32> to vector<2x32xf32>
    %59 = arith.addf %58, %49 : vector<2x32xf32>
    %60 = arith.negf %59 : vector<2x32xf32>
    %61 = math.exp %60 : vector<2x32xf32>
    %cst_28 = arith.constant 1.000000e+00 : f32
    %62 = vector.broadcast %cst_28 : f32 to vector<2x32xf32>
    %63 = arith.addf %62, %61 : vector<2x32xf32>
    %64 = arith.divf %62, %63 : vector<2x32xf32>
    %65 = arith.index_cast %c1_i32 : i32 to index
    %c0_29 = arith.constant 0 : index
    %c0_30 = arith.constant 0 : index
    %66 = vector.load %arg2[%65, %c0_29, %c0_30] : memref<7x2x32xf32, #tpu.memory_space<vmem>>, vector<1x2x32xf32>
    %67 = vector.shape_cast %66 : vector<1x2x32xf32> to vector<2x32xf32>
    %68 = arith.addf %67, %52 : vector<2x32xf32>
    %69 = arith.negf %68 : vector<2x32xf32>
    %70 = math.exp %69 : vector<2x32xf32>
    %cst_31 = arith.constant 1.000000e+00 : f32
    %71 = vector.broadcast %cst_31 : f32 to vector<2x32xf32>
    %72 = arith.addf %71, %70 : vector<2x32xf32>
    %73 = arith.divf %71, %72 : vector<2x32xf32>
    %74 = arith.index_cast %c1_i32 : i32 to index
    %c0_32 = arith.constant 0 : index
    %c0_33 = arith.constant 0 : index
    %75 = vector.load %arg3[%74, %c0_32, %c0_33] : memref<7x2x32xf32, #tpu.memory_space<vmem>>, vector<1x2x32xf32>
    %76 = vector.shape_cast %75 : vector<1x2x32xf32> to vector<2x32xf32>
    %77 = arith.mulf %64, %55 : vector<2x32xf32>
    %78 = arith.addf %76, %77 : vector<2x32xf32>
    %79 = math.tanh %78 : vector<2x32xf32>
    %cst_34 = arith.constant 1.000000e+00 : f32
    %80 = vector.broadcast %cst_34 : f32 to vector<2x32xf32>
    %81 = arith.subf %80, %73 : vector<2x32xf32>
    %82 = arith.mulf %81, %79 : vector<2x32xf32>
    %83 = arith.mulf %73, %45 : vector<2x32xf32>
    %84 = arith.addf %82, %83 : vector<2x32xf32>
    %c2_i32 = arith.constant 2 : i32
    %85 = arith.truncf %84 : vector<2x32xf32> to vector<2x32xbf16>
    %cst_35 = arith.constant dense<0.000000e+00> : vector<2x32xf32>
    %86 = tpu.matmul %85, %0, %cst_35 {dimension_numbers = #tpu.dot_dimension_numbers<[1], [0], [0], [1], [0, 0, 1, 1], [], []>} : vector<2x32xbf16>, vector<32x32xbf16>, vector<2x32xf32> -> vector<2x32xf32>
    %87 = vector.broadcast %3 : vector<1x32xf32> to vector<2x32xf32>
    %88 = arith.addf %86, %87 : vector<2x32xf32>
    %cst_36 = arith.constant dense<0.000000e+00> : vector<2x32xf32>
    %89 = tpu.matmul %85, %1, %cst_36 {dimension_numbers = #tpu.dot_dimension_numbers<[1], [0], [0], [1], [0, 0, 1, 1], [], []>} : vector<2x32xbf16>, vector<32x32xbf16>, vector<2x32xf32> -> vector<2x32xf32>
    %90 = vector.broadcast %4 : vector<1x32xf32> to vector<2x32xf32>
    %91 = arith.addf %89, %90 : vector<2x32xf32>
    %cst_37 = arith.constant dense<0.000000e+00> : vector<2x32xf32>
    %92 = tpu.matmul %85, %2, %cst_37 {dimension_numbers = #tpu.dot_dimension_numbers<[1], [0], [0], [1], [0, 0, 1, 1], [], []>} : vector<2x32xbf16>, vector<32x32xbf16>, vector<2x32xf32> -> vector<2x32xf32>
    %93 = vector.broadcast %5 : vector<1x32xf32> to vector<2x32xf32>
    %94 = arith.addf %92, %93 : vector<2x32xf32>
    %95 = arith.index_cast %c2_i32 : i32 to index
    %c0_38 = arith.constant 0 : index
    %c0_39 = arith.constant 0 : index
    %96 = vector.load %arg1[%95, %c0_38, %c0_39] : memref<7x2x32xf32, #tpu.memory_space<vmem>>, vector<1x2x32xf32>
    %97 = vector.shape_cast %96 : vector<1x2x32xf32> to vector<2x32xf32>
    %98 = arith.addf %97, %88 : vector<2x32xf32>
    %99 = arith.negf %98 : vector<2x32xf32>
    %100 = math.exp %99 : vector<2x32xf32>
    %cst_40 = arith.constant 1.000000e+00 : f32
    %101 = vector.broadcast %cst_40 : f32 to vector<2x32xf32>
    %102 = arith.addf %101, %100 : vector<2x32xf32>
    %103 = arith.divf %101, %102 : vector<2x32xf32>
    %104 = arith.index_cast %c2_i32 : i32 to index
    %c0_41 = arith.constant 0 : index
    %c0_42 = arith.constant 0 : index
    %105 = vector.load %arg2[%104, %c0_41, %c0_42] : memref<7x2x32xf32, #tpu.memory_space<vmem>>, vector<1x2x32xf32>
    %106 = vector.shape_cast %105 : vector<1x2x32xf32> to vector<2x32xf32>
    %107 = arith.addf %106, %91 : vector<2x32xf32>
    %108 = arith.negf %107 : vector<2x32xf32>
    %109 = math.exp %108 : vector<2x32xf32>
    %cst_43 = arith.constant 1.000000e+00 : f32
    %110 = vector.broadcast %cst_43 : f32 to vector<2x32xf32>
    %111 = arith.addf %110, %109 : vector<2x32xf32>
    %112 = arith.divf %110, %111 : vector<2x32xf32>
    %113 = arith.index_cast %c2_i32 : i32 to index
    %c0_44 = arith.constant 0 : index
    %c0_45 = arith.constant 0 : index
    %114 = vector.load %arg3[%113, %c0_44, %c0_45] : memref<7x2x32xf32, #tpu.memory_space<vmem>>, vector<1x2x32xf32>
    %115 = vector.shape_cast %114 : vector<1x2x32xf32> to vector<2x32xf32>
    %116 = arith.mulf %103, %94 : vector<2x32xf32>
    %117 = arith.addf %115, %116 : vector<2x32xf32>
    %118 = math.tanh %117 : vector<2x32xf32>
    %cst_46 = arith.constant 1.000000e+00 : f32
    %119 = vector.broadcast %cst_46 : f32 to vector<2x32xf32>
    %120 = arith.subf %119, %112 : vector<2x32xf32>
    %121 = arith.mulf %120, %118 : vector<2x32xf32>
    %122 = arith.mulf %112, %84 : vector<2x32xf32>
    %123 = arith.addf %121, %122 : vector<2x32xf32>
    %c3_i32 = arith.constant 3 : i32
    %124 = arith.truncf %123 : vector<2x32xf32> to vector<2x32xbf16>
    %cst_47 = arith.constant dense<0.000000e+00> : vector<2x32xf32>
    %125 = tpu.matmul %124, %0, %cst_47 {dimension_numbers = #tpu.dot_dimension_numbers<[1], [0], [0], [1], [0, 0, 1, 1], [], []>} : vector<2x32xbf16>, vector<32x32xbf16>, vector<2x32xf32> -> vector<2x32xf32>
    %126 = vector.broadcast %3 : vector<1x32xf32> to vector<2x32xf32>
    %127 = arith.addf %125, %126 : vector<2x32xf32>
    %cst_48 = arith.constant dense<0.000000e+00> : vector<2x32xf32>
    %128 = tpu.matmul %124, %1, %cst_48 {dimension_numbers = #tpu.dot_dimension_numbers<[1], [0], [0], [1], [0, 0, 1, 1], [], []>} : vector<2x32xbf16>, vector<32x32xbf16>, vector<2x32xf32> -> vector<2x32xf32>
    %129 = vector.broadcast %4 : vector<1x32xf32> to vector<2x32xf32>
    %130 = arith.addf %128, %129 : vector<2x32xf32>
    %cst_49 = arith.constant dense<0.000000e+00> : vector<2x32xf32>
    %131 = tpu.matmul %124, %2, %cst_49 {dimension_numbers = #tpu.dot_dimension_numbers<[1], [0], [0], [1], [0, 0, 1, 1], [], []>} : vector<2x32xbf16>, vector<32x32xbf16>, vector<2x32xf32> -> vector<2x32xf32>
    %132 = vector.broadcast %5 : vector<1x32xf32> to vector<2x32xf32>
    %133 = arith.addf %131, %132 : vector<2x32xf32>
    %134 = arith.index_cast %c3_i32 : i32 to index
    %c0_50 = arith.constant 0 : index
    %c0_51 = arith.constant 0 : index
    %135 = vector.load %arg1[%134, %c0_50, %c0_51] : memref<7x2x32xf32, #tpu.memory_space<vmem>>, vector<1x2x32xf32>
    %136 = vector.shape_cast %135 : vector<1x2x32xf32> to vector<2x32xf32>
    %137 = arith.addf %136, %127 : vector<2x32xf32>
    %138 = arith.negf %137 : vector<2x32xf32>
    %139 = math.exp %138 : vector<2x32xf32>
    %cst_52 = arith.constant 1.000000e+00 : f32
    %140 = vector.broadcast %cst_52 : f32 to vector<2x32xf32>
    %141 = arith.addf %140, %139 : vector<2x32xf32>
    %142 = arith.divf %140, %141 : vector<2x32xf32>
    %143 = arith.index_cast %c3_i32 : i32 to index
    %c0_53 = arith.constant 0 : index
    %c0_54 = arith.constant 0 : index
    %144 = vector.load %arg2[%143, %c0_53, %c0_54] : memref<7x2x32xf32, #tpu.memory_space<vmem>>, vector<1x2x32xf32>
    %145 = vector.shape_cast %144 : vector<1x2x32xf32> to vector<2x32xf32>
    %146 = arith.addf %145, %130 : vector<2x32xf32>
    %147 = arith.negf %146 : vector<2x32xf32>
    %148 = math.exp %147 : vector<2x32xf32>
    %cst_55 = arith.constant 1.000000e+00 : f32
    %149 = vector.broadcast %cst_55 : f32 to vector<2x32xf32>
    %150 = arith.addf %149, %148 : vector<2x32xf32>
    %151 = arith.divf %149, %150 : vector<2x32xf32>
    %152 = arith.index_cast %c3_i32 : i32 to index
    %c0_56 = arith.constant 0 : index
    %c0_57 = arith.constant 0 : index
    %153 = vector.load %arg3[%152, %c0_56, %c0_57] : memref<7x2x32xf32, #tpu.memory_space<vmem>>, vector<1x2x32xf32>
    %154 = vector.shape_cast %153 : vector<1x2x32xf32> to vector<2x32xf32>
    %155 = arith.mulf %142, %133 : vector<2x32xf32>
    %156 = arith.addf %154, %155 : vector<2x32xf32>
    %157 = math.tanh %156 : vector<2x32xf32>
    %cst_58 = arith.constant 1.000000e+00 : f32
    %158 = vector.broadcast %cst_58 : f32 to vector<2x32xf32>
    %159 = arith.subf %158, %151 : vector<2x32xf32>
    %160 = arith.mulf %159, %157 : vector<2x32xf32>
    %161 = arith.mulf %151, %123 : vector<2x32xf32>
    %162 = arith.addf %160, %161 : vector<2x32xf32>
    %c4_i32 = arith.constant 4 : i32
    %163 = arith.truncf %162 : vector<2x32xf32> to vector<2x32xbf16>
    %cst_59 = arith.constant dense<0.000000e+00> : vector<2x32xf32>
    %164 = tpu.matmul %163, %0, %cst_59 {dimension_numbers = #tpu.dot_dimension_numbers<[1], [0], [0], [1], [0, 0, 1, 1], [], []>} : vector<2x32xbf16>, vector<32x32xbf16>, vector<2x32xf32> -> vector<2x32xf32>
    %165 = vector.broadcast %3 : vector<1x32xf32> to vector<2x32xf32>
    %166 = arith.addf %164, %165 : vector<2x32xf32>
    %cst_60 = arith.constant dense<0.000000e+00> : vector<2x32xf32>
    %167 = tpu.matmul %163, %1, %cst_60 {dimension_numbers = #tpu.dot_dimension_numbers<[1], [0], [0], [1], [0, 0, 1, 1], [], []>} : vector<2x32xbf16>, vector<32x32xbf16>, vector<2x32xf32> -> vector<2x32xf32>
    %168 = vector.broadcast %4 : vector<1x32xf32> to vector<2x32xf32>
    %169 = arith.addf %167, %168 : vector<2x32xf32>
    %cst_61 = arith.constant dense<0.000000e+00> : vector<2x32xf32>
    %170 = tpu.matmul %163, %2, %cst_61 {dimension_numbers = #tpu.dot_dimension_numbers<[1], [0], [0], [1], [0, 0, 1, 1], [], []>} : vector<2x32xbf16>, vector<32x32xbf16>, vector<2x32xf32> -> vector<2x32xf32>
    %171 = vector.broadcast %5 : vector<1x32xf32> to vector<2x32xf32>
    %172 = arith.addf %170, %171 : vector<2x32xf32>
    %173 = arith.index_cast %c4_i32 : i32 to index
    %c0_62 = arith.constant 0 : index
    %c0_63 = arith.constant 0 : index
    %174 = vector.load %arg1[%173, %c0_62, %c0_63] : memref<7x2x32xf32, #tpu.memory_space<vmem>>, vector<1x2x32xf32>
    %175 = vector.shape_cast %174 : vector<1x2x32xf32> to vector<2x32xf32>
    %176 = arith.addf %175, %166 : vector<2x32xf32>
    %177 = arith.negf %176 : vector<2x32xf32>
    %178 = math.exp %177 : vector<2x32xf32>
    %cst_64 = arith.constant 1.000000e+00 : f32
    %179 = vector.broadcast %cst_64 : f32 to vector<2x32xf32>
    %180 = arith.addf %179, %178 : vector<2x32xf32>
    %181 = arith.divf %179, %180 : vector<2x32xf32>
    %182 = arith.index_cast %c4_i32 : i32 to index
    %c0_65 = arith.constant 0 : index
    %c0_66 = arith.constant 0 : index
    %183 = vector.load %arg2[%182, %c0_65, %c0_66] : memref<7x2x32xf32, #tpu.memory_space<vmem>>, vector<1x2x32xf32>
    %184 = vector.shape_cast %183 : vector<1x2x32xf32> to vector<2x32xf32>
    %185 = arith.addf %184, %169 : vector<2x32xf32>
    %186 = arith.negf %185 : vector<2x32xf32>
    %187 = math.exp %186 : vector<2x32xf32>
    %cst_67 = arith.constant 1.000000e+00 : f32
    %188 = vector.broadcast %cst_67 : f32 to vector<2x32xf32>
    %189 = arith.addf %188, %187 : vector<2x32xf32>
    %190 = arith.divf %188, %189 : vector<2x32xf32>
    %191 = arith.index_cast %c4_i32 : i32 to index
    %c0_68 = arith.constant 0 : index
    %c0_69 = arith.constant 0 : index
    %192 = vector.load %arg3[%191, %c0_68, %c0_69] : memref<7x2x32xf32, #tpu.memory_space<vmem>>, vector<1x2x32xf32>
    %193 = vector.shape_cast %192 : vector<1x2x32xf32> to vector<2x32xf32>
    %194 = arith.mulf %181, %172 : vector<2x32xf32>
    %195 = arith.addf %193, %194 : vector<2x32xf32>
    %196 = math.tanh %195 : vector<2x32xf32>
    %cst_70 = arith.constant 1.000000e+00 : f32
    %197 = vector.broadcast %cst_70 : f32 to vector<2x32xf32>
    %198 = arith.subf %197, %190 : vector<2x32xf32>
    %199 = arith.mulf %198, %196 : vector<2x32xf32>
    %200 = arith.mulf %190, %162 : vector<2x32xf32>
    %201 = arith.addf %199, %200 : vector<2x32xf32>
    %c5_i32 = arith.constant 5 : i32
    %202 = arith.truncf %201 : vector<2x32xf32> to vector<2x32xbf16>
    %cst_71 = arith.constant dense<0.000000e+00> : vector<2x32xf32>
    %203 = tpu.matmul %202, %0, %cst_71 {dimension_numbers = #tpu.dot_dimension_numbers<[1], [0], [0], [1], [0, 0, 1, 1], [], []>} : vector<2x32xbf16>, vector<32x32xbf16>, vector<2x32xf32> -> vector<2x32xf32>
    %204 = vector.broadcast %3 : vector<1x32xf32> to vector<2x32xf32>
    %205 = arith.addf %203, %204 : vector<2x32xf32>
    %cst_72 = arith.constant dense<0.000000e+00> : vector<2x32xf32>
    %206 = tpu.matmul %202, %1, %cst_72 {dimension_numbers = #tpu.dot_dimension_numbers<[1], [0], [0], [1], [0, 0, 1, 1], [], []>} : vector<2x32xbf16>, vector<32x32xbf16>, vector<2x32xf32> -> vector<2x32xf32>
    %207 = vector.broadcast %4 : vector<1x32xf32> to vector<2x32xf32>
    %208 = arith.addf %206, %207 : vector<2x32xf32>
    %cst_73 = arith.constant dense<0.000000e+00> : vector<2x32xf32>
    %209 = tpu.matmul %202, %2, %cst_73 {dimension_numbers = #tpu.dot_dimension_numbers<[1], [0], [0], [1], [0, 0, 1, 1], [], []>} : vector<2x32xbf16>, vector<32x32xbf16>, vector<2x32xf32> -> vector<2x32xf32>
    %210 = vector.broadcast %5 : vector<1x32xf32> to vector<2x32xf32>
    %211 = arith.addf %209, %210 : vector<2x32xf32>
    %212 = arith.index_cast %c5_i32 : i32 to index
    %c0_74 = arith.constant 0 : index
    %c0_75 = arith.constant 0 : index
    %213 = vector.load %arg1[%212, %c0_74, %c0_75] : memref<7x2x32xf32, #tpu.memory_space<vmem>>, vector<1x2x32xf32>
    %214 = vector.shape_cast %213 : vector<1x2x32xf32> to vector<2x32xf32>
    %215 = arith.addf %214, %205 : vector<2x32xf32>
    %216 = arith.negf %215 : vector<2x32xf32>
    %217 = math.exp %216 : vector<2x32xf32>
    %cst_76 = arith.constant 1.000000e+00 : f32
    %218 = vector.broadcast %cst_76 : f32 to vector<2x32xf32>
    %219 = arith.addf %218, %217 : vector<2x32xf32>
    %220 = arith.divf %218, %219 : vector<2x32xf32>
    %221 = arith.index_cast %c5_i32 : i32 to index
    %c0_77 = arith.constant 0 : index
    %c0_78 = arith.constant 0 : index
    %222 = vector.load %arg2[%221, %c0_77, %c0_78] : memref<7x2x32xf32, #tpu.memory_space<vmem>>, vector<1x2x32xf32>
    %223 = vector.shape_cast %222 : vector<1x2x32xf32> to vector<2x32xf32>
    %224 = arith.addf %223, %208 : vector<2x32xf32>
    %225 = arith.negf %224 : vector<2x32xf32>
    %226 = math.exp %225 : vector<2x32xf32>
    %cst_79 = arith.constant 1.000000e+00 : f32
    %227 = vector.broadcast %cst_79 : f32 to vector<2x32xf32>
    %228 = arith.addf %227, %226 : vector<2x32xf32>
    %229 = arith.divf %227, %228 : vector<2x32xf32>
    %230 = arith.index_cast %c5_i32 : i32 to index
    %c0_80 = arith.constant 0 : index
    %c0_81 = arith.constant 0 : index
    %231 = vector.load %arg3[%230, %c0_80, %c0_81] : memref<7x2x32xf32, #tpu.memory_space<vmem>>, vector<1x2x32xf32>
    %232 = vector.shape_cast %231 : vector<1x2x32xf32> to vector<2x32xf32>
    %233 = arith.mulf %220, %211 : vector<2x32xf32>
    %234 = arith.addf %232, %233 : vector<2x32xf32>
    %235 = math.tanh %234 : vector<2x32xf32>
    %cst_82 = arith.constant 1.000000e+00 : f32
    %236 = vector.broadcast %cst_82 : f32 to vector<2x32xf32>
    %237 = arith.subf %236, %229 : vector<2x32xf32>
    %238 = arith.mulf %237, %235 : vector<2x32xf32>
    %239 = arith.mulf %229, %201 : vector<2x32xf32>
    %240 = arith.addf %238, %239 : vector<2x32xf32>
    %c6_i32 = arith.constant 6 : i32
    %241 = arith.truncf %240 : vector<2x32xf32> to vector<2x32xbf16>
    %cst_83 = arith.constant dense<0.000000e+00> : vector<2x32xf32>
    %242 = tpu.matmul %241, %0, %cst_83 {dimension_numbers = #tpu.dot_dimension_numbers<[1], [0], [0], [1], [0, 0, 1, 1], [], []>} : vector<2x32xbf16>, vector<32x32xbf16>, vector<2x32xf32> -> vector<2x32xf32>
    %243 = vector.broadcast %3 : vector<1x32xf32> to vector<2x32xf32>
    %244 = arith.addf %242, %243 : vector<2x32xf32>
    %cst_84 = arith.constant dense<0.000000e+00> : vector<2x32xf32>
    %245 = tpu.matmul %241, %1, %cst_84 {dimension_numbers = #tpu.dot_dimension_numbers<[1], [0], [0], [1], [0, 0, 1, 1], [], []>} : vector<2x32xbf16>, vector<32x32xbf16>, vector<2x32xf32> -> vector<2x32xf32>
    %246 = vector.broadcast %4 : vector<1x32xf32> to vector<2x32xf32>
    %247 = arith.addf %245, %246 : vector<2x32xf32>
    %cst_85 = arith.constant dense<0.000000e+00> : vector<2x32xf32>
    %248 = tpu.matmul %241, %2, %cst_85 {dimension_numbers = #tpu.dot_dimension_numbers<[1], [0], [0], [1], [0, 0, 1, 1], [], []>} : vector<2x32xbf16>, vector<32x32xbf16>, vector<2x32xf32> -> vector<2x32xf32>
    %249 = vector.broadcast %5 : vector<1x32xf32> to vector<2x32xf32>
    %250 = arith.addf %248, %249 : vector<2x32xf32>
    %251 = arith.index_cast %c6_i32 : i32 to index
    %c0_86 = arith.constant 0 : index
    %c0_87 = arith.constant 0 : index
    %252 = vector.load %arg1[%251, %c0_86, %c0_87] : memref<7x2x32xf32, #tpu.memory_space<vmem>>, vector<1x2x32xf32>
    %253 = vector.shape_cast %252 : vector<1x2x32xf32> to vector<2x32xf32>
    %254 = arith.addf %253, %244 : vector<2x32xf32>
    %255 = arith.negf %254 : vector<2x32xf32>
    %256 = math.exp %255 : vector<2x32xf32>
    %cst_88 = arith.constant 1.000000e+00 : f32
    %257 = vector.broadcast %cst_88 : f32 to vector<2x32xf32>
    %258 = arith.addf %257, %256 : vector<2x32xf32>
    %259 = arith.divf %257, %258 : vector<2x32xf32>
    %260 = arith.index_cast %c6_i32 : i32 to index
    %c0_89 = arith.constant 0 : index
    %c0_90 = arith.constant 0 : index
    %261 = vector.load %arg2[%260, %c0_89, %c0_90] : memref<7x2x32xf32, #tpu.memory_space<vmem>>, vector<1x2x32xf32>
    %262 = vector.shape_cast %261 : vector<1x2x32xf32> to vector<2x32xf32>
    %263 = arith.addf %262, %247 : vector<2x32xf32>
    %264 = arith.negf %263 : vector<2x32xf32>
    %265 = math.exp %264 : vector<2x32xf32>
    %cst_91 = arith.constant 1.000000e+00 : f32
    %266 = vector.broadcast %cst_91 : f32 to vector<2x32xf32>
    %267 = arith.addf %266, %265 : vector<2x32xf32>
    %268 = arith.divf %266, %267 : vector<2x32xf32>
    %269 = arith.index_cast %c6_i32 : i32 to index
    %c0_92 = arith.constant 0 : index
    %c0_93 = arith.constant 0 : index
    %270 = vector.load %arg3[%269, %c0_92, %c0_93] : memref<7x2x32xf32, #tpu.memory_space<vmem>>, vector<1x2x32xf32>
    %271 = vector.shape_cast %270 : vector<1x2x32xf32> to vector<2x32xf32>
    %272 = arith.mulf %259, %250 : vector<2x32xf32>
    %273 = arith.addf %271, %272 : vector<2x32xf32>
    %274 = math.tanh %273 : vector<2x32xf32>
    %cst_94 = arith.constant 1.000000e+00 : f32
    %275 = vector.broadcast %cst_94 : f32 to vector<2x32xf32>
    %276 = arith.subf %275, %268 : vector<2x32xf32>
    %277 = arith.mulf %276, %274 : vector<2x32xf32>
    %278 = arith.mulf %268, %240 : vector<2x32xf32>
    %279 = arith.addf %277, %278 : vector<2x32xf32>
    %c7_i32 = arith.constant 7 : i32
    %c0_95 = arith.constant 0 : index
    %c0_96 = arith.constant 0 : index
    %280 = vector.load %arg10[%c0_95, %c0_96] : memref<2x32xf32, #tpu.memory_space<vmem>>, vector<2x32xf32>
    tpu.vector_store %arg10[%c0_95, %c0_96], %279 {strides = array<i32>} : memref<2x32xf32, #tpu.memory_space<vmem>>, vector<2x32xf32>,
    return
  }
  func.func @transform_0(%arg0: i32) -> (i32, i32, i32) {
    %c0_i32 = arith.constant 0 : i32
    %c0_i32_0 = arith.constant 0 : i32
    %c0_i32_1 = arith.constant 0 : i32
    %c0_i32_2 = arith.constant 0 : i32
    return %c0_i32, %c0_i32_0, %c0_i32_1 : i32, i32, i32
  }
  func.func @transform_1(%arg0: i32) -> (i32, i32, i32) {
    %c0_i32 = arith.constant 0 : i32
    %c0_i32_0 = arith.constant 0 : i32
    %c0_i32_1 = arith.constant 0 : i32
    %c0_i32_2 = arith.constant 0 : i32
    return %c0_i32, %c0_i32_0, %c0_i32_1 : i32, i32, i32
  }
  func.func @transform_2(%arg0: i32) -> (i32, i32, i32) {
    %c0_i32 = arith.constant 0 : i32
    %c0_i32_0 = arith.constant 0 : i32
    %c0_i32_1 = arith.constant 0 : i32
    %c0_i32_2 = arith.constant 0 : i32
    return %c0_i32, %c0_i32_0, %c0_i32_1 : i32, i32, i32
  }
  func.func @transform_3(%arg0: i32) -> (i32, i32) {
    %c0_i32 = arith.constant 0 : i32
    %c0_i32_0 = arith.constant 0 : i32
    %c0_i32_1 = arith.constant 0 : i32
    return %c0_i32, %c0_i32_0 : i32, i32
  }
  func.func @transform_4(%arg0: i32) -> (i32, i32) {
    %c0_i32 = arith.constant 0 : i32
    %c0_i32_0 = arith.constant 0 : i32
    %c0_i32_1 = arith.constant 0 : i32
    return %c0_i32, %c0_i32_0 : i32, i32
  }
  func.func @transform_5(%arg0: i32) -> (i32, i32) {
    %c0_i32 = arith.constant 0 : i32
    %c0_i32_0 = arith.constant 0 : i32
    %c0_i32_1 = arith.constant 0 : i32
    return %c0_i32, %c0_i32_0 : i32, i32
  }
  func.func @transform_6(%arg0: i32) -> (i32, i32) {
    %c0_i32 = arith.constant 0 : i32
    %c0_i32_0 = arith.constant 0 : i32
    %c0_i32_1 = arith.constant 0 : i32
    return %c0_i32, %c0_i32_0 : i32, i32
  }
  func.func @transform_7(%arg0: i32) -> (i32, i32) {
    %c0_i32 = arith.constant 0 : i32
    %c0_i32_0 = arith.constant 0 : i32
    %c0_i32_1 = arith.constant 0 : i32
    return %c0_i32, %c0_i32_0 : i32, i32
  }
  func.func @transform_8(%arg0: i32) -> (i32, i32) {
    %c0_i32 = arith.constant 0 : i32
    %c0_i32_0 = arith.constant 0 : i32
    %c0_i32_1 = arith.constant 0 : i32
    return %c0_i32, %c0_i32_0 : i32, i32
  }
  func.func @transform_9(%arg0: i32) -> (i32, i32) {
    %c0_i32 = arith.constant 0 : i32
    %c0_i32_0 = arith.constant 0 : i32
    %c0_i32_1 = arith.constant 0 : i32
    return %c0_i32, %c0_i32_0 : i32, i32
  }
}

module attributes {stable_mosaic.version = 11 : i64} {
  func.func @decoder_fused_kernel(%arg0: i32, %arg1: memref<8xi32, #tpu.memory_space<smem>>, %arg2: memref<8x2x32xf32, #tpu.memory_space<vmem>>, %arg3: memref<8x2x32xf32, #tpu.memory_space<vmem>>, %arg4: memref<8x2x32xf32, #tpu.memory_space<vmem>>, %arg5: memref<128x32xbf16, #tpu.memory_space<vmem>>, %arg6: memref<128x32xbf16, #tpu.memory_space<vmem>>, %arg7: memref<128x32xbf16, #tpu.memory_space<vmem>>, %arg8: memref<32x32xbf16, #tpu.memory_space<vmem>>, %arg9: memref<32x32xbf16, #tpu.memory_space<vmem>>, %arg10: memref<32x32xbf16, #tpu.memory_space<vmem>>, %arg11: memref<1x32xf32, #tpu.memory_space<vmem>>, %arg12: memref<1x32xf32, #tpu.memory_space<vmem>>, %arg13: memref<1x32xf32, #tpu.memory_space<vmem>>, %arg14: memref<2x32xf32, #tpu.memory_space<vmem>>, %arg15: memref<32x128xbf16, #tpu.memory_space<vmem>>, %arg16: memref<1x128xf32, #tpu.memory_space<vmem>>, %arg17: memref<8x2x128xf32, #tpu.memory_space<vmem>>) attributes {dimension_semantics = [#tpu.dimension_semantics<arbitrary>], iteration_bounds = array<i64: 1>, scalar_prefetch = 1 : i64, scratch_operands = 0 : i64, tpu.core_type = #tpu.core_type<tc>, window_params = [{pipeline_mode = #tpu.pipeline_mode<synchronous>, transform_indices = @transform_0, window_bounds = array<i64: 8, 2, 32>}, {pipeline_mode = #tpu.pipeline_mode<synchronous>, transform_indices = @transform_1, window_bounds = array<i64: 8, 2, 32>}, {pipeline_mode = #tpu.pipeline_mode<synchronous>, transform_indices = @transform_2, window_bounds = array<i64: 8, 2, 32>}, {pipeline_mode = #tpu.pipeline_mode<synchronous>, transform_indices = @transform_3, window_bounds = array<i64: 128, 32>}, {pipeline_mode = #tpu.pipeline_mode<synchronous>, transform_indices = @transform_4, window_bounds = array<i64: 128, 32>}, {pipeline_mode = #tpu.pipeline_mode<synchronous>, transform_indices = @transform_5, window_bounds = array<i64: 128, 32>}, {pipeline_mode = #tpu.pipeline_mode<synchronous>, transform_indices = @transform_6, window_bounds = array<i64: 32, 32>}, {pipeline_mode = #tpu.pipeline_mode<synchronous>, transform_indices = @transform_7, window_bounds = array<i64: 32, 32>}, {pipeline_mode = #tpu.pipeline_mode<synchronous>, transform_indices = @transform_8, window_bounds = array<i64: 32, 32>}, {pipeline_mode = #tpu.pipeline_mode<synchronous>, transform_indices = @transform_9, window_bounds = array<i64: 1, 32>}, {pipeline_mode = #tpu.pipeline_mode<synchronous>, transform_indices = @transform_10, window_bounds = array<i64: 1, 32>}, {pipeline_mode = #tpu.pipeline_mode<synchronous>, transform_indices = @transform_11, window_bounds = array<i64: 1, 32>}, {pipeline_mode = #tpu.pipeline_mode<synchronous>, transform_indices = @transform_12, window_bounds = array<i64: 2, 32>}, {pipeline_mode = #tpu.pipeline_mode<synchronous>, transform_indices = @transform_13, window_bounds = array<i64: 32, 128>}, {pipeline_mode = #tpu.pipeline_mode<synchronous>, transform_indices = @transform_14, window_bounds = array<i64: 1, 128>}, {pipeline_mode = #tpu.pipeline_mode<synchronous>, transform_indices = @transform_15, window_bounds = array<i64: 8, 2, 128>}]} {
    %c0 = arith.constant 0 : index
    %c0_0 = arith.constant 0 : index
    %0 = vector.load %arg14[%c0, %c0_0] : memref<2x32xf32, #tpu.memory_space<vmem>>, vector<2x32xf32>
    %1 = arith.truncf %0 : vector<2x32xf32> to vector<2x32xbf16>
    %c0_1 = arith.constant 0 : index
    %c0_2 = arith.constant 0 : index
    %2 = vector.load %arg8[%c0_1, %c0_2] : memref<32x32xbf16, #tpu.memory_space<vmem>>, vector<32x32xbf16>
    %cst = arith.constant dense<0.000000e+00> : vector<2x32xf32>
    %3 = tpu.matmul %1, %2, %cst {dimension_numbers = #tpu.dot_dimension_numbers<[1], [0], [0], [1], [0, 0, 1, 1], [], []>} : vector<2x32xbf16>, vector<32x32xbf16>, vector<2x32xf32> -> vector<2x32xf32>
    %c0_3 = arith.constant 0 : index
    %c0_4 = arith.constant 0 : index
    %4 = vector.load %arg11[%c0_3, %c0_4] : memref<1x32xf32, #tpu.memory_space<vmem>>, vector<1x32xf32>
    %5 = vector.broadcast %4 : vector<1x32xf32> to vector<2x32xf32>
    %6 = arith.addf %3, %5 : vector<2x32xf32>
    %c0_5 = arith.constant 0 : index
    %c0_6 = arith.constant 0 : index
    %7 = vector.load %arg9[%c0_5, %c0_6] : memref<32x32xbf16, #tpu.memory_space<vmem>>, vector<32x32xbf16>
    %cst_7 = arith.constant dense<0.000000e+00> : vector<2x32xf32>
    %8 = tpu.matmul %1, %7, %cst_7 {dimension_numbers = #tpu.dot_dimension_numbers<[1], [0], [0], [1], [0, 0, 1, 1], [], []>} : vector<2x32xbf16>, vector<32x32xbf16>, vector<2x32xf32> -> vector<2x32xf32>
    %c0_8 = arith.constant 0 : index
    %c0_9 = arith.constant 0 : index
    %9 = vector.load %arg12[%c0_8, %c0_9] : memref<1x32xf32, #tpu.memory_space<vmem>>, vector<1x32xf32>
    %10 = vector.broadcast %9 : vector<1x32xf32> to vector<2x32xf32>
    %11 = arith.addf %8, %10 : vector<2x32xf32>
    %c0_10 = arith.constant 0 : index
    %c0_11 = arith.constant 0 : index
    %12 = vector.load %arg10[%c0_10, %c0_11] : memref<32x32xbf16, #tpu.memory_space<vmem>>, vector<32x32xbf16>
    %cst_12 = arith.constant dense<0.000000e+00> : vector<2x32xf32>
    %13 = tpu.matmul %1, %12, %cst_12 {dimension_numbers = #tpu.dot_dimension_numbers<[1], [0], [0], [1], [0, 0, 1, 1], [], []>} : vector<2x32xbf16>, vector<32x32xbf16>, vector<2x32xf32> -> vector<2x32xf32>
    %c0_13 = arith.constant 0 : index
    %c0_14 = arith.constant 0 : index
    %14 = vector.load %arg13[%c0_13, %c0_14] : memref<1x32xf32, #tpu.memory_space<vmem>>, vector<1x32xf32>
    %15 = vector.broadcast %14 : vector<1x32xf32> to vector<2x32xf32>
    %16 = arith.addf %13, %15 : vector<2x32xf32>
    %c0_15 = arith.constant 0 : index
    %c0_16 = arith.constant 0 : index
    %17 = vector.load %arg5[%c0_15, %c0_16] : memref<128x32xbf16, #tpu.memory_space<vmem>>, vector<128x32xbf16>
    %c0_17 = arith.constant 0 : index
    %c0_18 = arith.constant 0 : index
    %18 = vector.load %arg6[%c0_17, %c0_18] : memref<128x32xbf16, #tpu.memory_space<vmem>>, vector<128x32xbf16>
    %c0_19 = arith.constant 0 : index
    %c0_20 = arith.constant 0 : index
    %19 = vector.load %arg7[%c0_19, %c0_20] : memref<128x32xbf16, #tpu.memory_space<vmem>>, vector<128x32xbf16>
    %c0_21 = arith.constant 0 : index
    %c0_22 = arith.constant 0 : index
    %20 = vector.load %arg15[%c0_21, %c0_22] : memref<32x128xbf16, #tpu.memory_space<vmem>>, vector<32x128xbf16>
    %c0_23 = arith.constant 0 : index
    %c0_24 = arith.constant 0 : index
    %21 = vector.load %arg16[%c0_23, %c0_24] : memref<1x128xf32, #tpu.memory_space<vmem>>, vector<1x128xf32>
    %22 = tpu.iota {dimensions = array<i32: 1>} : vector<2x128xi32>
    %23 = arith.sitofp %22 : vector<2x128xi32> to vector<2x128xf32>
    %cst_25 = arith.constant 0.000000e+00 : f32
    %24 = vector.broadcast %cst_25 : f32 to vector<2x128xf32>
    %c0_26 = arith.constant 0 : index
    %c0_27 = arith.constant 0 : index
    %c0_28 = arith.constant 0 : index
    %25 = vector.load %arg17[%c0_26, %c0_27, %c0_28] : memref<8x2x128xf32, #tpu.memory_space<vmem>>, vector<1x2x128xf32>
    %26 = vector.shape_cast %25 : vector<1x2x128xf32> to vector<2x128xf32>
    %27 = vector.shape_cast %24 : vector<2x128xf32> to vector<1x2x128xf32>
    tpu.vector_store %arg17[%c0_26, %c0_27, %c0_28], %27 {strides = array<i32>} : memref<8x2x128xf32, #tpu.memory_space<vmem>>, vector<1x2x128xf32>,
    %c0_29 = arith.constant 0 : index
    %c0_30 = arith.constant 0 : index
    %c0_31 = arith.constant 0 : index
    %28 = vector.load %arg2[%c0_29, %c0_30, %c0_31] : memref<8x2x32xf32, #tpu.memory_space<vmem>>, vector<1x2x32xf32>
    %29 = vector.shape_cast %28 : vector<1x2x32xf32> to vector<2x32xf32>
    %c0_32 = arith.constant 0 : index
    %c0_33 = arith.constant 0 : index
    %c0_34 = arith.constant 0 : index
    %30 = vector.load %arg3[%c0_32, %c0_33, %c0_34] : memref<8x2x32xf32, #tpu.memory_space<vmem>>, vector<1x2x32xf32>
    %31 = vector.shape_cast %30 : vector<1x2x32xf32> to vector<2x32xf32>
    %c0_35 = arith.constant 0 : index
    %c0_36 = arith.constant 0 : index
    %c0_37 = arith.constant 0 : index
    %32 = vector.load %arg4[%c0_35, %c0_36, %c0_37] : memref<8x2x32xf32, #tpu.memory_space<vmem>>, vector<1x2x32xf32>
    %33 = vector.shape_cast %32 : vector<1x2x32xf32> to vector<2x32xf32>
    %c0_i32 = arith.constant 0 : i32
    %c1_i32 = arith.constant 1 : i32
    %34 = arith.addi %c0_i32, %c1_i32 : i32
    %35 = arith.addf %29, %6 : vector<2x32xf32>
    %36 = arith.negf %35 : vector<2x32xf32>
    %37 = math.exp %36 : vector<2x32xf32>
    %cst_38 = arith.constant 1.000000e+00 : f32
    %38 = vector.broadcast %cst_38 : f32 to vector<2x32xf32>
    %39 = arith.addf %38, %37 : vector<2x32xf32>
    %40 = arith.divf %38, %39 : vector<2x32xf32>
    %41 = arith.addf %31, %11 : vector<2x32xf32>
    %42 = arith.negf %41 : vector<2x32xf32>
    %43 = math.exp %42 : vector<2x32xf32>
    %cst_39 = arith.constant 1.000000e+00 : f32
    %44 = vector.broadcast %cst_39 : f32 to vector<2x32xf32>
    %45 = arith.addf %44, %43 : vector<2x32xf32>
    %46 = arith.divf %44, %45 : vector<2x32xf32>
    %47 = arith.mulf %40, %16 : vector<2x32xf32>
    %48 = arith.addf %33, %47 : vector<2x32xf32>
    %49 = math.tanh %48 : vector<2x32xf32>
    %cst_40 = arith.constant 1.000000e+00 : f32
    %50 = vector.broadcast %cst_40 : f32 to vector<2x32xf32>
    %51 = arith.subf %50, %46 : vector<2x32xf32>
    %52 = arith.mulf %51, %49 : vector<2x32xf32>
    %53 = arith.mulf %46, %0 : vector<2x32xf32>
    %54 = arith.addf %52, %53 : vector<2x32xf32>
    %55 = arith.truncf %54 : vector<2x32xf32> to vector<2x32xbf16>
    %cst_41 = arith.constant dense<0.000000e+00> : vector<2x128xf32>
    %56 = tpu.matmul %55, %20, %cst_41 {dimension_numbers = #tpu.dot_dimension_numbers<[1], [0], [0], [1], [0, 0, 1, 1], [], []>} : vector<2x32xbf16>, vector<32x128xbf16>, vector<2x128xf32> -> vector<2x128xf32>
    %57 = vector.broadcast %21 : vector<1x128xf32> to vector<2x128xf32>
    %58 = arith.addf %56, %57 : vector<2x128xf32>
    %59 = arith.index_cast %34 : i32 to index
    %c0_42 = arith.constant 0 : index
    %c0_43 = arith.constant 0 : index
    %60 = vector.load %arg17[%59, %c0_42, %c0_43] : memref<8x2x128xf32, #tpu.memory_space<vmem>>, vector<1x2x128xf32>
    %61 = vector.shape_cast %60 : vector<1x2x128xf32> to vector<2x128xf32>
    %62 = vector.shape_cast %58 : vector<2x128xf32> to vector<1x2x128xf32>
    tpu.vector_store %arg17[%59, %c0_42, %c0_43], %62 {strides = array<i32>} : memref<8x2x128xf32, #tpu.memory_space<vmem>>, vector<1x2x128xf32>,
    %cst_44 = arith.constant dense<0xFF800000> : vector<2xf32>
    %63 = vector.multi_reduction <maximumf>, %58, %cst_44 [1] : vector<2x128xf32> to vector<2xf32>
    %64 = vector.shape_cast %63 : vector<2xf32> to vector<2x1xf32>
    %65 = vector.broadcast %64 : vector<2x1xf32> to vector<2x128xf32>
    %66 = arith.cmpf oge, %58, %65 : vector<2x128xf32>
    %cst_45 = arith.constant 0.000000e+00 : f32
    %67 = vector.broadcast %cst_45 : f32 to vector<2x128xf32>
    %68 = arith.subf %67, %23 : vector<2x128xf32>
    %cst_46 = arith.constant 0.000000e+00 : f32
    %cst_47 = arith.constant 1.280000e+02 : f32
    %69 = arith.subf %cst_46, %cst_47 : f32
    %70 = vector.broadcast %69 : f32 to vector<2x128xf32>
    %71 = arith.select %66, %68, %70 : vector<2x128xi1>, vector<2x128xf32>
    %cst_48 = arith.constant dense<0xFF800000> : vector<2xf32>
    %72 = vector.multi_reduction <maximumf>, %71, %cst_48 [1] : vector<2x128xf32> to vector<2xf32>
    %73 = vector.shape_cast %72 : vector<2xf32> to vector<2x1xf32>
    %cst_49 = arith.constant 0.000000e+00 : f32
    %74 = vector.broadcast %cst_49 : f32 to vector<2x1xf32>
    %75 = arith.subf %74, %73 : vector<2x1xf32>
    %76 = vector.broadcast %75 : vector<2x1xf32> to vector<2x128xf32>
    %77 = arith.cmpf oeq, %23, %76 : vector<2x128xf32>
    %78 = arith.extui %77 : vector<2x128xi1> to vector<2x128xi32>
    %79 = arith.sitofp %78 : vector<2x128xi32> to vector<2x128xf32>
    %80 = arith.truncf %79 : vector<2x128xf32> to vector<2x128xbf16>
    %cst_50 = arith.constant dense<0.000000e+00> : vector<2x32xf32>
    %81 = tpu.matmul %80, %17, %cst_50 {dimension_numbers = #tpu.dot_dimension_numbers<[1], [0], [0], [1], [0, 0, 1, 1], [], []>} : vector<2x128xbf16>, vector<128x32xbf16>, vector<2x32xf32> -> vector<2x32xf32>
    %cst_51 = arith.constant dense<0.000000e+00> : vector<2x32xf32>
    %82 = tpu.matmul %80, %18, %cst_51 {dimension_numbers = #tpu.dot_dimension_numbers<[1], [0], [0], [1], [0, 0, 1, 1], [], []>} : vector<2x128xbf16>, vector<128x32xbf16>, vector<2x32xf32> -> vector<2x32xf32>
    %cst_52 = arith.constant dense<0.000000e+00> : vector<2x32xf32>
    %83 = tpu.matmul %80, %19, %cst_52 {dimension_numbers = #tpu.dot_dimension_numbers<[1], [0], [0], [1], [0, 0, 1, 1], [], []>} : vector<2x128xbf16>, vector<128x32xbf16>, vector<2x32xf32> -> vector<2x32xf32>
    %84 = arith.index_cast %34 : i32 to index
    %85 = memref.load %arg1[%84] : memref<8xi32, #tpu.memory_space<smem>>
    %86 = arith.sitofp %85 : i32 to f32
    %87 = arith.index_cast %34 : i32 to index
    %c0_53 = arith.constant 0 : index
    %c0_54 = arith.constant 0 : index
    %88 = vector.load %arg2[%87, %c0_53, %c0_54] : memref<8x2x32xf32, #tpu.memory_space<vmem>>, vector<1x2x32xf32>
    %89 = vector.shape_cast %88 : vector<1x2x32xf32> to vector<2x32xf32>
    %90 = vector.broadcast %86 : f32 to vector<2x32xf32>
    %91 = arith.mulf %90, %89 : vector<2x32xf32>
    %cst_55 = arith.constant 1.000000e+00 : f32
    %92 = arith.subf %cst_55, %86 : f32
    %93 = vector.broadcast %92 : f32 to vector<2x32xf32>
    %94 = arith.mulf %93, %81 : vector<2x32xf32>
    %95 = arith.addf %91, %94 : vector<2x32xf32>
    %96 = arith.index_cast %34 : i32 to index
    %c0_56 = arith.constant 0 : index
    %c0_57 = arith.constant 0 : index
    %97 = vector.load %arg3[%96, %c0_56, %c0_57] : memref<8x2x32xf32, #tpu.memory_space<vmem>>, vector<1x2x32xf32>
    %98 = vector.shape_cast %97 : vector<1x2x32xf32> to vector<2x32xf32>
    %99 = vector.broadcast %86 : f32 to vector<2x32xf32>
    %100 = arith.mulf %99, %98 : vector<2x32xf32>
    %cst_58 = arith.constant 1.000000e+00 : f32
    %101 = arith.subf %cst_58, %86 : f32
    %102 = vector.broadcast %101 : f32 to vector<2x32xf32>
    %103 = arith.mulf %102, %82 : vector<2x32xf32>
    %104 = arith.addf %100, %103 : vector<2x32xf32>
    %105 = arith.index_cast %34 : i32 to index
    %c0_59 = arith.constant 0 : index
    %c0_60 = arith.constant 0 : index
    %106 = vector.load %arg4[%105, %c0_59, %c0_60] : memref<8x2x32xf32, #tpu.memory_space<vmem>>, vector<1x2x32xf32>
    %107 = vector.shape_cast %106 : vector<1x2x32xf32> to vector<2x32xf32>
    %108 = vector.broadcast %86 : f32 to vector<2x32xf32>
    %109 = arith.mulf %108, %107 : vector<2x32xf32>
    %cst_61 = arith.constant 1.000000e+00 : f32
    %110 = arith.subf %cst_61, %86 : f32
    %111 = vector.broadcast %110 : f32 to vector<2x32xf32>
    %112 = arith.mulf %111, %83 : vector<2x32xf32>
    %113 = arith.addf %109, %112 : vector<2x32xf32>
    %c1_i32_62 = arith.constant 1 : i32
    %c1_i32_63 = arith.constant 1 : i32
    %114 = arith.addi %c1_i32_62, %c1_i32_63 : i32
    %115 = arith.addf %95, %6 : vector<2x32xf32>
    %116 = arith.negf %115 : vector<2x32xf32>
    %117 = math.exp %116 : vector<2x32xf32>
    %cst_64 = arith.constant 1.000000e+00 : f32
    %118 = vector.broadcast %cst_64 : f32 to vector<2x32xf32>
    %119 = arith.addf %118, %117 : vector<2x32xf32>
    %120 = arith.divf %118, %119 : vector<2x32xf32>
    %121 = arith.addf %104, %11 : vector<2x32xf32>
    %122 = arith.negf %121 : vector<2x32xf32>
    %123 = math.exp %122 : vector<2x32xf32>
    %cst_65 = arith.constant 1.000000e+00 : f32
    %124 = vector.broadcast %cst_65 : f32 to vector<2x32xf32>
    %125 = arith.addf %124, %123 : vector<2x32xf32>
    %126 = arith.divf %124, %125 : vector<2x32xf32>
    %127 = arith.mulf %120, %16 : vector<2x32xf32>
    %128 = arith.addf %113, %127 : vector<2x32xf32>
    %129 = math.tanh %128 : vector<2x32xf32>
    %cst_66 = arith.constant 1.000000e+00 : f32
    %130 = vector.broadcast %cst_66 : f32 to vector<2x32xf32>
    %131 = arith.subf %130, %126 : vector<2x32xf32>
    %132 = arith.mulf %131, %129 : vector<2x32xf32>
    %133 = arith.mulf %126, %0 : vector<2x32xf32>
    %134 = arith.addf %132, %133 : vector<2x32xf32>
    %135 = arith.truncf %134 : vector<2x32xf32> to vector<2x32xbf16>
    %cst_67 = arith.constant dense<0.000000e+00> : vector<2x128xf32>
    %136 = tpu.matmul %135, %20, %cst_67 {dimension_numbers = #tpu.dot_dimension_numbers<[1], [0], [0], [1], [0, 0, 1, 1], [], []>} : vector<2x32xbf16>, vector<32x128xbf16>, vector<2x128xf32> -> vector<2x128xf32>
    %137 = vector.broadcast %21 : vector<1x128xf32> to vector<2x128xf32>
    %138 = arith.addf %136, %137 : vector<2x128xf32>
    %139 = arith.index_cast %114 : i32 to index
    %c0_68 = arith.constant 0 : index
    %c0_69 = arith.constant 0 : index
    %140 = vector.load %arg17[%139, %c0_68, %c0_69] : memref<8x2x128xf32, #tpu.memory_space<vmem>>, vector<1x2x128xf32>
    %141 = vector.shape_cast %140 : vector<1x2x128xf32> to vector<2x128xf32>
    %142 = vector.shape_cast %138 : vector<2x128xf32> to vector<1x2x128xf32>
    tpu.vector_store %arg17[%139, %c0_68, %c0_69], %142 {strides = array<i32>} : memref<8x2x128xf32, #tpu.memory_space<vmem>>, vector<1x2x128xf32>,
    %cst_70 = arith.constant dense<0xFF800000> : vector<2xf32>
    %143 = vector.multi_reduction <maximumf>, %138, %cst_70 [1] : vector<2x128xf32> to vector<2xf32>
    %144 = vector.shape_cast %143 : vector<2xf32> to vector<2x1xf32>
    %145 = vector.broadcast %144 : vector<2x1xf32> to vector<2x128xf32>
    %146 = arith.cmpf oge, %138, %145 : vector<2x128xf32>
    %cst_71 = arith.constant 0.000000e+00 : f32
    %147 = vector.broadcast %cst_71 : f32 to vector<2x128xf32>
    %148 = arith.subf %147, %23 : vector<2x128xf32>
    %cst_72 = arith.constant 0.000000e+00 : f32
    %cst_73 = arith.constant 1.280000e+02 : f32
    %149 = arith.subf %cst_72, %cst_73 : f32
    %150 = vector.broadcast %149 : f32 to vector<2x128xf32>
    %151 = arith.select %146, %148, %150 : vector<2x128xi1>, vector<2x128xf32>
    %cst_74 = arith.constant dense<0xFF800000> : vector<2xf32>
    %152 = vector.multi_reduction <maximumf>, %151, %cst_74 [1] : vector<2x128xf32> to vector<2xf32>
    %153 = vector.shape_cast %152 : vector<2xf32> to vector<2x1xf32>
    %cst_75 = arith.constant 0.000000e+00 : f32
    %154 = vector.broadcast %cst_75 : f32 to vector<2x1xf32>
    %155 = arith.subf %154, %153 : vector<2x1xf32>
    %156 = vector.broadcast %155 : vector<2x1xf32> to vector<2x128xf32>
    %157 = arith.cmpf oeq, %23, %156 : vector<2x128xf32>
    %158 = arith.extui %157 : vector<2x128xi1> to vector<2x128xi32>
    %159 = arith.sitofp %158 : vector<2x128xi32> to vector<2x128xf32>
    %160 = arith.truncf %159 : vector<2x128xf32> to vector<2x128xbf16>
    %cst_76 = arith.constant dense<0.000000e+00> : vector<2x32xf32>
    %161 = tpu.matmul %160, %17, %cst_76 {dimension_numbers = #tpu.dot_dimension_numbers<[1], [0], [0], [1], [0, 0, 1, 1], [], []>} : vector<2x128xbf16>, vector<128x32xbf16>, vector<2x32xf32> -> vector<2x32xf32>
    %cst_77 = arith.constant dense<0.000000e+00> : vector<2x32xf32>
    %162 = tpu.matmul %160, %18, %cst_77 {dimension_numbers = #tpu.dot_dimension_numbers<[1], [0], [0], [1], [0, 0, 1, 1], [], []>} : vector<2x128xbf16>, vector<128x32xbf16>, vector<2x32xf32> -> vector<2x32xf32>
    %cst_78 = arith.constant dense<0.000000e+00> : vector<2x32xf32>
    %163 = tpu.matmul %160, %19, %cst_78 {dimension_numbers = #tpu.dot_dimension_numbers<[1], [0], [0], [1], [0, 0, 1, 1], [], []>} : vector<2x128xbf16>, vector<128x32xbf16>, vector<2x32xf32> -> vector<2x32xf32>
    %164 = arith.index_cast %114 : i32 to index
    %165 = memref.load %arg1[%164] : memref<8xi32, #tpu.memory_space<smem>>
    %166 = arith.sitofp %165 : i32 to f32
    %167 = arith.index_cast %114 : i32 to index
    %c0_79 = arith.constant 0 : index
    %c0_80 = arith.constant 0 : index
    %168 = vector.load %arg2[%167, %c0_79, %c0_80] : memref<8x2x32xf32, #tpu.memory_space<vmem>>, vector<1x2x32xf32>
    %169 = vector.shape_cast %168 : vector<1x2x32xf32> to vector<2x32xf32>
    %170 = vector.broadcast %166 : f32 to vector<2x32xf32>
    %171 = arith.mulf %170, %169 : vector<2x32xf32>
    %cst_81 = arith.constant 1.000000e+00 : f32
    %172 = arith.subf %cst_81, %166 : f32
    %173 = vector.broadcast %172 : f32 to vector<2x32xf32>
    %174 = arith.mulf %173, %161 : vector<2x32xf32>
    %175 = arith.addf %171, %174 : vector<2x32xf32>
    %176 = arith.index_cast %114 : i32 to index
    %c0_82 = arith.constant 0 : index
    %c0_83 = arith.constant 0 : index
    %177 = vector.load %arg3[%176, %c0_82, %c0_83] : memref<8x2x32xf32, #tpu.memory_space<vmem>>, vector<1x2x32xf32>
    %178 = vector.shape_cast %177 : vector<1x2x32xf32> to vector<2x32xf32>
    %179 = vector.broadcast %166 : f32 to vector<2x32xf32>
    %180 = arith.mulf %179, %178 : vector<2x32xf32>
    %cst_84 = arith.constant 1.000000e+00 : f32
    %181 = arith.subf %cst_84, %166 : f32
    %182 = vector.broadcast %181 : f32 to vector<2x32xf32>
    %183 = arith.mulf %182, %162 : vector<2x32xf32>
    %184 = arith.addf %180, %183 : vector<2x32xf32>
    %185 = arith.index_cast %114 : i32 to index
    %c0_85 = arith.constant 0 : index
    %c0_86 = arith.constant 0 : index
    %186 = vector.load %arg4[%185, %c0_85, %c0_86] : memref<8x2x32xf32, #tpu.memory_space<vmem>>, vector<1x2x32xf32>
    %187 = vector.shape_cast %186 : vector<1x2x32xf32> to vector<2x32xf32>
    %188 = vector.broadcast %166 : f32 to vector<2x32xf32>
    %189 = arith.mulf %188, %187 : vector<2x32xf32>
    %cst_87 = arith.constant 1.000000e+00 : f32
    %190 = arith.subf %cst_87, %166 : f32
    %191 = vector.broadcast %190 : f32 to vector<2x32xf32>
    %192 = arith.mulf %191, %163 : vector<2x32xf32>
    %193 = arith.addf %189, %192 : vector<2x32xf32>
    %c2_i32 = arith.constant 2 : i32
    %c1_i32_88 = arith.constant 1 : i32
    %194 = arith.addi %c2_i32, %c1_i32_88 : i32
    %195 = arith.addf %175, %6 : vector<2x32xf32>
    %196 = arith.negf %195 : vector<2x32xf32>
    %197 = math.exp %196 : vector<2x32xf32>
    %cst_89 = arith.constant 1.000000e+00 : f32
    %198 = vector.broadcast %cst_89 : f32 to vector<2x32xf32>
    %199 = arith.addf %198, %197 : vector<2x32xf32>
    %200 = arith.divf %198, %199 : vector<2x32xf32>
    %201 = arith.addf %184, %11 : vector<2x32xf32>
    %202 = arith.negf %201 : vector<2x32xf32>
    %203 = math.exp %202 : vector<2x32xf32>
    %cst_90 = arith.constant 1.000000e+00 : f32
    %204 = vector.broadcast %cst_90 : f32 to vector<2x32xf32>
    %205 = arith.addf %204, %203 : vector<2x32xf32>
    %206 = arith.divf %204, %205 : vector<2x32xf32>
    %207 = arith.mulf %200, %16 : vector<2x32xf32>
    %208 = arith.addf %193, %207 : vector<2x32xf32>
    %209 = math.tanh %208 : vector<2x32xf32>
    %cst_91 = arith.constant 1.000000e+00 : f32
    %210 = vector.broadcast %cst_91 : f32 to vector<2x32xf32>
    %211 = arith.subf %210, %206 : vector<2x32xf32>
    %212 = arith.mulf %211, %209 : vector<2x32xf32>
    %213 = arith.mulf %206, %0 : vector<2x32xf32>
    %214 = arith.addf %212, %213 : vector<2x32xf32>
    %215 = arith.truncf %214 : vector<2x32xf32> to vector<2x32xbf16>
    %cst_92 = arith.constant dense<0.000000e+00> : vector<2x128xf32>
    %216 = tpu.matmul %215, %20, %cst_92 {dimension_numbers = #tpu.dot_dimension_numbers<[1], [0], [0], [1], [0, 0, 1, 1], [], []>} : vector<2x32xbf16>, vector<32x128xbf16>, vector<2x128xf32> -> vector<2x128xf32>
    %217 = vector.broadcast %21 : vector<1x128xf32> to vector<2x128xf32>
    %218 = arith.addf %216, %217 : vector<2x128xf32>
    %219 = arith.index_cast %194 : i32 to index
    %c0_93 = arith.constant 0 : index
    %c0_94 = arith.constant 0 : index
    %220 = vector.load %arg17[%219, %c0_93, %c0_94] : memref<8x2x128xf32, #tpu.memory_space<vmem>>, vector<1x2x128xf32>
    %221 = vector.shape_cast %220 : vector<1x2x128xf32> to vector<2x128xf32>
    %222 = vector.shape_cast %218 : vector<2x128xf32> to vector<1x2x128xf32>
    tpu.vector_store %arg17[%219, %c0_93, %c0_94], %222 {strides = array<i32>} : memref<8x2x128xf32, #tpu.memory_space<vmem>>, vector<1x2x128xf32>,
    %cst_95 = arith.constant dense<0xFF800000> : vector<2xf32>
    %223 = vector.multi_reduction <maximumf>, %218, %cst_95 [1] : vector<2x128xf32> to vector<2xf32>
    %224 = vector.shape_cast %223 : vector<2xf32> to vector<2x1xf32>
    %225 = vector.broadcast %224 : vector<2x1xf32> to vector<2x128xf32>
    %226 = arith.cmpf oge, %218, %225 : vector<2x128xf32>
    %cst_96 = arith.constant 0.000000e+00 : f32
    %227 = vector.broadcast %cst_96 : f32 to vector<2x128xf32>
    %228 = arith.subf %227, %23 : vector<2x128xf32>
    %cst_97 = arith.constant 0.000000e+00 : f32
    %cst_98 = arith.constant 1.280000e+02 : f32
    %229 = arith.subf %cst_97, %cst_98 : f32
    %230 = vector.broadcast %229 : f32 to vector<2x128xf32>
    %231 = arith.select %226, %228, %230 : vector<2x128xi1>, vector<2x128xf32>
    %cst_99 = arith.constant dense<0xFF800000> : vector<2xf32>
    %232 = vector.multi_reduction <maximumf>, %231, %cst_99 [1] : vector<2x128xf32> to vector<2xf32>
    %233 = vector.shape_cast %232 : vector<2xf32> to vector<2x1xf32>
    %cst_100 = arith.constant 0.000000e+00 : f32
    %234 = vector.broadcast %cst_100 : f32 to vector<2x1xf32>
    %235 = arith.subf %234, %233 : vector<2x1xf32>
    %236 = vector.broadcast %235 : vector<2x1xf32> to vector<2x128xf32>
    %237 = arith.cmpf oeq, %23, %236 : vector<2x128xf32>
    %238 = arith.extui %237 : vector<2x128xi1> to vector<2x128xi32>
    %239 = arith.sitofp %238 : vector<2x128xi32> to vector<2x128xf32>
    %240 = arith.truncf %239 : vector<2x128xf32> to vector<2x128xbf16>
    %cst_101 = arith.constant dense<0.000000e+00> : vector<2x32xf32>
    %241 = tpu.matmul %240, %17, %cst_101 {dimension_numbers = #tpu.dot_dimension_numbers<[1], [0], [0], [1], [0, 0, 1, 1], [], []>} : vector<2x128xbf16>, vector<128x32xbf16>, vector<2x32xf32> -> vector<2x32xf32>
    %cst_102 = arith.constant dense<0.000000e+00> : vector<2x32xf32>
    %242 = tpu.matmul %240, %18, %cst_102 {dimension_numbers = #tpu.dot_dimension_numbers<[1], [0], [0], [1], [0, 0, 1, 1], [], []>} : vector<2x128xbf16>, vector<128x32xbf16>, vector<2x32xf32> -> vector<2x32xf32>
    %cst_103 = arith.constant dense<0.000000e+00> : vector<2x32xf32>
    %243 = tpu.matmul %240, %19, %cst_103 {dimension_numbers = #tpu.dot_dimension_numbers<[1], [0], [0], [1], [0, 0, 1, 1], [], []>} : vector<2x128xbf16>, vector<128x32xbf16>, vector<2x32xf32> -> vector<2x32xf32>
    %244 = arith.index_cast %194 : i32 to index
    %245 = memref.load %arg1[%244] : memref<8xi32, #tpu.memory_space<smem>>
    %246 = arith.sitofp %245 : i32 to f32
    %247 = arith.index_cast %194 : i32 to index
    %c0_104 = arith.constant 0 : index
    %c0_105 = arith.constant 0 : index
    %248 = vector.load %arg2[%247, %c0_104, %c0_105] : memref<8x2x32xf32, #tpu.memory_space<vmem>>, vector<1x2x32xf32>
    %249 = vector.shape_cast %248 : vector<1x2x32xf32> to vector<2x32xf32>
    %250 = vector.broadcast %246 : f32 to vector<2x32xf32>
    %251 = arith.mulf %250, %249 : vector<2x32xf32>
    %cst_106 = arith.constant 1.000000e+00 : f32
    %252 = arith.subf %cst_106, %246 : f32
    %253 = vector.broadcast %252 : f32 to vector<2x32xf32>
    %254 = arith.mulf %253, %241 : vector<2x32xf32>
    %255 = arith.addf %251, %254 : vector<2x32xf32>
    %256 = arith.index_cast %194 : i32 to index
    %c0_107 = arith.constant 0 : index
    %c0_108 = arith.constant 0 : index
    %257 = vector.load %arg3[%256, %c0_107, %c0_108] : memref<8x2x32xf32, #tpu.memory_space<vmem>>, vector<1x2x32xf32>
    %258 = vector.shape_cast %257 : vector<1x2x32xf32> to vector<2x32xf32>
    %259 = vector.broadcast %246 : f32 to vector<2x32xf32>
    %260 = arith.mulf %259, %258 : vector<2x32xf32>
    %cst_109 = arith.constant 1.000000e+00 : f32
    %261 = arith.subf %cst_109, %246 : f32
    %262 = vector.broadcast %261 : f32 to vector<2x32xf32>
    %263 = arith.mulf %262, %242 : vector<2x32xf32>
    %264 = arith.addf %260, %263 : vector<2x32xf32>
    %265 = arith.index_cast %194 : i32 to index
    %c0_110 = arith.constant 0 : index
    %c0_111 = arith.constant 0 : index
    %266 = vector.load %arg4[%265, %c0_110, %c0_111] : memref<8x2x32xf32, #tpu.memory_space<vmem>>, vector<1x2x32xf32>
    %267 = vector.shape_cast %266 : vector<1x2x32xf32> to vector<2x32xf32>
    %268 = vector.broadcast %246 : f32 to vector<2x32xf32>
    %269 = arith.mulf %268, %267 : vector<2x32xf32>
    %cst_112 = arith.constant 1.000000e+00 : f32
    %270 = arith.subf %cst_112, %246 : f32
    %271 = vector.broadcast %270 : f32 to vector<2x32xf32>
    %272 = arith.mulf %271, %243 : vector<2x32xf32>
    %273 = arith.addf %269, %272 : vector<2x32xf32>
    %c3_i32 = arith.constant 3 : i32
    %c1_i32_113 = arith.constant 1 : i32
    %274 = arith.addi %c3_i32, %c1_i32_113 : i32
    %275 = arith.addf %255, %6 : vector<2x32xf32>
    %276 = arith.negf %275 : vector<2x32xf32>
    %277 = math.exp %276 : vector<2x32xf32>
    %cst_114 = arith.constant 1.000000e+00 : f32
    %278 = vector.broadcast %cst_114 : f32 to vector<2x32xf32>
    %279 = arith.addf %278, %277 : vector<2x32xf32>
    %280 = arith.divf %278, %279 : vector<2x32xf32>
    %281 = arith.addf %264, %11 : vector<2x32xf32>
    %282 = arith.negf %281 : vector<2x32xf32>
    %283 = math.exp %282 : vector<2x32xf32>
    %cst_115 = arith.constant 1.000000e+00 : f32
    %284 = vector.broadcast %cst_115 : f32 to vector<2x32xf32>
    %285 = arith.addf %284, %283 : vector<2x32xf32>
    %286 = arith.divf %284, %285 : vector<2x32xf32>
    %287 = arith.mulf %280, %16 : vector<2x32xf32>
    %288 = arith.addf %273, %287 : vector<2x32xf32>
    %289 = math.tanh %288 : vector<2x32xf32>
    %cst_116 = arith.constant 1.000000e+00 : f32
    %290 = vector.broadcast %cst_116 : f32 to vector<2x32xf32>
    %291 = arith.subf %290, %286 : vector<2x32xf32>
    %292 = arith.mulf %291, %289 : vector<2x32xf32>
    %293 = arith.mulf %286, %0 : vector<2x32xf32>
    %294 = arith.addf %292, %293 : vector<2x32xf32>
    %295 = arith.truncf %294 : vector<2x32xf32> to vector<2x32xbf16>
    %cst_117 = arith.constant dense<0.000000e+00> : vector<2x128xf32>
    %296 = tpu.matmul %295, %20, %cst_117 {dimension_numbers = #tpu.dot_dimension_numbers<[1], [0], [0], [1], [0, 0, 1, 1], [], []>} : vector<2x32xbf16>, vector<32x128xbf16>, vector<2x128xf32> -> vector<2x128xf32>
    %297 = vector.broadcast %21 : vector<1x128xf32> to vector<2x128xf32>
    %298 = arith.addf %296, %297 : vector<2x128xf32>
    %299 = arith.index_cast %274 : i32 to index
    %c0_118 = arith.constant 0 : index
    %c0_119 = arith.constant 0 : index
    %300 = vector.load %arg17[%299, %c0_118, %c0_119] : memref<8x2x128xf32, #tpu.memory_space<vmem>>, vector<1x2x128xf32>
    %301 = vector.shape_cast %300 : vector<1x2x128xf32> to vector<2x128xf32>
    %302 = vector.shape_cast %298 : vector<2x128xf32> to vector<1x2x128xf32>
    tpu.vector_store %arg17[%299, %c0_118, %c0_119], %302 {strides = array<i32>} : memref<8x2x128xf32, #tpu.memory_space<vmem>>, vector<1x2x128xf32>,
    %cst_120 = arith.constant dense<0xFF800000> : vector<2xf32>
    %303 = vector.multi_reduction <maximumf>, %298, %cst_120 [1] : vector<2x128xf32> to vector<2xf32>
    %304 = vector.shape_cast %303 : vector<2xf32> to vector<2x1xf32>
    %305 = vector.broadcast %304 : vector<2x1xf32> to vector<2x128xf32>
    %306 = arith.cmpf oge, %298, %305 : vector<2x128xf32>
    %cst_121 = arith.constant 0.000000e+00 : f32
    %307 = vector.broadcast %cst_121 : f32 to vector<2x128xf32>
    %308 = arith.subf %307, %23 : vector<2x128xf32>
    %cst_122 = arith.constant 0.000000e+00 : f32
    %cst_123 = arith.constant 1.280000e+02 : f32
    %309 = arith.subf %cst_122, %cst_123 : f32
    %310 = vector.broadcast %309 : f32 to vector<2x128xf32>
    %311 = arith.select %306, %308, %310 : vector<2x128xi1>, vector<2x128xf32>
    %cst_124 = arith.constant dense<0xFF800000> : vector<2xf32>
    %312 = vector.multi_reduction <maximumf>, %311, %cst_124 [1] : vector<2x128xf32> to vector<2xf32>
    %313 = vector.shape_cast %312 : vector<2xf32> to vector<2x1xf32>
    %cst_125 = arith.constant 0.000000e+00 : f32
    %314 = vector.broadcast %cst_125 : f32 to vector<2x1xf32>
    %315 = arith.subf %314, %313 : vector<2x1xf32>
    %316 = vector.broadcast %315 : vector<2x1xf32> to vector<2x128xf32>
    %317 = arith.cmpf oeq, %23, %316 : vector<2x128xf32>
    %318 = arith.extui %317 : vector<2x128xi1> to vector<2x128xi32>
    %319 = arith.sitofp %318 : vector<2x128xi32> to vector<2x128xf32>
    %320 = arith.truncf %319 : vector<2x128xf32> to vector<2x128xbf16>
    %cst_126 = arith.constant dense<0.000000e+00> : vector<2x32xf32>
    %321 = tpu.matmul %320, %17, %cst_126 {dimension_numbers = #tpu.dot_dimension_numbers<[1], [0], [0], [1], [0, 0, 1, 1], [], []>} : vector<2x128xbf16>, vector<128x32xbf16>, vector<2x32xf32> -> vector<2x32xf32>
    %cst_127 = arith.constant dense<0.000000e+00> : vector<2x32xf32>
    %322 = tpu.matmul %320, %18, %cst_127 {dimension_numbers = #tpu.dot_dimension_numbers<[1], [0], [0], [1], [0, 0, 1, 1], [], []>} : vector<2x128xbf16>, vector<128x32xbf16>, vector<2x32xf32> -> vector<2x32xf32>
    %cst_128 = arith.constant dense<0.000000e+00> : vector<2x32xf32>
    %323 = tpu.matmul %320, %19, %cst_128 {dimension_numbers = #tpu.dot_dimension_numbers<[1], [0], [0], [1], [0, 0, 1, 1], [], []>} : vector<2x128xbf16>, vector<128x32xbf16>, vector<2x32xf32> -> vector<2x32xf32>
    %324 = arith.index_cast %274 : i32 to index
    %325 = memref.load %arg1[%324] : memref<8xi32, #tpu.memory_space<smem>>
    %326 = arith.sitofp %325 : i32 to f32
    %327 = arith.index_cast %274 : i32 to index
    %c0_129 = arith.constant 0 : index
    %c0_130 = arith.constant 0 : index
    %328 = vector.load %arg2[%327, %c0_129, %c0_130] : memref<8x2x32xf32, #tpu.memory_space<vmem>>, vector<1x2x32xf32>
    %329 = vector.shape_cast %328 : vector<1x2x32xf32> to vector<2x32xf32>
    %330 = vector.broadcast %326 : f32 to vector<2x32xf32>
    %331 = arith.mulf %330, %329 : vector<2x32xf32>
    %cst_131 = arith.constant 1.000000e+00 : f32
    %332 = arith.subf %cst_131, %326 : f32
    %333 = vector.broadcast %332 : f32 to vector<2x32xf32>
    %334 = arith.mulf %333, %321 : vector<2x32xf32>
    %335 = arith.addf %331, %334 : vector<2x32xf32>
    %336 = arith.index_cast %274 : i32 to index
    %c0_132 = arith.constant 0 : index
    %c0_133 = arith.constant 0 : index
    %337 = vector.load %arg3[%336, %c0_132, %c0_133] : memref<8x2x32xf32, #tpu.memory_space<vmem>>, vector<1x2x32xf32>
    %338 = vector.shape_cast %337 : vector<1x2x32xf32> to vector<2x32xf32>
    %339 = vector.broadcast %326 : f32 to vector<2x32xf32>
    %340 = arith.mulf %339, %338 : vector<2x32xf32>
    %cst_134 = arith.constant 1.000000e+00 : f32
    %341 = arith.subf %cst_134, %326 : f32
    %342 = vector.broadcast %341 : f32 to vector<2x32xf32>
    %343 = arith.mulf %342, %322 : vector<2x32xf32>
    %344 = arith.addf %340, %343 : vector<2x32xf32>
    %345 = arith.index_cast %274 : i32 to index
    %c0_135 = arith.constant 0 : index
    %c0_136 = arith.constant 0 : index
    %346 = vector.load %arg4[%345, %c0_135, %c0_136] : memref<8x2x32xf32, #tpu.memory_space<vmem>>, vector<1x2x32xf32>
    %347 = vector.shape_cast %346 : vector<1x2x32xf32> to vector<2x32xf32>
    %348 = vector.broadcast %326 : f32 to vector<2x32xf32>
    %349 = arith.mulf %348, %347 : vector<2x32xf32>
    %cst_137 = arith.constant 1.000000e+00 : f32
    %350 = arith.subf %cst_137, %326 : f32
    %351 = vector.broadcast %350 : f32 to vector<2x32xf32>
    %352 = arith.mulf %351, %323 : vector<2x32xf32>
    %353 = arith.addf %349, %352 : vector<2x32xf32>
    %c4_i32 = arith.constant 4 : i32
    %c1_i32_138 = arith.constant 1 : i32
    %354 = arith.addi %c4_i32, %c1_i32_138 : i32
    %355 = arith.addf %335, %6 : vector<2x32xf32>
    %356 = arith.negf %355 : vector<2x32xf32>
    %357 = math.exp %356 : vector<2x32xf32>
    %cst_139 = arith.constant 1.000000e+00 : f32
    %358 = vector.broadcast %cst_139 : f32 to vector<2x32xf32>
    %359 = arith.addf %358, %357 : vector<2x32xf32>
    %360 = arith.divf %358, %359 : vector<2x32xf32>
    %361 = arith.addf %344, %11 : vector<2x32xf32>
    %362 = arith.negf %361 : vector<2x32xf32>
    %363 = math.exp %362 : vector<2x32xf32>
    %cst_140 = arith.constant 1.000000e+00 : f32
    %364 = vector.broadcast %cst_140 : f32 to vector<2x32xf32>
    %365 = arith.addf %364, %363 : vector<2x32xf32>
    %366 = arith.divf %364, %365 : vector<2x32xf32>
    %367 = arith.mulf %360, %16 : vector<2x32xf32>
    %368 = arith.addf %353, %367 : vector<2x32xf32>
    %369 = math.tanh %368 : vector<2x32xf32>
    %cst_141 = arith.constant 1.000000e+00 : f32
    %370 = vector.broadcast %cst_141 : f32 to vector<2x32xf32>
    %371 = arith.subf %370, %366 : vector<2x32xf32>
    %372 = arith.mulf %371, %369 : vector<2x32xf32>
    %373 = arith.mulf %366, %0 : vector<2x32xf32>
    %374 = arith.addf %372, %373 : vector<2x32xf32>
    %375 = arith.truncf %374 : vector<2x32xf32> to vector<2x32xbf16>
    %cst_142 = arith.constant dense<0.000000e+00> : vector<2x128xf32>
    %376 = tpu.matmul %375, %20, %cst_142 {dimension_numbers = #tpu.dot_dimension_numbers<[1], [0], [0], [1], [0, 0, 1, 1], [], []>} : vector<2x32xbf16>, vector<32x128xbf16>, vector<2x128xf32> -> vector<2x128xf32>
    %377 = vector.broadcast %21 : vector<1x128xf32> to vector<2x128xf32>
    %378 = arith.addf %376, %377 : vector<2x128xf32>
    %379 = arith.index_cast %354 : i32 to index
    %c0_143 = arith.constant 0 : index
    %c0_144 = arith.constant 0 : index
    %380 = vector.load %arg17[%379, %c0_143, %c0_144] : memref<8x2x128xf32, #tpu.memory_space<vmem>>, vector<1x2x128xf32>
    %381 = vector.shape_cast %380 : vector<1x2x128xf32> to vector<2x128xf32>
    %382 = vector.shape_cast %378 : vector<2x128xf32> to vector<1x2x128xf32>
    tpu.vector_store %arg17[%379, %c0_143, %c0_144], %382 {strides = array<i32>} : memref<8x2x128xf32, #tpu.memory_space<vmem>>, vector<1x2x128xf32>,
    %cst_145 = arith.constant dense<0xFF800000> : vector<2xf32>
    %383 = vector.multi_reduction <maximumf>, %378, %cst_145 [1] : vector<2x128xf32> to vector<2xf32>
    %384 = vector.shape_cast %383 : vector<2xf32> to vector<2x1xf32>
    %385 = vector.broadcast %384 : vector<2x1xf32> to vector<2x128xf32>
    %386 = arith.cmpf oge, %378, %385 : vector<2x128xf32>
    %cst_146 = arith.constant 0.000000e+00 : f32
    %387 = vector.broadcast %cst_146 : f32 to vector<2x128xf32>
    %388 = arith.subf %387, %23 : vector<2x128xf32>
    %cst_147 = arith.constant 0.000000e+00 : f32
    %cst_148 = arith.constant 1.280000e+02 : f32
    %389 = arith.subf %cst_147, %cst_148 : f32
    %390 = vector.broadcast %389 : f32 to vector<2x128xf32>
    %391 = arith.select %386, %388, %390 : vector<2x128xi1>, vector<2x128xf32>
    %cst_149 = arith.constant dense<0xFF800000> : vector<2xf32>
    %392 = vector.multi_reduction <maximumf>, %391, %cst_149 [1] : vector<2x128xf32> to vector<2xf32>
    %393 = vector.shape_cast %392 : vector<2xf32> to vector<2x1xf32>
    %cst_150 = arith.constant 0.000000e+00 : f32
    %394 = vector.broadcast %cst_150 : f32 to vector<2x1xf32>
    %395 = arith.subf %394, %393 : vector<2x1xf32>
    %396 = vector.broadcast %395 : vector<2x1xf32> to vector<2x128xf32>
    %397 = arith.cmpf oeq, %23, %396 : vector<2x128xf32>
    %398 = arith.extui %397 : vector<2x128xi1> to vector<2x128xi32>
    %399 = arith.sitofp %398 : vector<2x128xi32> to vector<2x128xf32>
    %400 = arith.truncf %399 : vector<2x128xf32> to vector<2x128xbf16>
    %cst_151 = arith.constant dense<0.000000e+00> : vector<2x32xf32>
    %401 = tpu.matmul %400, %17, %cst_151 {dimension_numbers = #tpu.dot_dimension_numbers<[1], [0], [0], [1], [0, 0, 1, 1], [], []>} : vector<2x128xbf16>, vector<128x32xbf16>, vector<2x32xf32> -> vector<2x32xf32>
    %cst_152 = arith.constant dense<0.000000e+00> : vector<2x32xf32>
    %402 = tpu.matmul %400, %18, %cst_152 {dimension_numbers = #tpu.dot_dimension_numbers<[1], [0], [0], [1], [0, 0, 1, 1], [], []>} : vector<2x128xbf16>, vector<128x32xbf16>, vector<2x32xf32> -> vector<2x32xf32>
    %cst_153 = arith.constant dense<0.000000e+00> : vector<2x32xf32>
    %403 = tpu.matmul %400, %19, %cst_153 {dimension_numbers = #tpu.dot_dimension_numbers<[1], [0], [0], [1], [0, 0, 1, 1], [], []>} : vector<2x128xbf16>, vector<128x32xbf16>, vector<2x32xf32> -> vector<2x32xf32>
    %404 = arith.index_cast %354 : i32 to index
    %405 = memref.load %arg1[%404] : memref<8xi32, #tpu.memory_space<smem>>
    %406 = arith.sitofp %405 : i32 to f32
    %407 = arith.index_cast %354 : i32 to index
    %c0_154 = arith.constant 0 : index
    %c0_155 = arith.constant 0 : index
    %408 = vector.load %arg2[%407, %c0_154, %c0_155] : memref<8x2x32xf32, #tpu.memory_space<vmem>>, vector<1x2x32xf32>
    %409 = vector.shape_cast %408 : vector<1x2x32xf32> to vector<2x32xf32>
    %410 = vector.broadcast %406 : f32 to vector<2x32xf32>
    %411 = arith.mulf %410, %409 : vector<2x32xf32>
    %cst_156 = arith.constant 1.000000e+00 : f32
    %412 = arith.subf %cst_156, %406 : f32
    %413 = vector.broadcast %412 : f32 to vector<2x32xf32>
    %414 = arith.mulf %413, %401 : vector<2x32xf32>
    %415 = arith.addf %411, %414 : vector<2x32xf32>
    %416 = arith.index_cast %354 : i32 to index
    %c0_157 = arith.constant 0 : index
    %c0_158 = arith.constant 0 : index
    %417 = vector.load %arg3[%416, %c0_157, %c0_158] : memref<8x2x32xf32, #tpu.memory_space<vmem>>, vector<1x2x32xf32>
    %418 = vector.shape_cast %417 : vector<1x2x32xf32> to vector<2x32xf32>
    %419 = vector.broadcast %406 : f32 to vector<2x32xf32>
    %420 = arith.mulf %419, %418 : vector<2x32xf32>
    %cst_159 = arith.constant 1.000000e+00 : f32
    %421 = arith.subf %cst_159, %406 : f32
    %422 = vector.broadcast %421 : f32 to vector<2x32xf32>
    %423 = arith.mulf %422, %402 : vector<2x32xf32>
    %424 = arith.addf %420, %423 : vector<2x32xf32>
    %425 = arith.index_cast %354 : i32 to index
    %c0_160 = arith.constant 0 : index
    %c0_161 = arith.constant 0 : index
    %426 = vector.load %arg4[%425, %c0_160, %c0_161] : memref<8x2x32xf32, #tpu.memory_space<vmem>>, vector<1x2x32xf32>
    %427 = vector.shape_cast %426 : vector<1x2x32xf32> to vector<2x32xf32>
    %428 = vector.broadcast %406 : f32 to vector<2x32xf32>
    %429 = arith.mulf %428, %427 : vector<2x32xf32>
    %cst_162 = arith.constant 1.000000e+00 : f32
    %430 = arith.subf %cst_162, %406 : f32
    %431 = vector.broadcast %430 : f32 to vector<2x32xf32>
    %432 = arith.mulf %431, %403 : vector<2x32xf32>
    %433 = arith.addf %429, %432 : vector<2x32xf32>
    %c5_i32 = arith.constant 5 : i32
    %c1_i32_163 = arith.constant 1 : i32
    %434 = arith.addi %c5_i32, %c1_i32_163 : i32
    %435 = arith.addf %415, %6 : vector<2x32xf32>
    %436 = arith.negf %435 : vector<2x32xf32>
    %437 = math.exp %436 : vector<2x32xf32>
    %cst_164 = arith.constant 1.000000e+00 : f32
    %438 = vector.broadcast %cst_164 : f32 to vector<2x32xf32>
    %439 = arith.addf %438, %437 : vector<2x32xf32>
    %440 = arith.divf %438, %439 : vector<2x32xf32>
    %441 = arith.addf %424, %11 : vector<2x32xf32>
    %442 = arith.negf %441 : vector<2x32xf32>
    %443 = math.exp %442 : vector<2x32xf32>
    %cst_165 = arith.constant 1.000000e+00 : f32
    %444 = vector.broadcast %cst_165 : f32 to vector<2x32xf32>
    %445 = arith.addf %444, %443 : vector<2x32xf32>
    %446 = arith.divf %444, %445 : vector<2x32xf32>
    %447 = arith.mulf %440, %16 : vector<2x32xf32>
    %448 = arith.addf %433, %447 : vector<2x32xf32>
    %449 = math.tanh %448 : vector<2x32xf32>
    %cst_166 = arith.constant 1.000000e+00 : f32
    %450 = vector.broadcast %cst_166 : f32 to vector<2x32xf32>
    %451 = arith.subf %450, %446 : vector<2x32xf32>
    %452 = arith.mulf %451, %449 : vector<2x32xf32>
    %453 = arith.mulf %446, %0 : vector<2x32xf32>
    %454 = arith.addf %452, %453 : vector<2x32xf32>
    %455 = arith.truncf %454 : vector<2x32xf32> to vector<2x32xbf16>
    %cst_167 = arith.constant dense<0.000000e+00> : vector<2x128xf32>
    %456 = tpu.matmul %455, %20, %cst_167 {dimension_numbers = #tpu.dot_dimension_numbers<[1], [0], [0], [1], [0, 0, 1, 1], [], []>} : vector<2x32xbf16>, vector<32x128xbf16>, vector<2x128xf32> -> vector<2x128xf32>
    %457 = vector.broadcast %21 : vector<1x128xf32> to vector<2x128xf32>
    %458 = arith.addf %456, %457 : vector<2x128xf32>
    %459 = arith.index_cast %434 : i32 to index
    %c0_168 = arith.constant 0 : index
    %c0_169 = arith.constant 0 : index
    %460 = vector.load %arg17[%459, %c0_168, %c0_169] : memref<8x2x128xf32, #tpu.memory_space<vmem>>, vector<1x2x128xf32>
    %461 = vector.shape_cast %460 : vector<1x2x128xf32> to vector<2x128xf32>
    %462 = vector.shape_cast %458 : vector<2x128xf32> to vector<1x2x128xf32>
    tpu.vector_store %arg17[%459, %c0_168, %c0_169], %462 {strides = array<i32>} : memref<8x2x128xf32, #tpu.memory_space<vmem>>, vector<1x2x128xf32>,
    %cst_170 = arith.constant dense<0xFF800000> : vector<2xf32>
    %463 = vector.multi_reduction <maximumf>, %458, %cst_170 [1] : vector<2x128xf32> to vector<2xf32>
    %464 = vector.shape_cast %463 : vector<2xf32> to vector<2x1xf32>
    %465 = vector.broadcast %464 : vector<2x1xf32> to vector<2x128xf32>
    %466 = arith.cmpf oge, %458, %465 : vector<2x128xf32>
    %cst_171 = arith.constant 0.000000e+00 : f32
    %467 = vector.broadcast %cst_171 : f32 to vector<2x128xf32>
    %468 = arith.subf %467, %23 : vector<2x128xf32>
    %cst_172 = arith.constant 0.000000e+00 : f32
    %cst_173 = arith.constant 1.280000e+02 : f32
    %469 = arith.subf %cst_172, %cst_173 : f32
    %470 = vector.broadcast %469 : f32 to vector<2x128xf32>
    %471 = arith.select %466, %468, %470 : vector<2x128xi1>, vector<2x128xf32>
    %cst_174 = arith.constant dense<0xFF800000> : vector<2xf32>
    %472 = vector.multi_reduction <maximumf>, %471, %cst_174 [1] : vector<2x128xf32> to vector<2xf32>
    %473 = vector.shape_cast %472 : vector<2xf32> to vector<2x1xf32>
    %cst_175 = arith.constant 0.000000e+00 : f32
    %474 = vector.broadcast %cst_175 : f32 to vector<2x1xf32>
    %475 = arith.subf %474, %473 : vector<2x1xf32>
    %476 = vector.broadcast %475 : vector<2x1xf32> to vector<2x128xf32>
    %477 = arith.cmpf oeq, %23, %476 : vector<2x128xf32>
    %478 = arith.extui %477 : vector<2x128xi1> to vector<2x128xi32>
    %479 = arith.sitofp %478 : vector<2x128xi32> to vector<2x128xf32>
    %480 = arith.truncf %479 : vector<2x128xf32> to vector<2x128xbf16>
    %cst_176 = arith.constant dense<0.000000e+00> : vector<2x32xf32>
    %481 = tpu.matmul %480, %17, %cst_176 {dimension_numbers = #tpu.dot_dimension_numbers<[1], [0], [0], [1], [0, 0, 1, 1], [], []>} : vector<2x128xbf16>, vector<128x32xbf16>, vector<2x32xf32> -> vector<2x32xf32>
    %cst_177 = arith.constant dense<0.000000e+00> : vector<2x32xf32>
    %482 = tpu.matmul %480, %18, %cst_177 {dimension_numbers = #tpu.dot_dimension_numbers<[1], [0], [0], [1], [0, 0, 1, 1], [], []>} : vector<2x128xbf16>, vector<128x32xbf16>, vector<2x32xf32> -> vector<2x32xf32>
    %cst_178 = arith.constant dense<0.000000e+00> : vector<2x32xf32>
    %483 = tpu.matmul %480, %19, %cst_178 {dimension_numbers = #tpu.dot_dimension_numbers<[1], [0], [0], [1], [0, 0, 1, 1], [], []>} : vector<2x128xbf16>, vector<128x32xbf16>, vector<2x32xf32> -> vector<2x32xf32>
    %484 = arith.index_cast %434 : i32 to index
    %485 = memref.load %arg1[%484] : memref<8xi32, #tpu.memory_space<smem>>
    %486 = arith.sitofp %485 : i32 to f32
    %487 = arith.index_cast %434 : i32 to index
    %c0_179 = arith.constant 0 : index
    %c0_180 = arith.constant 0 : index
    %488 = vector.load %arg2[%487, %c0_179, %c0_180] : memref<8x2x32xf32, #tpu.memory_space<vmem>>, vector<1x2x32xf32>
    %489 = vector.shape_cast %488 : vector<1x2x32xf32> to vector<2x32xf32>
    %490 = vector.broadcast %486 : f32 to vector<2x32xf32>
    %491 = arith.mulf %490, %489 : vector<2x32xf32>
    %cst_181 = arith.constant 1.000000e+00 : f32
    %492 = arith.subf %cst_181, %486 : f32
    %493 = vector.broadcast %492 : f32 to vector<2x32xf32>
    %494 = arith.mulf %493, %481 : vector<2x32xf32>
    %495 = arith.addf %491, %494 : vector<2x32xf32>
    %496 = arith.index_cast %434 : i32 to index
    %c0_182 = arith.constant 0 : index
    %c0_183 = arith.constant 0 : index
    %497 = vector.load %arg3[%496, %c0_182, %c0_183] : memref<8x2x32xf32, #tpu.memory_space<vmem>>, vector<1x2x32xf32>
    %498 = vector.shape_cast %497 : vector<1x2x32xf32> to vector<2x32xf32>
    %499 = vector.broadcast %486 : f32 to vector<2x32xf32>
    %500 = arith.mulf %499, %498 : vector<2x32xf32>
    %cst_184 = arith.constant 1.000000e+00 : f32
    %501 = arith.subf %cst_184, %486 : f32
    %502 = vector.broadcast %501 : f32 to vector<2x32xf32>
    %503 = arith.mulf %502, %482 : vector<2x32xf32>
    %504 = arith.addf %500, %503 : vector<2x32xf32>
    %505 = arith.index_cast %434 : i32 to index
    %c0_185 = arith.constant 0 : index
    %c0_186 = arith.constant 0 : index
    %506 = vector.load %arg4[%505, %c0_185, %c0_186] : memref<8x2x32xf32, #tpu.memory_space<vmem>>, vector<1x2x32xf32>
    %507 = vector.shape_cast %506 : vector<1x2x32xf32> to vector<2x32xf32>
    %508 = vector.broadcast %486 : f32 to vector<2x32xf32>
    %509 = arith.mulf %508, %507 : vector<2x32xf32>
    %cst_187 = arith.constant 1.000000e+00 : f32
    %510 = arith.subf %cst_187, %486 : f32
    %511 = vector.broadcast %510 : f32 to vector<2x32xf32>
    %512 = arith.mulf %511, %483 : vector<2x32xf32>
    %513 = arith.addf %509, %512 : vector<2x32xf32>
    %c6_i32 = arith.constant 6 : i32
    %c1_i32_188 = arith.constant 1 : i32
    %514 = arith.addi %c6_i32, %c1_i32_188 : i32
    %515 = arith.addf %495, %6 : vector<2x32xf32>
    %516 = arith.negf %515 : vector<2x32xf32>
    %517 = math.exp %516 : vector<2x32xf32>
    %cst_189 = arith.constant 1.000000e+00 : f32
    %518 = vector.broadcast %cst_189 : f32 to vector<2x32xf32>
    %519 = arith.addf %518, %517 : vector<2x32xf32>
    %520 = arith.divf %518, %519 : vector<2x32xf32>
    %521 = arith.addf %504, %11 : vector<2x32xf32>
    %522 = arith.negf %521 : vector<2x32xf32>
    %523 = math.exp %522 : vector<2x32xf32>
    %cst_190 = arith.constant 1.000000e+00 : f32
    %524 = vector.broadcast %cst_190 : f32 to vector<2x32xf32>
    %525 = arith.addf %524, %523 : vector<2x32xf32>
    %526 = arith.divf %524, %525 : vector<2x32xf32>
    %527 = arith.mulf %520, %16 : vector<2x32xf32>
    %528 = arith.addf %513, %527 : vector<2x32xf32>
    %529 = math.tanh %528 : vector<2x32xf32>
    %cst_191 = arith.constant 1.000000e+00 : f32
    %530 = vector.broadcast %cst_191 : f32 to vector<2x32xf32>
    %531 = arith.subf %530, %526 : vector<2x32xf32>
    %532 = arith.mulf %531, %529 : vector<2x32xf32>
    %533 = arith.mulf %526, %0 : vector<2x32xf32>
    %534 = arith.addf %532, %533 : vector<2x32xf32>
    %535 = arith.truncf %534 : vector<2x32xf32> to vector<2x32xbf16>
    %cst_192 = arith.constant dense<0.000000e+00> : vector<2x128xf32>
    %536 = tpu.matmul %535, %20, %cst_192 {dimension_numbers = #tpu.dot_dimension_numbers<[1], [0], [0], [1], [0, 0, 1, 1], [], []>} : vector<2x32xbf16>, vector<32x128xbf16>, vector<2x128xf32> -> vector<2x128xf32>
    %537 = vector.broadcast %21 : vector<1x128xf32> to vector<2x128xf32>
    %538 = arith.addf %536, %537 : vector<2x128xf32>
    %539 = arith.index_cast %514 : i32 to index
    %c0_193 = arith.constant 0 : index
    %c0_194 = arith.constant 0 : index
    %540 = vector.load %arg17[%539, %c0_193, %c0_194] : memref<8x2x128xf32, #tpu.memory_space<vmem>>, vector<1x2x128xf32>
    %541 = vector.shape_cast %540 : vector<1x2x128xf32> to vector<2x128xf32>
    %542 = vector.shape_cast %538 : vector<2x128xf32> to vector<1x2x128xf32>
    tpu.vector_store %arg17[%539, %c0_193, %c0_194], %542 {strides = array<i32>} : memref<8x2x128xf32, #tpu.memory_space<vmem>>, vector<1x2x128xf32>,
    %cst_195 = arith.constant dense<0xFF800000> : vector<2xf32>
    %543 = vector.multi_reduction <maximumf>, %538, %cst_195 [1] : vector<2x128xf32> to vector<2xf32>
    %544 = vector.shape_cast %543 : vector<2xf32> to vector<2x1xf32>
    %545 = vector.broadcast %544 : vector<2x1xf32> to vector<2x128xf32>
    %546 = arith.cmpf oge, %538, %545 : vector<2x128xf32>
    %cst_196 = arith.constant 0.000000e+00 : f32
    %547 = vector.broadcast %cst_196 : f32 to vector<2x128xf32>
    %548 = arith.subf %547, %23 : vector<2x128xf32>
    %cst_197 = arith.constant 0.000000e+00 : f32
    %cst_198 = arith.constant 1.280000e+02 : f32
    %549 = arith.subf %cst_197, %cst_198 : f32
    %550 = vector.broadcast %549 : f32 to vector<2x128xf32>
    %551 = arith.select %546, %548, %550 : vector<2x128xi1>, vector<2x128xf32>
    %cst_199 = arith.constant dense<0xFF800000> : vector<2xf32>
    %552 = vector.multi_reduction <maximumf>, %551, %cst_199 [1] : vector<2x128xf32> to vector<2xf32>
    %553 = vector.shape_cast %552 : vector<2xf32> to vector<2x1xf32>
    %cst_200 = arith.constant 0.000000e+00 : f32
    %554 = vector.broadcast %cst_200 : f32 to vector<2x1xf32>
    %555 = arith.subf %554, %553 : vector<2x1xf32>
    %556 = vector.broadcast %555 : vector<2x1xf32> to vector<2x128xf32>
    %557 = arith.cmpf oeq, %23, %556 : vector<2x128xf32>
    %558 = arith.extui %557 : vector<2x128xi1> to vector<2x128xi32>
    %559 = arith.sitofp %558 : vector<2x128xi32> to vector<2x128xf32>
    %560 = arith.truncf %559 : vector<2x128xf32> to vector<2x128xbf16>
    %cst_201 = arith.constant dense<0.000000e+00> : vector<2x32xf32>
    %561 = tpu.matmul %560, %17, %cst_201 {dimension_numbers = #tpu.dot_dimension_numbers<[1], [0], [0], [1], [0, 0, 1, 1], [], []>} : vector<2x128xbf16>, vector<128x32xbf16>, vector<2x32xf32> -> vector<2x32xf32>
    %cst_202 = arith.constant dense<0.000000e+00> : vector<2x32xf32>
    %562 = tpu.matmul %560, %18, %cst_202 {dimension_numbers = #tpu.dot_dimension_numbers<[1], [0], [0], [1], [0, 0, 1, 1], [], []>} : vector<2x128xbf16>, vector<128x32xbf16>, vector<2x32xf32> -> vector<2x32xf32>
    %cst_203 = arith.constant dense<0.000000e+00> : vector<2x32xf32>
    %563 = tpu.matmul %560, %19, %cst_203 {dimension_numbers = #tpu.dot_dimension_numbers<[1], [0], [0], [1], [0, 0, 1, 1], [], []>} : vector<2x128xbf16>, vector<128x32xbf16>, vector<2x32xf32> -> vector<2x32xf32>
    %564 = arith.index_cast %514 : i32 to index
    %565 = memref.load %arg1[%564] : memref<8xi32, #tpu.memory_space<smem>>
    %566 = arith.sitofp %565 : i32 to f32
    %567 = arith.index_cast %514 : i32 to index
    %c0_204 = arith.constant 0 : index
    %c0_205 = arith.constant 0 : index
    %568 = vector.load %arg2[%567, %c0_204, %c0_205] : memref<8x2x32xf32, #tpu.memory_space<vmem>>, vector<1x2x32xf32>
    %569 = vector.shape_cast %568 : vector<1x2x32xf32> to vector<2x32xf32>
    %570 = vector.broadcast %566 : f32 to vector<2x32xf32>
    %571 = arith.mulf %570, %569 : vector<2x32xf32>
    %cst_206 = arith.constant 1.000000e+00 : f32
    %572 = arith.subf %cst_206, %566 : f32
    %573 = vector.broadcast %572 : f32 to vector<2x32xf32>
    %574 = arith.mulf %573, %561 : vector<2x32xf32>
    %575 = arith.addf %571, %574 : vector<2x32xf32>
    %576 = arith.index_cast %514 : i32 to index
    %c0_207 = arith.constant 0 : index
    %c0_208 = arith.constant 0 : index
    %577 = vector.load %arg3[%576, %c0_207, %c0_208] : memref<8x2x32xf32, #tpu.memory_space<vmem>>, vector<1x2x32xf32>
    %578 = vector.shape_cast %577 : vector<1x2x32xf32> to vector<2x32xf32>
    %579 = vector.broadcast %566 : f32 to vector<2x32xf32>
    %580 = arith.mulf %579, %578 : vector<2x32xf32>
    %cst_209 = arith.constant 1.000000e+00 : f32
    %581 = arith.subf %cst_209, %566 : f32
    %582 = vector.broadcast %581 : f32 to vector<2x32xf32>
    %583 = arith.mulf %582, %562 : vector<2x32xf32>
    %584 = arith.addf %580, %583 : vector<2x32xf32>
    %585 = arith.index_cast %514 : i32 to index
    %c0_210 = arith.constant 0 : index
    %c0_211 = arith.constant 0 : index
    %586 = vector.load %arg4[%585, %c0_210, %c0_211] : memref<8x2x32xf32, #tpu.memory_space<vmem>>, vector<1x2x32xf32>
    %587 = vector.shape_cast %586 : vector<1x2x32xf32> to vector<2x32xf32>
    %588 = vector.broadcast %566 : f32 to vector<2x32xf32>
    %589 = arith.mulf %588, %587 : vector<2x32xf32>
    %cst_212 = arith.constant 1.000000e+00 : f32
    %590 = arith.subf %cst_212, %566 : f32
    %591 = vector.broadcast %590 : f32 to vector<2x32xf32>
    %592 = arith.mulf %591, %563 : vector<2x32xf32>
    %593 = arith.addf %589, %592 : vector<2x32xf32>
    %c7_i32 = arith.constant 7 : i32
    return
  }
  func.func @transform_0(%arg0: i32, %arg1: memref<8xi32, #tpu.memory_space<smem>>) -> (i32, i32, i32) {
    %c0_i32 = arith.constant 0 : i32
    %c0_i32_0 = arith.constant 0 : i32
    %c0_i32_1 = arith.constant 0 : i32
    %c0_i32_2 = arith.constant 0 : i32
    return %c0_i32, %c0_i32_0, %c0_i32_1 : i32, i32, i32
  }
  func.func @transform_1(%arg0: i32, %arg1: memref<8xi32, #tpu.memory_space<smem>>) -> (i32, i32, i32) {
    %c0_i32 = arith.constant 0 : i32
    %c0_i32_0 = arith.constant 0 : i32
    %c0_i32_1 = arith.constant 0 : i32
    %c0_i32_2 = arith.constant 0 : i32
    return %c0_i32, %c0_i32_0, %c0_i32_1 : i32, i32, i32
  }
  func.func @transform_2(%arg0: i32, %arg1: memref<8xi32, #tpu.memory_space<smem>>) -> (i32, i32, i32) {
    %c0_i32 = arith.constant 0 : i32
    %c0_i32_0 = arith.constant 0 : i32
    %c0_i32_1 = arith.constant 0 : i32
    %c0_i32_2 = arith.constant 0 : i32
    return %c0_i32, %c0_i32_0, %c0_i32_1 : i32, i32, i32
  }
  func.func @transform_3(%arg0: i32, %arg1: memref<8xi32, #tpu.memory_space<smem>>) -> (i32, i32) {
    %c0_i32 = arith.constant 0 : i32
    %c0_i32_0 = arith.constant 0 : i32
    %c0_i32_1 = arith.constant 0 : i32
    return %c0_i32, %c0_i32_0 : i32, i32
  }
  func.func @transform_4(%arg0: i32, %arg1: memref<8xi32, #tpu.memory_space<smem>>) -> (i32, i32) {
    %c0_i32 = arith.constant 0 : i32
    %c0_i32_0 = arith.constant 0 : i32
    %c0_i32_1 = arith.constant 0 : i32
    return %c0_i32, %c0_i32_0 : i32, i32
  }
  func.func @transform_5(%arg0: i32, %arg1: memref<8xi32, #tpu.memory_space<smem>>) -> (i32, i32) {
    %c0_i32 = arith.constant 0 : i32
    %c0_i32_0 = arith.constant 0 : i32
    %c0_i32_1 = arith.constant 0 : i32
    return %c0_i32, %c0_i32_0 : i32, i32
  }
  func.func @transform_6(%arg0: i32, %arg1: memref<8xi32, #tpu.memory_space<smem>>) -> (i32, i32) {
    %c0_i32 = arith.constant 0 : i32
    %c0_i32_0 = arith.constant 0 : i32
    %c0_i32_1 = arith.constant 0 : i32
    return %c0_i32, %c0_i32_0 : i32, i32
  }
  func.func @transform_7(%arg0: i32, %arg1: memref<8xi32, #tpu.memory_space<smem>>) -> (i32, i32) {
    %c0_i32 = arith.constant 0 : i32
    %c0_i32_0 = arith.constant 0 : i32
    %c0_i32_1 = arith.constant 0 : i32
    return %c0_i32, %c0_i32_0 : i32, i32
  }
  func.func @transform_8(%arg0: i32, %arg1: memref<8xi32, #tpu.memory_space<smem>>) -> (i32, i32) {
    %c0_i32 = arith.constant 0 : i32
    %c0_i32_0 = arith.constant 0 : i32
    %c0_i32_1 = arith.constant 0 : i32
    return %c0_i32, %c0_i32_0 : i32, i32
  }
  func.func @transform_9(%arg0: i32, %arg1: memref<8xi32, #tpu.memory_space<smem>>) -> (i32, i32) {
    %c0_i32 = arith.constant 0 : i32
    %c0_i32_0 = arith.constant 0 : i32
    %c0_i32_1 = arith.constant 0 : i32
    return %c0_i32, %c0_i32_0 : i32, i32
  }
  func.func @transform_10(%arg0: i32, %arg1: memref<8xi32, #tpu.memory_space<smem>>) -> (i32, i32) {
    %c0_i32 = arith.constant 0 : i32
    %c0_i32_0 = arith.constant 0 : i32
    %c0_i32_1 = arith.constant 0 : i32
    return %c0_i32, %c0_i32_0 : i32, i32
  }
  func.func @transform_11(%arg0: i32, %arg1: memref<8xi32, #tpu.memory_space<smem>>) -> (i32, i32) {
    %c0_i32 = arith.constant 0 : i32
    %c0_i32_0 = arith.constant 0 : i32
    %c0_i32_1 = arith.constant 0 : i32
    return %c0_i32, %c0_i32_0 : i32, i32
  }
  func.func @transform_12(%arg0: i32, %arg1: memref<8xi32, #tpu.memory_space<smem>>) -> (i32, i32) {
    %c0_i32 = arith.constant 0 : i32
    %c0_i32_0 = arith.constant 0 : i32
    %c0_i32_1 = arith.constant 0 : i32
    return %c0_i32, %c0_i32_0 : i32, i32
  }
  func.func @transform_13(%arg0: i32, %arg1: memref<8xi32, #tpu.memory_space<smem>>) -> (i32, i32) {
    %c0_i32 = arith.constant 0 : i32
    %c0_i32_0 = arith.constant 0 : i32
    %c0_i32_1 = arith.constant 0 : i32
    return %c0_i32, %c0_i32_0 : i32, i32
  }
  func.func @transform_14(%arg0: i32, %arg1: memref<8xi32, #tpu.memory_space<smem>>) -> (i32, i32) {
    %c0_i32 = arith.constant 0 : i32
    %c0_i32_0 = arith.constant 0 : i32
    %c0_i32_1 = arith.constant 0 : i32
    return %c0_i32, %c0_i32_0 : i32, i32
  }
  func.func @transform_15(%arg0: i32, %arg1: memref<8xi32, #tpu.memory_space<smem>>) -> (i32, i32, i32) {
    %c0_i32 = arith.constant 0 : i32
    %c0_i32_0 = arith.constant 0 : i32
    %c0_i32_1 = arith.constant 0 : i32
    %c0_i32_2 = arith.constant 0 : i32
    return %c0_i32, %c0_i32_0, %c0_i32_1 : i32, i32, i32
  }
}

</mosaic_0001>

<bundles_post_ra>
// kernel: seq2seq_forward.2
= control target key start
LH: loop header
LB: loop body
LE: loop exit
PB: predicated region body
PF: predicated region fallthrough
CT: control target
= control target key end

     0   :  { %v1531_v0 = vmov 0.0   ;;  %vm1532_vm0 = vmmov 0   ;;  %v1533_v6 = vmov 0   ;;  %vm66_vm1 = vcmask 261120   ;;  %s1860_s3 = inlined_call_operand.vmem [shape: bf16[32,32], index: 3, kind: input, shape index: {}]   ;;  %s1861_s4 = inlined_call_operand.vmem [shape: bf16[32,32], index: 4, kind: input, shape index: {}]   ;;  %s1862_s5 = inlined_call_operand.vmem [shape: bf16[32,32], index: 5, kind: input, shape index: {}]   ;;  %s1863_s6 = inlined_call_operand.vmem [shape: f32[1,32], index: 6, kind: input, shape index: {}]   ;;  %s1864_s0 = inlined_call_operand.vmem [shape: f32[7,2,32], index: 0, kind: input, shape index: {}]   ;;  %s1865_s7 = inlined_call_operand.vmem [shape: f32[1,32], index: 7, kind: input, shape index: {}]   ;;  %s1866_s1 = inlined_call_operand.vmem [shape: f32[7,2,32], index: 1, kind: input, shape index: {}]   ;;  %s1867_s8 = inlined_call_operand.vmem [shape: f32[1,32], index: 8, kind: input, shape index: {}]   ;;  %s1868_s2 = inlined_call_operand.vmem [shape: f32[7,2,32], index: 2, kind: input, shape index: {}]   ;;  %s1869_s9 = inlined_call_operand.vmem [shape: f32[2,32], index: 9, kind: output, shape index: {}]  }
   0x1   :  { %1284 = vmatprep.subr.bf16.mxu0 %v1531_v0  ;;  %v1588_v1 = vld [vmem:[%s1860_s3] sm:$0xff]   ;;  %1288 = vmatprep.mubr.msk.bf16.mxu0 %vm1532_vm0, %v1531_v0  ;;  %v1595_v2 = vld [vmem:[%s1860_s3 + $0x8] sm:$0xff]   ;;  %vm1156_vm2 = vcmask 254976  }
   0x2   :  { %1292 = vmatprep.subr.bf16.mxu1 %v1531_v0  ;;  %1296 = vmatprep.mubr.msk.bf16.mxu1 %vm1532_vm0, %v1531_v0  ;;  %v1604_v3 = vld [vmem:[%s1861_s4] sm:$0xff]   ;;  %v1611_v4 = vld [vmem:[%s1861_s4 + $0x8] sm:$0xff]  }
   0x3   :  { %1285 = vmatpush3.bf16.msra.mxu0 %v1588_v1  ;;  %1293 = vmatpush3.bf16.msra.mxu1 %v1604_v3  ;;  %v1618_v5 = vld [vmem:[%s1862_s5] sm:$0xff]   ;;  %v1627_v7 = vld [vmem:[%s1862_s5 + $0x8] sm:$0xff]  }
   0x4   :  { %1286 = vmatprep.subr.bf16.mxu0 %v1531_v0  ;;  %1294 = vmatprep.subr.bf16.mxu1 %v1531_v0  ;;  %v1649_v8 = vld [vmem:[%s1863_s6] ss:$0 sm:$0xff]  ;;  %v1176_v48 = vld [vmem:[%s1864_s0 + $0x2] sm:$0x3] }
   0x5   :  { %v226_v10 = vld [vmem:[%s1864_s0] sm:$0x3]  ;;  %v1178_v57 = vld [vmem:[%s1866_s1 + $0x2] sm:$0x3] }
   0x6   :  { %v1657_v11 = vld [vmem:[%s1865_s7] ss:$0 sm:$0xff] }
   0x7   :  { %1287 = vmatpush3.bf16.msra.mxu0 %v1595_v2  ;;  %1295 = vmatpush3.bf16.msra.mxu1 %v1611_v4  ;;  %v234_v16 = vld [vmem:[%s1866_s1] sm:$0x3] }
   0x8   :  { %1300 = vmatprep.subr.bf16.mxu0 %v1531_v0  ;;  %1308 = vmatprep.subr.bf16.mxu1 %v1531_v0  ;;  %v1667_v33 = vld [vmem:[%s1867_s8] ss:$0 sm:$0xff] }
   0x9   :  { %v242_v37 = vld [vmem:[%s1868_s2] sm:$0x3] }
   0xa   :  { %1289 = vmatmul.mubr.bf16.vlgmr.msra.gmra.mrb[0].mxu0 %v1533_v6  ;;  %1297 = vmatmul.mubr.bf16.vlgmr.msra.gmra.mrb[0].mxu1 %v1533_v6 }
   0xb   :  { %1301 = vmatpush3.bf16.msra.mxu0 %v1618_v5  ;;  %1304 = vmatprep.mubr.msk.bf16.mxu0 %vm1532_vm0, %v1531_v0 }
   0xc   :  { %1302 = vmatprep.subr.bf16.mxu0 %v1531_v0  ;;  %1309 = vmatpush3.bf16.msra.mxu1 %v1588_v1 }
   0xd   :  { %1312 = vmatprep.mubr.msk.bf16.mxu1 %vm1532_vm0, %v1531_v0  ;;  %1310 = vmatprep.subr.bf16.mxu1 %v1531_v0 }
   0xf   :  { %1303 = vmatpush3.bf16.msra.mxu0 %v1627_v7 }
  0x10   :  { %1316 = vmatprep.subr.bf16.mxu0 %v1531_v0  ;;  %1311 = vmatpush3.bf16.msra.mxu1 %v1595_v2 }
  0x11   :  { %1324 = vmatprep.subr.bf16.mxu1 %v1531_v0 }
  0x12   :  { %1305 = vmatmul.mubr.bf16.vlgmr.msra.gmra.mrb[4].mxu0 %v1533_v6 }
  0x13   :  { %1317 = vmatpush3.bf16.msra.mxu0 %v1604_v3  ;;  %1320 = vmatprep.mubr.msk.bf16.mxu0 %vm1532_vm0, %v1531_v0 }
  0x14   :  { %1318 = vmatprep.subr.bf16.mxu0 %v1531_v0 }
  0x17   :  { %1319 = vmatpush3.bf16.msra.mxu0 %v1611_v4 }
  0x18   :  { %1332 = vmatprep.subr.bf16.mxu0 %v1531_v0 }
  0xdd   :  { %v104_v9 = vpop.f32.mrb[0].mxu0  ;;  %v162_v15 = vpop.f32.mrb[0].mxu1 }
  0xde   :  { %v105_v12 = vadd.f32 %v1649_v8, %v104_v9  ;;  %v1290_v13 = vpop.f32.mrb[1].mxu0  ;;  %v163_v19 = vadd.f32 %v1657_v11, %v162_v15  ;;  %v1298_v20 = vpop.f32.mrb[1].mxu1 }
  0xdf   :  { %v107_v14 = vpop.f32.mrb[2].mxu0  ;;  %v165_v21 = vpop.f32.mrb[2].mxu1 }
  0xe0   :  { %v227_v17 = vadd.f32 %v226_v10, %v105_v12  ;;  %v1291_v18 = vpop.f32.mrb[3].mxu0  ;;  %v235_v23 = vadd.f32 %v234_v16, %v163_v19  ;;  %v1299_v24 = vpop.f32.mrb[3].mxu1 }
  0xe1   :  { %v1180_v18 = vld [vmem:[%s1868_s2 + $0x2] sm:$0x3] }
  0xe2   :  { %v1171_v22 = vmul.f32 -1.442695, %v227_v17  ;;  %v1172_v25 = vmul.f32 -1.442695, %v235_v23 }
  0xe4   :  { %1461 = vpow2.f32 %v1171_v22 }
  0xe5   :  { %v220_v26 = vpop.f32.mrb[4].mxu0  ;;  %1463 = vpow2.f32 %v1172_v25 }
  0xe6   :  { %v1306_v27 = vpop.f32.mrb[5].mxu0  ;;  %v221_v35 = vadd.f32 %v1667_v33, %v220_v26 }
  0xe7   :  { %v223_v28 = vpop.f32.mrb[6].mxu0 }
  0xe8   :  { %v1307_v29 = vpop.f32.mrb[7].mxu0 }
  0xe9   :  { %v1184_v29 = vld [vmem:[%s1864_s0 + $0x4] sm:$0x3] }
  0xee   :  { %v1462_v30 = vpop.eup %1461 }
  0xef   :  { %v231_v31 = vadd.f32 1.0, %v1462_v30  ;;  %v1464_v32 = vpop.eup %1463 }
  0xf0   :  { %v239_v34 = vadd.f32 1.0, %v1464_v32 }
  0xf1   :  { %1465 = vrcp.f32 %v231_v31 }
  0xf2   :  { %1467 = vrcp.f32 %v239_v34 }
  0xfb   :  { %v1466_v36 = vpop.eup %1465 }
  0xfc   :  { %v243_v38 = vmul.f32 %v1466_v36, %v221_v35  ;;  %v1468_v40 = vpop.eup %1467 }
  0xfd   :  { %v246_v41 = vsub.f32 1.0, %v1468_v40  ;;  %v248_v44 = vmul.f32 0.0, %v1468_v40 }
  0xfe   :  { %v244_v39 = vadd.f32 %v243_v38, %v242_v37 }
 0x100   :  { %1469 = vtanh.f32 %v244_v39  ;;  %v1186_v39 = vld [vmem:[%s1866_s1 + $0x4] sm:$0x3] }
 0x10a   :  { %v1470_v42 = vpop.eup %1469 }
 0x10b   :  { %v247_v43 = vmul.f32 %v1470_v42, %v246_v41 }
 0x10d   :  { %v249_v45 = vadd.f32 %v248_v44, %v247_v43 }
 0x10f   :  { %v250_v46 = vpack.c.bf16 %v249_v45, %v249_v45 }
 0x111   :  { %1313 = vmatmul.mubr.msk.bf16.vlgmr.msra.gmra.mrb[4].mxu1 %vm66_vm1, %v250_v46  ;;  %1321 = vmatmul.mubr.msk.bf16.vlgmr.msra.gmra.mrb[8].mxu0 %vm66_vm1, %v250_v46 }
 0x112   :  { %1325 = vmatpush3.bf16.msra.mxu1 %v1618_v5  ;;  %1328 = vmatprep.mubr.msk.bf16.mxu1 %vm1532_vm0, %v1531_v0 }
 0x113   :  { %1326 = vmatprep.subr.bf16.mxu1 %v1531_v0  ;;  %1333 = vmatpush3.bf16.msra.mxu0 %v1588_v1 }
 0x114   :  { %1334 = vmatprep.subr.bf16.mxu0 %v1531_v0  ;;  %1336 = vmatprep.mubr.msk.bf16.mxu0 %vm1532_vm0, %v1531_v0 }
 0x116   :  { %1327 = vmatpush3.bf16.msra.mxu1 %v1627_v7 }
 0x117   :  { %1340 = vmatprep.subr.bf16.mxu1 %v1531_v0  ;;  %1335 = vmatpush3.bf16.msra.mxu0 %v1595_v2 }
 0x118   :  { %1348 = vmatprep.subr.bf16.mxu0 %v1531_v0 }
 0x119   :  { %1329 = vmatmul.mubr.msk.bf16.vlgmr.msra.gmra.mrb[8].mxu1 %vm66_vm1, %v250_v46 }
 0x11a   :  { %1341 = vmatpush3.bf16.msra.mxu1 %v1604_v3  ;;  %1344 = vmatprep.mubr.msk.bf16.mxu1 %vm1532_vm0, %v1531_v0 }
 0x11b   :  { %1342 = vmatprep.subr.bf16.mxu1 %v1531_v0 }
 0x11e   :  { %1343 = vmatpush3.bf16.msra.mxu1 %v1611_v4 }
 0x11f   :  { %1356 = vmatprep.subr.bf16.mxu1 %v1531_v0 }
 0x1e4   :  { %v288_v47 = vpop.f32.mrb[4].mxu1  ;;  %v328_v49 = vpop.f32.mrb[8].mxu0 }
 0x1e5   :  { %v289_v50 = vadd.f32 %v1649_v8, %v288_v47  ;;  %v1314_v51 = vpop.f32.mrb[5].mxu1  ;;  %v1322_v52 = vpop.f32.mrb[9].mxu0  ;;  %v329_v53 = vadd.f32 %v1657_v11, %v328_v49 }
 0x1e6   :  { %v291_v54 = vpop.f32.mrb[6].mxu1  ;;  %v331_v55 = vpop.f32.mrb[10].mxu0 }
 0x1e7   :  { %v376_v56 = vadd.f32 %v1176_v48, %v289_v50  ;;  %v1315_v58 = vpop.f32.mrb[7].mxu1  ;;  %v1323_v59 = vpop.f32.mrb[11].mxu0  ;;  %v385_v61 = vadd.f32 %v1178_v57, %v329_v53  ;;  %v1188_v55 = vld [vmem:[%s1868_s2 + $0x4] sm:$0x3] }
 0x1e9   :  { %v1177_v60 = vmul.f32 -1.442695, %v376_v56  ;;  %v1179_v6 = vmul.f32 -1.442695, %v385_v61 }
 0x1eb   :  { %1471 = vpow2.f32 %v1177_v60 }
 0x1ec   :  { %v368_v62 = vpop.f32.mrb[8].mxu1  ;;  %1473 = vpow2.f32 %v1179_v6 }
 0x1ed   :  { %v1330_v63 = vpop.f32.mrb[9].mxu1  ;;  %v369_v16 = vadd.f32 %v1667_v33, %v368_v62 }
 0x1ee   :  { %v371_v9 = vpop.f32.mrb[10].mxu1 }
 0x1ef   :  { %v1331_v10 = vpop.f32.mrb[11].mxu1 }
 0x1f0   :  { %v1192_v10 = vld [vmem:[%s1864_s0 + $0x6] sm:$0x3] }
 0x1f5   :  { %v1472_v12 = vpop.eup %1471 }
 0x1f6   :  { %v380_v13 = vadd.f32 1.0, %v1472_v12  ;;  %v1474_v14 = vpop.eup %1473 }
 0x1f7   :  { %v389_v15 = vadd.f32 1.0, %v1474_v14 }
 0x1f8   :  { %1475 = vrcp.f32 %v380_v13 }
 0x1f9   :  { %1477 = vrcp.f32 %v389_v15 }
 0x202   :  { %v1476_v17 = vpop.eup %1475 }
 0x203   :  { %v394_v19 = vmul.f32 %v1476_v17, %v369_v16  ;;  %v1478_v21 = vpop.eup %1477 }
 0x204   :  { %v397_v22 = vsub.f32 1.0, %v1478_v21  ;;  %v399_v25 = vmul.f32 %v1478_v21, %v249_v45 }
 0x205   :  { %v395_v20 = vadd.f32 %v1180_v18, %v394_v19 }
 0x207   :  { %1479 = vtanh.f32 %v395_v20  ;;  %v1194_v20 = vld [vmem:[%s1866_s1 + $0x6] sm:$0x3] }
 0x211   :  { %v1480_v23 = vpop.eup %1479 }
 0x212   :  { %v398_v24 = vmul.f32 %v1480_v23, %v397_v22 }
 0x214   :  { %v400_v26 = vadd.f32 %v399_v25, %v398_v24 }
 0x216   :  { %v401_v27 = vpack.c.bf16 %v400_v26, %v400_v26 }
 0x218   :  { %1337 = vmatmul.mubr.msk.bf16.vlgmr.msra.gmra.mrb[12].mxu0 %vm66_vm1, %v401_v27  ;;  %1345 = vmatmul.mubr.msk.bf16.vlgmr.msra.gmra.mrb[12].mxu1 %vm66_vm1, %v401_v27 }
 0x219   :  { %1349 = vmatpush3.bf16.msra.mxu0 %v1618_v5  ;;  %1352 = vmatprep.mubr.msk.bf16.mxu0 %vm1532_vm0, %v1531_v0 }
 0x21a   :  { %1350 = vmatprep.subr.bf16.mxu0 %v1531_v0  ;;  %1357 = vmatpush3.bf16.msra.mxu1 %v1588_v1 }
 0x21b   :  { %1358 = vmatprep.subr.bf16.mxu1 %v1531_v0  ;;  %1360 = vmatprep.mubr.msk.bf16.mxu1 %vm1532_vm0, %v1531_v0 }
 0x21d   :  { %1351 = vmatpush3.bf16.msra.mxu0 %v1627_v7 }
 0x21e   :  { %1364 = vmatprep.subr.bf16.mxu0 %v1531_v0  ;;  %1359 = vmatpush3.bf16.msra.mxu1 %v1595_v2 }
 0x21f   :  { %1372 = vmatprep.subr.bf16.mxu1 %v1531_v0 }
 0x220   :  { %1353 = vmatmul.mubr.msk.bf16.vlgmr.msra.gmra.mrb[16].mxu0 %vm66_vm1, %v401_v27 }
 0x221   :  { %1365 = vmatpush3.bf16.msra.mxu0 %v1604_v3  ;;  %1368 = vmatprep.mubr.msk.bf16.mxu0 %vm1532_vm0, %v1531_v0 }
 0x222   :  { %1366 = vmatprep.subr.bf16.mxu0 %v1531_v0 }
 0x225   :  { %1367 = vmatpush3.bf16.msra.mxu0 %v1611_v4 }
 0x226   :  { %1380 = vmatprep.subr.bf16.mxu0 %v1531_v0 }
 0x2eb   :  { %v439_v28 = vpop.f32.mrb[12].mxu0  ;;  %v479_v30 = vpop.f32.mrb[12].mxu1 }
 0x2ec   :  { %v440_v31 = vadd.f32 %v1649_v8, %v439_v28  ;;  %v1338_v32 = vpop.f32.mrb[13].mxu0  ;;  %v1346_v34 = vpop.f32.mrb[13].mxu1  ;;  %v480_v35 = vadd.f32 %v1657_v11, %v479_v30 }
 0x2ed   :  { %v442_v36 = vpop.f32.mrb[14].mxu0  ;;  %v482_v37 = vpop.f32.mrb[14].mxu1 }
 0x2ee   :  { %v527_v38 = vadd.f32 %v1184_v29, %v440_v31  ;;  %v1339_v40 = vpop.f32.mrb[15].mxu0  ;;  %v1347_v41 = vpop.f32.mrb[15].mxu1  ;;  %v536_v43 = vadd.f32 %v1186_v39, %v480_v35  ;;  %v1196_v37 = vld [vmem:[%s1868_s2 + $0x6] sm:$0x3] }
 0x2f0   :  { %v1185_v42 = vmul.f32 -1.442695, %v527_v38  ;;  %v1187_v46 = vmul.f32 -1.442695, %v536_v43 }
 0x2f2   :  { %1481 = vpow2.f32 %v1185_v42 }
 0x2f3   :  { %v519_v44 = vpop.f32.mrb[16].mxu0  ;;  %1483 = vpow2.f32 %v1187_v46 }
 0x2f4   :  { %v1354_v45 = vpop.f32.mrb[17].mxu0  ;;  %v520_v53 = vadd.f32 %v1667_v33, %v519_v44 }
 0x2f5   :  { %v522_v47 = vpop.f32.mrb[18].mxu0 }
 0x2f6   :  { %v1355_v48 = vpop.f32.mrb[19].mxu0 }
 0x2f7   :  { %v1200_v48 = vld [vmem:[%s1864_s0 + $0x8] sm:$0x3] }
 0x2fc   :  { %v1482_v49 = vpop.eup %1481 }
 0x2fd   :  { %v531_v50 = vadd.f32 1.0, %v1482_v49  ;;  %v1484_v51 = vpop.eup %1483 }
 0x2fe   :  { %v540_v52 = vadd.f32 1.0, %v1484_v51 }
 0x2ff   :  { %1485 = vrcp.f32 %v531_v50 }
 0x300   :  { %1487 = vrcp.f32 %v540_v52 }
 0x309   :  { %v1486_v54 = vpop.eup %1485 }
 0x30a   :  { %v545_v56 = vmul.f32 %v1486_v54, %v520_v53  ;;  %v1488_v58 = vpop.eup %1487 }
 0x30b   :  { %v548_v59 = vsub.f32 1.0, %v1488_v58  ;;  %v550_v62 = vmul.f32 %v1488_v58, %v400_v26 }
 0x30c   :  { %v546_v57 = vadd.f32 %v1188_v55, %v545_v56 }
 0x30e   :  { %1489 = vtanh.f32 %v546_v57  ;;  %v1202_v57 = vld [vmem:[%s1866_s1 + $0x8] sm:$0x3] }
 0x318   :  { %v1490_v60 = vpop.eup %1489 }
 0x319   :  { %v549_v61 = vmul.f32 %v1490_v60, %v548_v59 }
 0x31b   :  { %v551_v63 = vadd.f32 %v550_v62, %v549_v61 }
 0x31d   :  { %v552_v6 = vpack.c.bf16 %v551_v63, %v551_v63 }
 0x31f   :  { %1361 = vmatmul.mubr.msk.bf16.vlgmr.msra.gmra.mrb[16].mxu1 %vm66_vm1, %v552_v6  ;;  %1369 = vmatmul.mubr.msk.bf16.vlgmr.msra.gmra.mrb[20].mxu0 %vm66_vm1, %v552_v6 }
 0x320   :  { %1373 = vmatpush3.bf16.msra.mxu1 %v1618_v5  ;;  %1376 = vmatprep.mubr.msk.bf16.mxu1 %vm1532_vm0, %v1531_v0 }
 0x321   :  { %1374 = vmatprep.subr.bf16.mxu1 %v1531_v0  ;;  %1381 = vmatpush3.bf16.msra.mxu0 %v1588_v1 }
 0x322   :  { %1382 = vmatprep.subr.bf16.mxu0 %v1531_v0  ;;  %1384 = vmatprep.mubr.msk.bf16.mxu0 %vm1532_vm0, %v1531_v0 }
 0x324   :  { %1375 = vmatpush3.bf16.msra.mxu1 %v1627_v7 }
 0x325   :  { %1388 = vmatprep.subr.bf16.mxu1 %v1531_v0  ;;  %1383 = vmatpush3.bf16.msra.mxu0 %v1595_v2 }
 0x326   :  { %1396 = vmatprep.subr.bf16.mxu0 %v1531_v0 }
 0x327   :  { %1377 = vmatmul.mubr.msk.bf16.vlgmr.msra.gmra.mrb[20].mxu1 %vm66_vm1, %v552_v6 }
 0x328   :  { %1389 = vmatpush3.bf16.msra.mxu1 %v1604_v3  ;;  %1392 = vmatprep.mubr.msk.bf16.mxu1 %vm1532_vm0, %v1531_v0 }
 0x329   :  { %1390 = vmatprep.subr.bf16.mxu1 %v1531_v0 }
 0x32c   :  { %1391 = vmatpush3.bf16.msra.mxu1 %v1611_v4 }
 0x32d   :  { %1404 = vmatprep.subr.bf16.mxu1 %v1531_v0 }
 0x3f2   :  { %v590_v9 = vpop.f32.mrb[16].mxu1  ;;  %v630_v12 = vpop.f32.mrb[20].mxu0 }
 0x3f3   :  { %v591_v13 = vadd.f32 %v1649_v8, %v590_v9  ;;  %v1362_v14 = vpop.f32.mrb[17].mxu1  ;;  %v1370_v15 = vpop.f32.mrb[21].mxu0  ;;  %v631_v16 = vadd.f32 %v1657_v11, %v630_v12 }
 0x3f4   :  { %v593_v17 = vpop.f32.mrb[18].mxu1  ;;  %v633_v18 = vpop.f32.mrb[22].mxu0 }
 0x3f5   :  { %v678_v19 = vadd.f32 %v1192_v10, %v591_v13  ;;  %v1363_v21 = vpop.f32.mrb[19].mxu1  ;;  %v1371_v22 = vpop.f32.mrb[23].mxu0  ;;  %v687_v24 = vadd.f32 %v1194_v20, %v631_v16  ;;  %v1204_v18 = vld [vmem:[%s1868_s2 + $0x8] sm:$0x3] }
 0x3f7   :  { %v1193_v23 = vmul.f32 -1.442695, %v678_v19  ;;  %v1195_v27 = vmul.f32 -1.442695, %v687_v24 }
 0x3f9   :  { %1491 = vpow2.f32 %v1193_v23 }
 0x3fa   :  { %v670_v25 = vpop.f32.mrb[20].mxu1  ;;  %1493 = vpow2.f32 %v1195_v27 }
 0x3fb   :  { %v1378_v26 = vpop.f32.mrb[21].mxu1  ;;  %v671_v35 = vadd.f32 %v1667_v33, %v670_v25 }
 0x3fc   :  { %v673_v28 = vpop.f32.mrb[22].mxu1 }
 0x3fd   :  { %v1379_v29 = vpop.f32.mrb[23].mxu1  ;;  %v1208_v28 = vld [vmem:[%s1864_s0 + $0xa] sm:$0x3] }
 0x403   :  { %v1492_v30 = vpop.eup %1491 }
 0x404   :  { %v682_v31 = vadd.f32 1.0, %v1492_v30  ;;  %v1494_v32 = vpop.eup %1493 }
 0x405   :  { %v691_v34 = vadd.f32 1.0, %v1494_v32 }
 0x406   :  { %1495 = vrcp.f32 %v682_v31 }
 0x407   :  { %1497 = vrcp.f32 %v691_v34 }
 0x410   :  { %v1496_v36 = vpop.eup %1495 }
 0x411   :  { %v696_v38 = vmul.f32 %v1496_v36, %v671_v35  ;;  %v1498_v40 = vpop.eup %1497  ;;  %v1210_v36 = vld [vmem:[%s1866_s1 + $0xa] sm:$0x3] }
 0x412   :  { %v699_v41 = vsub.f32 1.0, %v1498_v40  ;;  %v701_v44 = vmul.f32 %v1498_v40, %v551_v63 }
 0x413   :  { %v697_v39 = vadd.f32 %v1196_v37, %v696_v38 }
 0x415   :  { %1499 = vtanh.f32 %v697_v39 }
 0x41f   :  { %v1500_v42 = vpop.eup %1499 }
 0x420   :  { %v700_v43 = vmul.f32 %v1500_v42, %v699_v41 }
 0x422   :  { %v702_v45 = vadd.f32 %v701_v44, %v700_v43 }
 0x424   :  { %v703_v46 = vpack.c.bf16 %v702_v45, %v702_v45 }
 0x426   :  { %1385 = vmatmul.mubr.msk.bf16.vlgmr.msra.gmra.mrb[24].mxu0 %vm66_vm1, %v703_v46  ;;  %1393 = vmatmul.mubr.msk.bf16.vlgmr.msra.gmra.mrb[24].mxu1 %vm66_vm1, %v703_v46 }
 0x427   :  { %1397 = vmatpush3.bf16.msra.mxu0 %v1618_v5  ;;  %1400 = vmatprep.mubr.msk.bf16.mxu0 %vm1532_vm0, %v1531_v0 }
 0x428   :  { %1398 = vmatprep.subr.bf16.mxu0 %v1531_v0  ;;  %1405 = vmatpush3.bf16.msra.mxu1 %v1588_v1 }
 0x429   :  { %1406 = vmatprep.subr.bf16.mxu1 %v1531_v0  ;;  %1408 = vmatprep.mubr.msk.bf16.mxu1 %vm1532_vm0, %v1531_v0 }
 0x42b   :  { %1399 = vmatpush3.bf16.msra.mxu0 %v1627_v7 }
 0x42c   :  { %1412 = vmatprep.subr.bf16.mxu0 %v1531_v0  ;;  %1407 = vmatpush3.bf16.msra.mxu1 %v1595_v2 }
 0x42d   :  { %1420 = vmatprep.subr.bf16.mxu1 %v1531_v0 }
 0x42e   :  { %1401 = vmatmul.mubr.msk.bf16.vlgmr.msra.gmra.mrb[28].mxu0 %vm66_vm1, %v703_v46 }
 0x42f   :  { %1413 = vmatpush3.bf16.msra.mxu0 %v1604_v3  ;;  %1416 = vmatprep.mubr.msk.bf16.mxu0 %vm1532_vm0, %v1531_v0 }
 0x430   :  { %1414 = vmatprep.subr.bf16.mxu0 %v1531_v0 }
 0x433   :  { %1415 = vmatpush3.bf16.msra.mxu0 %v1611_v4 }
 0x434   :  { %1428 = vmatprep.subr.bf16.mxu0 %v1531_v0 }
 0x4f9   :  { %v741_v47 = vpop.f32.mrb[24].mxu0  ;;  %v781_v49 = vpop.f32.mrb[24].mxu1 }
 0x4fa   :  { %v742_v50 = vadd.f32 %v1649_v8, %v741_v47  ;;  %v1386_v51 = vpop.f32.mrb[25].mxu0  ;;  %v1394_v52 = vpop.f32.mrb[25].mxu1  ;;  %v782_v53 = vadd.f32 %v1657_v11, %v781_v49 }
 0x4fb   :  { %v744_v54 = vpop.f32.mrb[26].mxu0  ;;  %v784_v55 = vpop.f32.mrb[26].mxu1  ;;  %v1212_v51 = vld [vmem:[%s1868_s2 + $0xa] sm:$0x3] }
 0x4fc   :  { %v829_v56 = vadd.f32 %v1200_v48, %v742_v50  ;;  %v1387_v58 = vpop.f32.mrb[27].mxu0  ;;  %v1395_v59 = vpop.f32.mrb[27].mxu1  ;;  %v838_v61 = vadd.f32 %v1202_v57, %v782_v53 }
 0x4fe   :  { %v1201_v60 = vmul.f32 -1.442695, %v829_v56  ;;  %v1203_v6 = vmul.f32 -1.442695, %v838_v61 }
 0x500   :  { %1501 = vpow2.f32 %v1201_v60 }
 0x501   :  { %v821_v62 = vpop.f32.mrb[28].mxu0  ;;  %1503 = vpow2.f32 %v1203_v6 }
 0x502   :  { %v1402_v63 = vpop.f32.mrb[29].mxu0  ;;  %v822_v16 = vadd.f32 %v1667_v33, %v821_v62  ;;  %v1216_v62 = vld [vmem:[%s1864_s0 + $0xc] sm:$0x3] }
 0x503   :  { %v824_v9 = vpop.f32.mrb[30].mxu0 }
 0x504   :  { %v1403_v10 = vpop.f32.mrb[31].mxu0 }
 0x50a   :  { %v1502_v12 = vpop.eup %1501 }
 0x50b   :  { %v833_v13 = vadd.f32 1.0, %v1502_v12  ;;  %v1504_v14 = vpop.eup %1503 }
 0x50c   :  { %v842_v15 = vadd.f32 1.0, %v1504_v14 }
 0x50d   :  { %1505 = vrcp.f32 %v833_v13 }
 0x50e   :  { %1507 = vrcp.f32 %v842_v15 }
 0x517   :  { %v1506_v17 = vpop.eup %1505 }
 0x518   :  { %v847_v19 = vmul.f32 %v1506_v17, %v822_v16  ;;  %v1508_v21 = vpop.eup %1507 }
 0x519   :  { %v850_v22 = vsub.f32 1.0, %v1508_v21  ;;  %v852_v25 = vmul.f32 %v1508_v21, %v702_v45 }
 0x51a   :  { %v848_v20 = vadd.f32 %v1204_v18, %v847_v19 }
 0x51c   :  { %1509 = vtanh.f32 %v848_v20 }
 0x526   :  { %v1510_v23 = vpop.eup %1509 }
 0x527   :  { %v851_v24 = vmul.f32 %v1510_v23, %v850_v22 }
 0x529   :  { %v853_v26 = vadd.f32 %v852_v25, %v851_v24 }
 0x52b   :  { %v854_v27 = vpack.c.bf16 %v853_v26, %v853_v26 }
 0x52d   :  { %1409 = vmatmul.mubr.msk.bf16.vlgmr.msra.gmra.mrb[28].mxu1 %vm66_vm1, %v854_v27  ;;  %1417 = vmatmul.mubr.msk.bf16.vlgmr.msra.gmra.mrb[32].mxu0 %vm66_vm1, %v854_v27 }
 0x52e   :  { %1421 = vmatpush3.bf16.msra.mxu1 %v1618_v5  ;;  %1424 = vmatprep.mubr.msk.bf16.mxu1 %vm1532_vm0, %v1531_v0 }
 0x52f   :  { %1422 = vmatprep.subr.bf16.mxu1 %v1531_v0  ;;  %1429 = vmatpush3.bf16.msra.mxu0 %v1588_v1 }
 0x530   :  { %1430 = vmatprep.subr.bf16.mxu0 %v1531_v0  ;;  %1432 = vmatprep.mubr.msk.bf16.mxu0 %vm1532_vm0, %v1531_v0 }
 0x532   :  { %1423 = vmatpush3.bf16.msra.mxu1 %v1627_v7 }
 0x533   :  { %1436 = vmatprep.subr.bf16.mxu1 %v1531_v0  ;;  %1431 = vmatpush3.bf16.msra.mxu0 %v1595_v2 }
 0x534   :  { %1444 = vmatprep.subr.bf16.mxu0 %v1531_v0 }
 0x535   :  { %1425 = vmatmul.mubr.msk.bf16.vlgmr.msra.gmra.mrb[32].mxu1 %vm66_vm1, %v854_v27  ;;  %v1220_v27 = vld [vmem:[%s1868_s2 + $0xc] sm:$0x3] }
 0x536   :  { %1437 = vmatpush3.bf16.msra.mxu1 %v1604_v3  ;;  %1440 = vmatprep.mubr.msk.bf16.mxu1 %vm1532_vm0, %v1531_v0 }
 0x537   :  { %1438 = vmatprep.subr.bf16.mxu1 %v1531_v0 }
 0x53a   :  { %1439 = vmatpush3.bf16.msra.mxu1 %v1611_v4 }
 0x600   :  { %v892_v1 = vpop.f32.mrb[28].mxu1  ;;  %v932_v29 = vpop.f32.mrb[32].mxu0 }
 0x601   :  { %v893_v2 = vadd.f32 %v1649_v8, %v892_v1  ;;  %v1410_v30 = vpop.f32.mrb[29].mxu1  ;;  %v1418_v31 = vpop.f32.mrb[33].mxu0  ;;  %v933_v32 = vadd.f32 %v1657_v11, %v932_v29 }
 0x602   :  { %v895_v3 = vpop.f32.mrb[30].mxu1  ;;  %v935_v34 = vpop.f32.mrb[34].mxu0 }
 0x603   :  { %v980_v35 = vadd.f32 %v1208_v28, %v893_v2  ;;  %v1411_v4 = vpop.f32.mrb[31].mxu1  ;;  %v1419_v37 = vpop.f32.mrb[35].mxu0  ;;  %v989_v39 = vadd.f32 %v1210_v36, %v933_v32 }
 0x605   :  { %v1209_v38 = vmul.f32 -1.442695, %v980_v35  ;;  %v1211_v42 = vmul.f32 -1.442695, %v989_v39 }
 0x607   :  { %1511 = vpow2.f32 %v1209_v38 }
 0x608   :  { %v972_v40 = vpop.f32.mrb[32].mxu1  ;;  %1513 = vpow2.f32 %v1211_v42 }
 0x609   :  { %v1426_v41 = vpop.f32.mrb[33].mxu1  ;;  %v973_v49 = vadd.f32 %v1667_v33, %v972_v40 }
 0x60a   :  { %v975_v43 = vpop.f32.mrb[34].mxu1 }
 0x60b   :  { %v1427_v44 = vpop.f32.mrb[35].mxu1 }
 0x611   :  { %v1512_v45 = vpop.eup %1511 }
 0x612   :  { %v984_v46 = vadd.f32 1.0, %v1512_v45  ;;  %v1514_v47 = vpop.eup %1513 }
 0x613   :  { %v993_v48 = vadd.f32 1.0, %v1514_v47 }
 0x614   :  { %1515 = vrcp.f32 %v984_v46 }
 0x615   :  { %1517 = vrcp.f32 %v993_v48 }
 0x61e   :  { %v1516_v50 = vpop.eup %1515 }
 0x61f   :  { %v998_v52 = vmul.f32 %v1516_v50, %v973_v49  ;;  %v1518_v54 = vpop.eup %1517 }
 0x620   :  { %v1001_v55 = vsub.f32 1.0, %v1518_v54  ;;  %v1003_v58 = vmul.f32 %v1518_v54, %v853_v26 }
 0x621   :  { %v999_v53 = vadd.f32 %v1212_v51, %v998_v52 }
 0x623   :  { %1519 = vtanh.f32 %v999_v53 }
 0x62d   :  { %v1520_v56 = vpop.eup %1519 }
 0x62e   :  { %v1002_v57 = vmul.f32 %v1520_v56, %v1001_v55 }
 0x630   :  { %v1004_v59 = vadd.f32 %v1003_v58, %v1002_v57 }
 0x632   :  { %v1005_v60 = vpack.c.bf16 %v1004_v59, %v1004_v59 }
 0x634   :  { %1433 = vmatmul.mubr.msk.bf16.vlgmr.msra.gmra.mrb[36].mxu0 %vm66_vm1, %v1005_v60  ;;  %1441 = vmatmul.mubr.msk.bf16.vlgmr.msra.gmra.mrb[36].mxu1 %vm66_vm1, %v1005_v60 }
 0x635   :  { %1445 = vmatpush3.bf16.msra.mxu0 %v1618_v5  ;;  %1448 = vmatprep.mubr.msk.bf16.mxu0 %vm1532_vm0, %v1531_v0 }
 0x636   :  { %1446 = vmatprep.subr.bf16.mxu0 %v1531_v0  ;;  %v1218_v0 = vld [vmem:[%s1866_s1 + $0xc] sm:$0x3] }
 0x639   :  { %1447 = vmatpush3.bf16.msra.mxu0 %v1627_v7 }
 0x63c   :  { %1449 = vmatmul.mubr.msk.bf16.vlgmr.msra.gmra.mrb[40].mxu0 %vm66_vm1, %v1005_v60 }
 0x707   :  { %v1043_v61 = vpop.f32.mrb[36].mxu0  ;;  %v1083_v63 = vpop.f32.mrb[36].mxu1 }
 0x708   :  { %v1044_v6 = vadd.f32 %v1649_v8, %v1043_v61  ;;  %v1434_v9 = vpop.f32.mrb[37].mxu0  ;;  %v1442_v10 = vpop.f32.mrb[37].mxu1  ;;  %v1084_v5 = vadd.f32 %v1657_v11, %v1083_v63 }
 0x709   :  { %v1046_v12 = vpop.f32.mrb[38].mxu0  ;;  %v1086_v13 = vpop.f32.mrb[38].mxu1 }
 0x70a   :  { %v1131_v14 = vadd.f32 %v1216_v62, %v1044_v6  ;;  %v1435_v7 = vpop.f32.mrb[39].mxu0  ;;  %v1443_v15 = vpop.f32.mrb[39].mxu1  ;;  %v1140_v17 = vadd.f32 %v1218_v0, %v1084_v5 }
 0x70c   :  { %v1217_v16 = vmul.f32 -1.442695, %v1131_v14  ;;  %v1219_v20 = vmul.f32 -1.442695, %v1140_v17 }
 0x70e   :  { %1521 = vpow2.f32 %v1217_v16 }
 0x70f   :  { %v1123_v18 = vpop.f32.mrb[40].mxu0  ;;  %1523 = vpow2.f32 %v1219_v20 }
 0x710   :  { %v1450_v19 = vpop.f32.mrb[41].mxu0  ;;  %v1124_v25 = vadd.f32 %v1667_v33, %v1123_v18 }
 0x711   :  { %v1126_v8 = vpop.f32.mrb[42].mxu0 }
 0x712   :  { %v1451_v21 = vpop.f32.mrb[43].mxu0 }
 0x718   :  { %v1522_v22 = vpop.eup %1521 }
 0x719   :  { %v1135_v11 = vadd.f32 1.0, %v1522_v22  ;;  %v1524_v23 = vpop.eup %1523 }
 0x71a   :  { %v1144_v24 = vadd.f32 1.0, %v1524_v23 }
 0x71b   :  { %1525 = vrcp.f32 %v1135_v11 }
 0x71c   :  { %1527 = vrcp.f32 %v1144_v24 }
 0x725   :  { %v1526_v26 = vpop.eup %1525 }
 0x726   :  { %v1149_v1 = vmul.f32 %v1526_v26, %v1124_v25  ;;  %v1528_v29 = vpop.eup %1527 }
 0x727   :  { %v1152_v2 = vsub.f32 1.0, %v1528_v29  ;;  %v1154_v31 = vmul.f32 %v1528_v29, %v1004_v59 }
 0x728   :  { %v1150_v28 = vadd.f32 %v1220_v27, %v1149_v1 }
 0x72a   :  { %1529 = vtanh.f32 %v1150_v28 }
 0x734   :  { %v1530_v30 = vpop.eup %1529 }
 0x735   :  { %v1153_v32 = vmul.f32 %v1530_v30, %v1152_v2 }
 0x737   :  { %v1155_v3 = vadd.f32 %v1154_v31, %v1153_v32 }
 0x739   :  { %1157 = vst.msk [vmem:[%s1869_s9] sm:$0x3] %vm1156_vm2, %v1155_v3 }

// kernel: seq2seq_forward.3
= control target key start
LH: loop header
LB: loop body
LE: loop exit
PB: predicated region body
PF: predicated region fallthrough
CT: control target
= control target key end

     0   :  { %s3806_s0 = inlined_call_operand.vmem [shape: s32[8], index: 0, kind: input, shape index: {}]   ;;  %s3807_s1 = inlined_call_operand.vmem [shape: f32[8,2,32], index: 1, kind: input, shape index: {}]   ;;  %s3808_s2 = inlined_call_operand.vmem [shape: f32[8,2,32], index: 2, kind: input, shape index: {}]   ;;  %s3809_s3 = inlined_call_operand.vmem [shape: f32[8,2,32], index: 3, kind: input, shape index: {}]   ;;  %s3810_s4 = inlined_call_operand.vmem [shape: bf16[128,32], index: 4, kind: input, shape index: {}]   ;;  %s3811_s5 = inlined_call_operand.vmem [shape: bf16[128,32], index: 5, kind: input, shape index: {}]   ;;  %s3812_s6 = inlined_call_operand.vmem [shape: bf16[128,32], index: 6, kind: input, shape index: {}]   ;;  %s3813_s7 = inlined_call_operand.vmem [shape: bf16[32,32], index: 7, kind: input, shape index: {}]   ;;  %s3814_s8 = inlined_call_operand.vmem [shape: bf16[32,32], index: 8, kind: input, shape index: {}]   ;;  %s3815_s9 = inlined_call_operand.vmem [shape: bf16[32,32], index: 9, kind: input, shape index: {}]   ;;  %s3816_s10 = inlined_call_operand.vmem [shape: f32[1,32], index: 10, kind: input, shape index: {}]   ;;  %s3817_s11 = inlined_call_operand.vmem [shape: f32[1,32], index: 11, kind: input, shape index: {}]   ;;  %s3818_s12 = inlined_call_operand.vmem [shape: f32[1,32], index: 12, kind: input, shape index: {}]   ;;  %s3819_s13 = inlined_call_operand.vmem [shape: f32[2,32], index: 13, kind: input, shape index: {}]   ;;  %s3820_s14 = inlined_call_operand.vmem [shape: bf16[32,128], index: 14, kind: input, shape index: {}]   ;;  %s3821_s15 = inlined_call_operand.vmem [shape: f32[1,128], index: 15, kind: input, shape index: {}]   ;;  %s3822_s16 = inlined_call_operand.hbm [shape: f32[8,2,128], index: 16, kind: output, shape index: {}]  }
   0x1   :  { %3824 = sst [smem:[#allocation8_spill]] %s3806_s0 }
   0x2   :  { %3825 = sst [smem:[#allocation9_spill]] %s3812_s6  ;;  %s3826_s23 = sld [smem:[#allocation8_spill]] }
   0x8   :  { %s21_s6 = sshll.u32 %s3826_s23, 4  ;;  %s22_s6 = int_to_ptr.vmem [resolvable:$true] %s21_s6 }
   0x9   :  { %s2776_s24 = scalar_lea.vmem %s22_s6, 16  ;;  %p2781_p1 = scmp.lt.s32.totalorder %s22_s6, %s22_s6 }
   0xa   :  { %p2777_p0 = scmp.ne.s32.totalorder %s22_s6, %s2776_s24  ;;  %p2782_p2 = scmp.lt.s32.totalorder %s2776_s24, %s2776_s24 }
   0xc   :  { %p2783_p3 = por %p2782_p2, %p2781_p1 }
   0xe   :  { %p2784_p4 = pnand %p2783_p3, %p2777_p0 }
  0x10   :  { %2787 = shalt.err (!%p2784_p4)  }
  0x11   :  { %s2814_s25 = smov [#allocation3]  }
  0x12   :  { %24 = dma.vmem_to_smem %s22_s6, 16, %s2814_s25, [#allocation2] }
  0x13   :  { %2810 = dma.done.wait [#allocation2], 16 }
  0x14   :  { %2811 = vsyncadd [#allocation2], 4294967280 }
  0x15   :  { %26 = sfence }
  0x16   :  { %v2646_v0 = vld [vmem:[%s3813_s7] sm:$0xff]   ;;  %v2815_v1 = vmov 0.0   ;;  %v2647_v2 = vld [vmem:[%s3813_s7 + $0x8] sm:$0xff]   ;;  %vm2816_vm0 = vmmov 0   ;;  %vm84_vm1 = vcmask 261120  }
  0x17   :  { %2199 = vmatprep.subr.bf16.mxu0 %v2815_v1  ;;  %310 = vst [vmem:[#allocation4] sm:$0x3] %v2815_v1  ;;  %2207 = vmatprep.subr.bf16.mxu1 %v2815_v1  ;;  %v2923_v3 = vld [vmem:[%s3819_s13] sm:$0x3]  ;;  %v2649_v5 = vld [vmem:[%s3814_s8 + $0x8] sm:$0xff]  }
  0x18   :  { %2200 = vmatpush3.bf16.msra.mxu0 %v2646_v0  ;;  %2203 = vmatprep.mubr.msk.bf16.mxu0 %vm2816_vm0, %v2815_v1  ;;  %v2648_v4 = vld [vmem:[%s3814_s8] sm:$0xff]   ;;  %v60_v6 = vpack.c.bf16 %v2923_v3, %v2923_v3  ;;  %v2651_v8 = vld [vmem:[%s3815_s9 + $0x8] sm:$0xff]  }
  0x19   :  { %2201 = vmatprep.subr.bf16.mxu0 %v2815_v1  ;;  %2211 = vmatprep.mubr.msk.bf16.mxu1 %vm2816_vm0, %v2815_v1  ;;  %v2650_v7 = vld [vmem:[%s3815_s9] sm:$0xff]  }
  0x1a   :  { %2208 = vmatpush3.bf16.msra.mxu1 %v2648_v4 }
  0x1b   :  { %2209 = vmatprep.subr.bf16.mxu1 %v2815_v1 }
  0x1c   :  { %2202 = vmatpush3.bf16.msra.mxu0 %v2647_v2 }
  0x1d   :  { %2215 = vmatprep.subr.bf16.mxu0 %v2815_v1 }
  0x1e   :  { %2210 = vmatpush3.bf16.msra.mxu1 %v2649_v5 }
  0x1f   :  { %2204 = vmatmul.mubr.msk.bf16.vlgmr.msra.gmra.mrb[0].mxu0 %vm84_vm1, %v60_v6  ;;  %2223 = vmatprep.subr.bf16.mxu1 %v2815_v1 }
  0x20   :  { %2216 = vmatpush3.bf16.msra.mxu0 %v2650_v7  ;;  %2219 = vmatprep.mubr.msk.bf16.mxu0 %vm2816_vm0, %v2815_v1 }
  0x21   :  { %2212 = vmatmul.mubr.msk.bf16.vlgmr.msra.gmra.mrb[0].mxu1 %vm84_vm1, %v60_v6  ;;  %2217 = vmatprep.subr.bf16.mxu0 %v2815_v1 }
  0x22   :  { %2227 = vmatprep.mubr.msk.bf16.mxu1 %vm2816_vm0, %v2815_v1 }
  0x24   :  { %2218 = vmatpush3.bf16.msra.mxu0 %v2651_v8 }
  0x25   :  { %2231 = vmatprep.subr.bf16.mxu0 %v2815_v1 }
  0x27   :  { %2220 = vmatmul.mubr.msk.bf16.vlgmr.msra.gmra.mrb[4].mxu0 %vm84_vm1, %v60_v6 }
  0x28   :  { %2247 = vmatprep.mubr.msk.bf16.mxu0 %vm2816_vm0, %v2815_v1 }
  0x29   :  { %27 = vsyncpa [#allocation5], 0  ;;  %v2959_v9 = vld [vmem:[%s3820_s14] sm:$0xff]   ;;  %v2965_v10 = vld [vmem:[%s3820_s14 + $0x8] sm:$0xff]   ;;  %vm399_vm2 = vcmask 1041408   ;;  %s3827_s29 = sld [smem:[#allocation9_spill]] }
  0x2a   :  { %2224 = vmatpush3.bf16.msra.mxu1 %v2959_v9  ;;  %v1881_v11 = vld [vmem:[%s3816_s10] ss:$0 sm:$0xff]  ;;  %v3023_v59 = vld [vmem:[%s3810_s4 + $0x8] sm:$0xff]   ;;  %v3037_v61 = vld [vmem:[%s3810_s4 + $0x10] sm:$0xff]   ;;  %s1930_s9 = sld [smem:[#allocation3 + $0x1]]  ;;  %s1944_s0 = sld [smem:[#allocation3 + $0x2]] }
  0x2b   :  { %2225 = vmatprep.subr.bf16.mxu1 %v2815_v1  ;;  %v311_v13 = vld [vmem:[%s3807_s1] sm:$0x3]  ;;  %v3028_v60 = vld [vmem:[%s3811_s5 + $0x8] sm:$0xff]   ;;  %v3042_v62 = vld [vmem:[%s3811_s5 + $0x10] sm:$0xff]   ;;  %s1958_s21 = sld [smem:[#allocation3 + $0x3]]  ;;  %s2000_s27 = sld [smem:[#allocation3 + $0x6]] }
  0x2c   :  { %v1885_v14 = vld [vmem:[%s3817_s11] ss:$0 sm:$0xff]  ;;  %v3051_v63 = vld [vmem:[%s3810_s4 + $0x18] sm:$0xff]   ;;  %v3079_v5 = vld [vmem:[%s3810_s4 + $0x28] sm:$0xff]  }
  0x2d   :  { %v312_v19 = vld [vmem:[%s3808_s2] sm:$0x3]  ;;  %v3056_v0 = vld [vmem:[%s3811_s5 + $0x18] sm:$0xff]   ;;  %v3084_v6 = vld [vmem:[%s3811_s5 + $0x28] sm:$0xff]  }
  0x2e   :  { %2226 = vmatpush3.bf16.msra.mxu1 %v2965_v10  ;;  %v1889_v36 = vld [vmem:[%s3818_s12] ss:$0 sm:$0xff]  ;;  %v3093_v7 = vld [vmem:[%s3810_s4 + $0x30] sm:$0xff]  }
  0x2f   :  { %2251 = vmatprep.subr.bf16.mxu1 %v2815_v1  ;;  %v313_v40 = vld [vmem:[%s3809_s3] sm:$0x3]  ;;  %v3098_v8 = vld [vmem:[%s3811_s5 + $0x30] sm:$0xff]  }
  0x30   :  { %v3004_v50 = vld [vmem:[%s3821_s15] ss:$0 sm:$0xff]  ;;  %s679_s23 = scvt.s32.f32 %s1930_s9  ;;  %s899_s10 = scvt.s32.f32 %s1944_s0 }
  0x31   :  { %v3011_v57 = vld [vmem:[%s3810_s4] sm:$0xff]   ;;  %s1119_s22 = scvt.s32.f32 %s1958_s21  ;;  %s1986_s21 = sld [smem:[#allocation3 + $0x5]] }
  0x32   :  { %v3016_v58 = vld [vmem:[%s3811_s5] sm:$0xff]   ;;  %2232 = vmatpush3.bf16.msra.mxu0 %v3011_v57  ;;  %s684_s24 = ssub.f32 1.0, %s679_s23  ;;  %s1779_s28 = scvt.s32.f32 %s2000_s27 }
  0x33   :  { %2233 = vmatprep.subr.bf16.mxu0 %v2815_v1  ;;  %v3065_v2 = vld [vmem:[%s3810_s4 + $0x20] sm:$0xff]   ;;  %s904_s11 = ssub.f32 1.0, %s899_s10 }
  0x34   :  { %v3070_v4 = vld [vmem:[%s3811_s5 + $0x20] sm:$0xff]   ;;  %s1124_s8 = ssub.f32 1.0, %s1119_s22 }
  0x35   :  { %s1784_s6 = ssub.f32 1.0, %s1779_s28 }
  0x36   :  { %2234 = vmatpush3.bf16.msra.mxu0 %v3023_v59 }
  0x37   :  { %2235 = vmatprep.subr.bf16.mxu0 %v2815_v1 }
  0x3a   :  { %2236 = vmatpush3.bf16.msra.mxu0 %v3037_v61 }
  0x3b   :  { %2237 = vmatprep.subr.bf16.mxu0 %v2815_v1 }
  0x3e   :  { %2238 = vmatpush3.bf16.msra.mxu0 %v3051_v63 }
  0x3f   :  { %2239 = vmatprep.subr.bf16.mxu0 %v2815_v1 }
  0x42   :  { %2240 = vmatpush3.bf16.msra.mxu0 %v3065_v2 }
  0x43   :  { %2241 = vmatprep.subr.bf16.mxu0 %v2815_v1 }
  0x46   :  { %2242 = vmatpush3.bf16.msra.mxu0 %v3079_v5 }
  0x47   :  { %2243 = vmatprep.subr.bf16.mxu0 %v2815_v1 }
  0x4a   :  { %2244 = vmatpush3.bf16.msra.mxu0 %v3093_v7 }
  0x4b   :  { %2245 = vmatprep.subr.bf16.mxu0 %v2815_v1 }
  0xf2   :  { %v122_v12 = vpop.f32.mrb[0].mxu0 }
  0xf3   :  { %v2979_v15 = vadd.f32 %v1881_v11, %v122_v12  ;;  %v2205_v16 = vpop.f32.mrb[1].mxu0  ;;  %v307_v11 = vlaneseq }
  0xf4   :  { %v125_v17 = vpop.f32.mrb[2].mxu0  ;;  %v185_v18 = vpop.f32.mrb[0].mxu1 }
  0xf5   :  { %v314_v20 = vadd.f32 %v311_v13, %v2979_v15  ;;  %v2206_v21 = vpop.f32.mrb[3].mxu0  ;;  %v2985_v22 = vadd.f32 %v1885_v14, %v185_v18  ;;  %v2213_v23 = vpop.f32.mrb[1].mxu1  ;;  %v308_v12 = vand.u32 127, %v307_v11 }
  0xf6   :  { %v188_v24 = vpop.f32.mrb[2].mxu1 }
  0xf7   :  { %v1893_v25 = vmul.f32 -1.442695, %v314_v20  ;;  %v321_v26 = vadd.f32 %v312_v19, %v2985_v22  ;;  %v2214_v27 = vpop.f32.mrb[3].mxu1  ;;  %v3106_v13 = vcvt.s32.f32 %v308_v12  ;;  %v3116_v19 = vld [vmem:[%s3810_s4 + $0x38] sm:$0xff]   ;;  %v3130_v24 = vld [vmem:[%s3827_s29] sm:$0xff]  }
  0xf8   :  { %v3121_v20 = vld [vmem:[%s3811_s5 + $0x38] sm:$0xff]   ;;  %2246 = vmatpush3.bf16.msra.mxu0 %v3116_v19  ;;  %v3147_v27 = vld [vmem:[%s3827_s29 + $0x8] sm:$0xff]  }
  0xf9   :  { %2678 = vpow2.f32 %v1893_v25  ;;  %v1894_v28 = vmul.f32 -1.442695, %v321_v26  ;;  %v3109_v14 = vsub.f32 0.0, %v3106_v13  ;;  %2271 = vmatprep.subr.bf16.mxu0 %v2815_v1  ;;  %v2817_v26 = vmov 1.0|1.0  }
  0xfa   :  { %v248_v29 = vpop.f32.mrb[4].mxu0 }
  0xfb   :  { %v2221_v30 = vpop.f32.mrb[5].mxu0  ;;  %2680 = vpow2.f32 %v1894_v28  ;;  %v2991_v38 = vadd.f32 %v1889_v36, %v248_v29  ;;  %v3160_v28 = vld [vmem:[%s3827_s29 + $0x10] sm:$0xff]   ;;  %v3169_v29 = vld [vmem:[%s3827_s29 + $0x18] sm:$0xff]   ;;  %v685_v36 = vstv %s684_s24 }
  0xfc   :  { %v251_v31 = vpop.f32.mrb[6].mxu0  ;;  %v3176_v30 = vld [vmem:[%s3827_s29 + $0x20] sm:$0xff]  }
  0xfd   :  { %v2222_v32 = vpop.f32.mrb[7].mxu0  ;;  %v3183_v31 = vld [vmem:[%s3827_s29 + $0x28] sm:$0xff]  }
  0xfe   :  { %v3190_v32 = vld [vmem:[%s3827_s29 + $0x30] sm:$0xff]  }
 0x103   :  { %v2679_v33 = vpop.eup %2678 }
 0x104   :  { %v318_v34 = vadd.f32 1.0, %v2679_v33  ;;  %v3197_v33 = vld [vmem:[%s3827_s29 + $0x38] sm:$0xff]  }
 0x105   :  { %v2681_v35 = vpop.eup %2680 }
 0x106   :  { %2682 = vrcp.f32 %v318_v34  ;;  %v325_v37 = vadd.f32 1.0, %v2681_v35  ;;  %v1931_v34 = vld [vmem:[%s3807_s1 + $0x2] sm:$0x3]  ;;  %v682_v35 = vstv %s679_s23 }
 0x108   :  { %2684 = vrcp.f32 %v325_v37  ;;  %v683_v37 = vmul.f32 %v1931_v34, %v682_v35 }
 0x110   :  { %v2683_v39 = vpop.eup %2682 }
 0x111   :  { %v328_v41 = vmul.f32 %v2683_v39, %v2991_v38  ;;  %v1932_v39 = vld [vmem:[%s3808_s2 + $0x2] sm:$0x3] }
 0x112   :  { %v2685_v43 = vpop.eup %2684 }
 0x113   :  { %v329_v42 = vadd.f32 %v328_v41, %v313_v40  ;;  %v331_v44 = vsub.f32 1.0, %v2685_v43  ;;  %v333_v47 = vmul.f32 %v2685_v43, %v2923_v3 }
 0x115   :  { %2686 = vtanh.f32 %v329_v42 }
 0x11f   :  { %v2687_v45 = vpop.eup %2686 }
 0x120   :  { %v332_v46 = vmul.f32 %v2687_v45, %v331_v44  ;;  %v690_v45 = vmul.f32 %v1932_v39, %v682_v35 }
 0x122   :  { %v334_v48 = vadd.f32 %v333_v47, %v332_v46 }
 0x124   :  { %v335_v49 = vpack.c.bf16 %v334_v48, %v334_v48 }
 0x126   :  { %2228 = vmatmul.mubr.msk.bf16.vlgmr.msra.gmra.mrb[4].mxu1 %vm84_vm1, %v335_v49 }
 0x127   :  { %2267 = vmatprep.mubr.msk.bf16.mxu1 %vm2816_vm0, %v2815_v1  ;;  %2252 = vmatpush3.bf16.msra.mxu1 %v3016_v58 }
 0x128   :  { %2253 = vmatprep.subr.bf16.mxu1 %v2815_v1 }
 0x12b   :  { %2254 = vmatpush3.bf16.msra.mxu1 %v3028_v60 }
 0x12c   :  { %2255 = vmatprep.subr.bf16.mxu1 %v2815_v1 }
 0x12f   :  { %2256 = vmatpush3.bf16.msra.mxu1 %v3042_v62 }
 0x130   :  { %2257 = vmatprep.subr.bf16.mxu1 %v2815_v1 }
 0x133   :  { %2258 = vmatpush3.bf16.msra.mxu1 %v3056_v0 }
 0x134   :  { %2259 = vmatprep.subr.bf16.mxu1 %v2815_v1 }
 0x137   :  { %2260 = vmatpush3.bf16.msra.mxu1 %v3070_v4 }
 0x138   :  { %2261 = vmatprep.subr.bf16.mxu1 %v2815_v1 }
 0x13b   :  { %2262 = vmatpush3.bf16.msra.mxu1 %v3084_v6 }
 0x13c   :  { %2263 = vmatprep.subr.bf16.mxu1 %v2815_v1 }
 0x13f   :  { %2264 = vmatpush3.bf16.msra.mxu1 %v3098_v8 }
 0x140   :  { %2265 = vmatprep.subr.bf16.mxu1 %v2815_v1 }
 0x143   :  { %2266 = vmatpush3.bf16.msra.mxu1 %v3121_v20 }
 0x144   :  { %2291 = vmatprep.subr.bf16.mxu1 %v2815_v1 }
 0x1f9   :  { %v391_v51 = vpop.f32.mrb[4].mxu1 }
 0x1fa   :  { %v392_v52 = vadd.f32 %v3004_v50, %v391_v51  ;;  %v2229_v53 = vpop.f32.mrb[5].mxu1 }
 0x1fb   :  { %v394_v54 = vpop.f32.mrb[6].mxu1 }
 0x1fc   :  { %398 = vst [vmem:[#allocation4 + $0x2] sm:$0x3] %v392_v52  ;;  %v2230_v55 = vpop.f32.mrb[7].mxu1  ;;  %v400_v56 = vsel %vm399_vm2, %v392_v52, -inf }
 0x1fd   :  { %401 = vmax.xlane.f32.xlu0 %v400_v56 }
 0x28a   :  { %v402_v16 = vpop.xlane.xlu0 %401 }
 0x28b   :  { %vm403_vm3 = vcmp.ge.f32.partialorder %v392_v52, %v402_v16 }
 0x28c   :  { %v405_v17 = vsel %vm403_vm3, %v3109_v14, -128.0 }
 0x28d   :  { %v406_v18 = vsel %vm399_vm2, %v405_v17, -inf }
 0x28e   :  { %407 = vmax.xlane.f32.xlu0 %v406_v18  ;;  %v1933_v18 = vld [vmem:[%s3809_s3 + $0x2] sm:$0x3] }
 0x31b   :  { %v408_v21 = vpop.xlane.xlu0 %407 }
 0x31c   :  { %v409_v23 = vsub.f32 0.0, %v408_v21 }
 0x31e   :  { %vm410_vm4 = vcmp.eq.f32.partialorder %v3106_v13, %v409_v23  ;;  %v695_v23 = vmul.f32 %v1933_v18, %v682_v35 }
 0x31f   :  { %vm3133_vm5 = vmpackc.low %vm410_vm4, %vm410_vm4 }
 0x320   :  { %2248 = vmatmul.mubr.msk.bf16.vlgmr.msra.gmra.mrb[8].mxu0 %vm3133_vm5, %v2817_v26  ;;  %2268 = vmatmul.mubr.msk.bf16.vlgmr.msra.gmra.mrb[8].mxu1 %vm3133_vm5, %v2817_v26 }
 0x321   :  { %2272 = vmatpush3.bf16.msra.mxu0 %v3130_v24  ;;  %2287 = vmatprep.mubr.msk.bf16.mxu0 %vm2816_vm0, %v2815_v1 }
 0x322   :  { %2273 = vmatprep.subr.bf16.mxu0 %v2815_v1  ;;  %2292 = vmatpush3.bf16.msra.mxu1 %v2959_v9 }
 0x323   :  { %2293 = vmatprep.subr.bf16.mxu1 %v2815_v1  ;;  %2295 = vmatprep.mubr.msk.bf16.mxu1 %vm2816_vm0, %v2815_v1 }
 0x325   :  { %2274 = vmatpush3.bf16.msra.mxu0 %v3147_v27 }
 0x326   :  { %2275 = vmatprep.subr.bf16.mxu0 %v2815_v1  ;;  %2294 = vmatpush3.bf16.msra.mxu1 %v2965_v10 }
 0x327   :  { %2299 = vmatprep.subr.bf16.mxu1 %v2815_v1 }
 0x329   :  { %2276 = vmatpush3.bf16.msra.mxu0 %v3160_v28 }
 0x32a   :  { %2277 = vmatprep.subr.bf16.mxu0 %v2815_v1 }
 0x32d   :  { %2278 = vmatpush3.bf16.msra.mxu0 %v3169_v29 }
 0x32e   :  { %2279 = vmatprep.subr.bf16.mxu0 %v2815_v1 }
 0x331   :  { %2280 = vmatpush3.bf16.msra.mxu0 %v3176_v30 }
 0x332   :  { %2281 = vmatprep.subr.bf16.mxu0 %v2815_v1 }
 0x335   :  { %2282 = vmatpush3.bf16.msra.mxu0 %v3183_v31 }
 0x336   :  { %2283 = vmatprep.subr.bf16.mxu0 %v2815_v1 }
 0x339   :  { %2284 = vmatpush3.bf16.msra.mxu0 %v3190_v32 }
 0x33a   :  { %2285 = vmatprep.subr.bf16.mxu0 %v2815_v1 }
 0x33d   :  { %2286 = vmatpush3.bf16.msra.mxu0 %v3197_v33 }
 0x33e   :  { %2319 = vmatprep.subr.bf16.mxu0 %v2815_v1 }
 0x340   :  { %2288 = vmatmul.mubr.msk.bf16.vlgmr.msra.gmra.mrb[12].mxu0 %vm3133_vm5, %v2817_v26 }
 0x341   :  { %2320 = vmatpush3.bf16.msra.mxu0 %v3016_v58  ;;  %2335 = vmatprep.mubr.msk.bf16.mxu0 %vm2816_vm0, %v2815_v1 }
 0x342   :  { %2321 = vmatprep.subr.bf16.mxu0 %v2815_v1 }
 0x345   :  { %2322 = vmatpush3.bf16.msra.mxu0 %v3028_v60 }
 0x346   :  { %2323 = vmatprep.subr.bf16.mxu0 %v2815_v1 }
 0x349   :  { %2324 = vmatpush3.bf16.msra.mxu0 %v3042_v62 }
 0x34a   :  { %2325 = vmatprep.subr.bf16.mxu0 %v2815_v1 }
 0x34d   :  { %2326 = vmatpush3.bf16.msra.mxu0 %v3056_v0 }
 0x34e   :  { %2327 = vmatprep.subr.bf16.mxu0 %v2815_v1 }
 0x351   :  { %2328 = vmatpush3.bf16.msra.mxu0 %v3070_v4 }
 0x352   :  { %2329 = vmatprep.subr.bf16.mxu0 %v2815_v1 }
 0x355   :  { %2330 = vmatpush3.bf16.msra.mxu0 %v3084_v6 }
 0x356   :  { %2331 = vmatprep.subr.bf16.mxu0 %v2815_v1 }
 0x359   :  { %2332 = vmatpush3.bf16.msra.mxu0 %v3098_v8 }
 0x35a   :  { %2333 = vmatprep.subr.bf16.mxu0 %v2815_v1 }
 0x35d   :  { %2334 = vmatpush3.bf16.msra.mxu0 %v3121_v20 }
 0x35e   :  { %2359 = vmatprep.subr.bf16.mxu0 %v2815_v1 }
 0x3f3   :  { %v496_v40 = vpop.f32.mrb[8].mxu0  ;;  %v584_v41 = vpop.f32.mrb[8].mxu1 }
 0x3f4   :  { %v686_v42 = vmul.f32 %v685_v36, %v496_v40  ;;  %v2249_v43 = vpop.f32.mrb[9].mxu0  ;;  %v2269_v44 = vpop.f32.mrb[9].mxu1  ;;  %v691_v46 = vmul.f32 %v685_v36, %v584_v41 }
 0x3f5   :  { %v499_v47 = vpop.f32.mrb[10].mxu0  ;;  %v587_v48 = vpop.f32.mrb[10].mxu1 }
 0x3f6   :  { %v687_v49 = vadd.f32 %v686_v42, %v683_v37  ;;  %v2250_v51 = vpop.f32.mrb[11].mxu0  ;;  %v2270_v52 = vpop.f32.mrb[11].mxu1  ;;  %v692_v54 = vadd.f32 %v691_v46, %v690_v45 }
 0x3f8   :  { %v698_v53 = vadd.f32 %v687_v49, %v2979_v15  ;;  %v705_v56 = vadd.f32 %v692_v54, %v2985_v22 }
 0x3fa   :  { %v1934_v55 = vmul.f32 -1.442695, %v698_v53  ;;  %v1935_v11 = vmul.f32 -1.442695, %v705_v56 }
 0x3fc   :  { %2688 = vpow2.f32 %v1934_v55 }
 0x3fd   :  { %2690 = vpow2.f32 %v1935_v11 }
 0x406   :  { %v2689_v12 = vpop.eup %2688 }
 0x407   :  { %v702_v16 = vadd.f32 1.0, %v2689_v12  ;;  %v2691_v17 = vpop.eup %2690 }
 0x408   :  { %v709_v21 = vadd.f32 1.0, %v2691_v17 }
 0x409   :  { %2692 = vrcp.f32 %v702_v16 }
 0x40a   :  { %2694 = vrcp.f32 %v709_v21 }
 0x413   :  { %v2693_v25 = vpop.eup %2692  ;;  %v672_v34 = vpop.f32.mrb[12].mxu0 }
 0x414   :  { %v696_v37 = vmul.f32 %v685_v36, %v672_v34  ;;  %v712_v39 = vmul.f32 %v2693_v25, %v2991_v38  ;;  %v2289_v40 = vpop.f32.mrb[13].mxu0  ;;  %v2695_v45 = vpop.eup %2694  ;;  %v902_v25 = vstv %s899_s10  ;;  %v905_v34 = vstv %s904_s11 }
 0x415   :  { %v675_v41 = vpop.f32.mrb[14].mxu0  ;;  %v715_v46 = vsub.f32 1.0, %v2695_v45  ;;  %v717_v49 = vmul.f32 %v2695_v45, %v2923_v3 }
 0x416   :  { %v697_v42 = vadd.f32 %v696_v37, %v695_v23  ;;  %v2290_v43 = vpop.f32.mrb[15].mxu0  ;;  %v1945_v23 = vld [vmem:[%s3807_s1 + $0x4] sm:$0x3] }
 0x417   :  { %v903_v37 = vmul.f32 %v1945_v23, %v902_v25 }
 0x418   :  { %v713_v44 = vadd.f32 %v712_v39, %v697_v42  ;;  %v1946_v39 = vld [vmem:[%s3808_s2 + $0x4] sm:$0x3] }
 0x419   :  { %v910_v45 = vmul.f32 %v1946_v39, %v902_v25 }
 0x41a   :  { %2696 = vtanh.f32 %v713_v44 }
 0x424   :  { %v2697_v47 = vpop.eup %2696 }
 0x425   :  { %v716_v48 = vmul.f32 %v2697_v47, %v715_v46 }
 0x427   :  { %v718_v51 = vadd.f32 %v717_v49, %v716_v48 }
 0x429   :  { %v719_v35 = vpack.c.bf16 %v718_v51, %v718_v51 }
 0x42b   :  { %2296 = vmatmul.mubr.msk.bf16.vlgmr.msra.gmra.mrb[12].mxu1 %vm84_vm1, %v719_v35 }
 0x42c   :  { %2300 = vmatpush3.bf16.msra.mxu1 %v3011_v57  ;;  %2315 = vmatprep.mubr.msk.bf16.mxu1 %vm2816_vm0, %v2815_v1 }
 0x42d   :  { %2301 = vmatprep.subr.bf16.mxu1 %v2815_v1 }
 0x430   :  { %2302 = vmatpush3.bf16.msra.mxu1 %v3023_v59 }
 0x431   :  { %2303 = vmatprep.subr.bf16.mxu1 %v2815_v1 }
 0x434   :  { %2304 = vmatpush3.bf16.msra.mxu1 %v3037_v61 }
 0x435   :  { %2305 = vmatprep.subr.bf16.mxu1 %v2815_v1 }
 0x438   :  { %2306 = vmatpush3.bf16.msra.mxu1 %v3051_v63 }
 0x439   :  { %2307 = vmatprep.subr.bf16.mxu1 %v2815_v1 }
 0x43c   :  { %2308 = vmatpush3.bf16.msra.mxu1 %v3065_v2 }
 0x43d   :  { %2309 = vmatprep.subr.bf16.mxu1 %v2815_v1 }
 0x440   :  { %2310 = vmatpush3.bf16.msra.mxu1 %v3079_v5 }
 0x441   :  { %2311 = vmatprep.subr.bf16.mxu1 %v2815_v1 }
 0x444   :  { %2312 = vmatpush3.bf16.msra.mxu1 %v3093_v7 }
 0x445   :  { %2313 = vmatprep.subr.bf16.mxu1 %v2815_v1 }
 0x448   :  { %2314 = vmatpush3.bf16.msra.mxu1 %v3116_v19 }
 0x449   :  { %2339 = vmatprep.subr.bf16.mxu1 %v2815_v1 }
 0x4fe   :  { %v757_v36 = vpop.f32.mrb[12].mxu1 }
 0x4ff   :  { %v758_v52 = vadd.f32 %v3004_v50, %v757_v36  ;;  %v2297_v53 = vpop.f32.mrb[13].mxu1 }
 0x500   :  { %v760_v54 = vpop.f32.mrb[14].mxu1 }
 0x501   :  { %764 = vst [vmem:[#allocation4 + $0x4] sm:$0x3] %v758_v52  ;;  %v2298_v55 = vpop.f32.mrb[15].mxu1  ;;  %v765_v56 = vsel %vm399_vm2, %v758_v52, -inf }
 0x502   :  { %766 = vmax.xlane.f32.xlu1 %v765_v56 }
 0x58f   :  { %v767_v11 = vpop.xlane.xlu1 %766 }
 0x590   :  { %vm768_vm6 = vcmp.ge.f32.partialorder %v758_v52, %v767_v11 }
 0x591   :  { %v769_v12 = vsel %vm768_vm6, %v3109_v14, -128.0 }
 0x592   :  { %v770_v16 = vsel %vm399_vm2, %v769_v12, -inf }
 0x593   :  { %771 = vmax.xlane.f32.xlu1 %v770_v16  ;;  %v1947_v16 = vld [vmem:[%s3809_s3 + $0x4] sm:$0x3] }
 0x620   :  { %v772_v17 = vpop.xlane.xlu1 %771 }
 0x621   :  { %v773_v18 = vsub.f32 0.0, %v772_v17 }
 0x623   :  { %vm774_vm7 = vcmp.eq.f32.partialorder %v3106_v13, %v773_v18  ;;  %v915_v18 = vmul.f32 %v1947_v16, %v902_v25 }
 0x624   :  { %vm3260_vm8 = vmpackc.low %vm774_vm7, %vm774_vm7 }
 0x625   :  { %2316 = vmatmul.mubr.msk.bf16.vlgmr.msra.gmra.mrb[16].mxu1 %vm3260_vm8, %v2817_v26  ;;  %2336 = vmatmul.mubr.msk.bf16.vlgmr.msra.gmra.mrb[16].mxu0 %vm3260_vm8, %v2817_v26 }
 0x626   :  { %2340 = vmatpush3.bf16.msra.mxu1 %v3130_v24  ;;  %2355 = vmatprep.mubr.msk.bf16.mxu1 %vm2816_vm0, %v2815_v1 }
 0x627   :  { %2341 = vmatprep.subr.bf16.mxu1 %v2815_v1  ;;  %2360 = vmatpush3.bf16.msra.mxu0 %v2959_v9 }
 0x628   :  { %2361 = vmatprep.subr.bf16.mxu0 %v2815_v1  ;;  %2363 = vmatprep.mubr.msk.bf16.mxu0 %vm2816_vm0, %v2815_v1 }
 0x62a   :  { %2342 = vmatpush3.bf16.msra.mxu1 %v3147_v27 }
 0x62b   :  { %2343 = vmatprep.subr.bf16.mxu1 %v2815_v1  ;;  %2362 = vmatpush3.bf16.msra.mxu0 %v2965_v10 }
 0x62c   :  { %2367 = vmatprep.subr.bf16.mxu0 %v2815_v1 }
 0x62e   :  { %2344 = vmatpush3.bf16.msra.mxu1 %v3160_v28 }
 0x62f   :  { %2345 = vmatprep.subr.bf16.mxu1 %v2815_v1 }
 0x632   :  { %2346 = vmatpush3.bf16.msra.mxu1 %v3169_v29 }
 0x633   :  { %2347 = vmatprep.subr.bf16.mxu1 %v2815_v1 }
 0x636   :  { %2348 = vmatpush3.bf16.msra.mxu1 %v3176_v30 }
 0x637   :  { %2349 = vmatprep.subr.bf16.mxu1 %v2815_v1 }
 0x63a   :  { %2350 = vmatpush3.bf16.msra.mxu1 %v3183_v31 }
 0x63b   :  { %2351 = vmatprep.subr.bf16.mxu1 %v2815_v1 }
 0x63e   :  { %2352 = vmatpush3.bf16.msra.mxu1 %v3190_v32 }
 0x63f   :  { %2353 = vmatprep.subr.bf16.mxu1 %v2815_v1 }
 0x642   :  { %2354 = vmatpush3.bf16.msra.mxu1 %v3197_v33 }
 0x643   :  { %2387 = vmatprep.subr.bf16.mxu1 %v2815_v1 }
 0x645   :  { %2356 = vmatmul.mubr.msk.bf16.vlgmr.msra.gmra.mrb[20].mxu1 %vm3260_vm8, %v2817_v26 }
 0x646   :  { %2388 = vmatpush3.bf16.msra.mxu1 %v3016_v58  ;;  %2403 = vmatprep.mubr.msk.bf16.mxu1 %vm2816_vm0, %v2815_v1 }
 0x647   :  { %2389 = vmatprep.subr.bf16.mxu1 %v2815_v1 }
 0x64a   :  { %2390 = vmatpush3.bf16.msra.mxu1 %v3028_v60 }
 0x64b   :  { %2391 = vmatprep.subr.bf16.mxu1 %v2815_v1 }
 0x64e   :  { %2392 = vmatpush3.bf16.msra.mxu1 %v3042_v62 }
 0x64f   :  { %2393 = vmatprep.subr.bf16.mxu1 %v2815_v1 }
 0x652   :  { %2394 = vmatpush3.bf16.msra.mxu1 %v3056_v0 }
 0x653   :  { %2395 = vmatprep.subr.bf16.mxu1 %v2815_v1 }
 0x656   :  { %2396 = vmatpush3.bf16.msra.mxu1 %v3070_v4 }
 0x657   :  { %2397 = vmatprep.subr.bf16.mxu1 %v2815_v1 }
 0x65a   :  { %2398 = vmatpush3.bf16.msra.mxu1 %v3084_v6 }
 0x65b   :  { %2399 = vmatprep.subr.bf16.mxu1 %v2815_v1 }
 0x65e   :  { %2400 = vmatpush3.bf16.msra.mxu1 %v3098_v8 }
 0x65f   :  { %2401 = vmatprep.subr.bf16.mxu1 %v2815_v1 }
 0x662   :  { %2402 = vmatpush3.bf16.msra.mxu1 %v3121_v20 }
 0x663   :  { %2427 = vmatprep.subr.bf16.mxu1 %v2815_v1 }
 0x6f8   :  { %v812_v40 = vpop.f32.mrb[16].mxu1  ;;  %v852_v41 = vpop.f32.mrb[16].mxu0 }
 0x6f9   :  { %v906_v42 = vmul.f32 %v905_v34, %v812_v40  ;;  %v2317_v43 = vpop.f32.mrb[17].mxu1  ;;  %v2337_v44 = vpop.f32.mrb[17].mxu0  ;;  %v911_v46 = vmul.f32 %v905_v34, %v852_v41 }
 0x6fa   :  { %v815_v47 = vpop.f32.mrb[18].mxu1  ;;  %v855_v48 = vpop.f32.mrb[18].mxu0 }
 0x6fb   :  { %v907_v49 = vadd.f32 %v906_v42, %v903_v37  ;;  %v2318_v51 = vpop.f32.mrb[19].mxu1  ;;  %v2338_v35 = vpop.f32.mrb[19].mxu0  ;;  %v912_v52 = vadd.f32 %v911_v46, %v910_v45 }
 0x6fd   :  { %v918_v36 = vadd.f32 %v907_v49, %v2979_v15  ;;  %v925_v54 = vadd.f32 %v912_v52, %v2985_v22 }
 0x6ff   :  { %v1948_v53 = vmul.f32 -1.442695, %v918_v36  ;;  %v1949_v55 = vmul.f32 -1.442695, %v925_v54 }
 0x701   :  { %2698 = vpow2.f32 %v1948_v53 }
 0x702   :  { %2700 = vpow2.f32 %v1949_v55 }
 0x70b   :  { %v2699_v56 = vpop.eup %2698 }
 0x70c   :  { %v922_v11 = vadd.f32 1.0, %v2699_v56  ;;  %v2701_v12 = vpop.eup %2700 }
 0x70d   :  { %v929_v17 = vadd.f32 1.0, %v2701_v12 }
 0x70e   :  { %2702 = vrcp.f32 %v922_v11 }
 0x70f   :  { %2704 = vrcp.f32 %v929_v17  ;;  %v1125_v17 = vstv %s1124_s8 }
 0x718   :  { %v2703_v21 = vpop.eup %2702  ;;  %v892_v23 = vpop.f32.mrb[20].mxu1 }
 0x719   :  { %v916_v37 = vmul.f32 %v905_v34, %v892_v23  ;;  %v932_v39 = vmul.f32 %v2703_v21, %v2991_v38  ;;  %v2357_v40 = vpop.f32.mrb[21].mxu1  ;;  %v2705_v45 = vpop.eup %2704  ;;  %v1960_v21 = vld [vmem:[%s3808_s2 + $0x6] sm:$0x3] }
 0x71a   :  { %v895_v41 = vpop.f32.mrb[22].mxu1  ;;  %v935_v46 = vsub.f32 1.0, %v2705_v45  ;;  %v937_v49 = vmul.f32 %v2705_v45, %v2923_v3 }
 0x71b   :  { %v917_v42 = vadd.f32 %v916_v37, %v915_v18  ;;  %v2358_v43 = vpop.f32.mrb[23].mxu1 }
 0x71d   :  { %v933_v44 = vadd.f32 %v932_v39, %v917_v42 }
 0x71f   :  { %2706 = vtanh.f32 %v933_v44 }
 0x729   :  { %v2707_v47 = vpop.eup %2706 }
 0x72a   :  { %v936_v48 = vmul.f32 %v2707_v47, %v935_v46 }
 0x72c   :  { %v938_v51 = vadd.f32 %v937_v49, %v936_v48 }
 0x72e   :  { %v939_v25 = vpack.c.bf16 %v938_v51, %v938_v51 }
 0x730   :  { %2364 = vmatmul.mubr.msk.bf16.vlgmr.msra.gmra.mrb[20].mxu0 %vm84_vm1, %v939_v25 }
 0x731   :  { %2368 = vmatpush3.bf16.msra.mxu0 %v3011_v57  ;;  %2383 = vmatprep.mubr.msk.bf16.mxu0 %vm2816_vm0, %v2815_v1 }
 0x732   :  { %2369 = vmatprep.subr.bf16.mxu0 %v2815_v1 }
 0x735   :  { %2370 = vmatpush3.bf16.msra.mxu0 %v3023_v59 }
 0x736   :  { %2371 = vmatprep.subr.bf16.mxu0 %v2815_v1 }
 0x739   :  { %2372 = vmatpush3.bf16.msra.mxu0 %v3037_v61 }
 0x73a   :  { %2373 = vmatprep.subr.bf16.mxu0 %v2815_v1 }
 0x73d   :  { %2374 = vmatpush3.bf16.msra.mxu0 %v3051_v63 }
 0x73e   :  { %2375 = vmatprep.subr.bf16.mxu0 %v2815_v1 }
 0x741   :  { %2376 = vmatpush3.bf16.msra.mxu0 %v3065_v2 }
 0x742   :  { %2377 = vmatprep.subr.bf16.mxu0 %v2815_v1 }
 0x745   :  { %2378 = vmatpush3.bf16.msra.mxu0 %v3079_v5 }
 0x746   :  { %2379 = vmatprep.subr.bf16.mxu0 %v2815_v1 }
 0x749   :  { %2380 = vmatpush3.bf16.msra.mxu0 %v3093_v7 }
 0x74a   :  { %2381 = vmatprep.subr.bf16.mxu0 %v2815_v1 }
 0x74d   :  { %2382 = vmatpush3.bf16.msra.mxu0 %v3116_v19 }
 0x74e   :  { %2407 = vmatprep.subr.bf16.mxu0 %v2815_v1 }
 0x803   :  { %v977_v3 = vpop.f32.mrb[20].mxu0 }
 0x804   :  { %v978_v34 = vadd.f32 %v3004_v50, %v977_v3  ;;  %v2365_v35 = vpop.f32.mrb[21].mxu0 }
 0x805   :  { %v980_v36 = vpop.f32.mrb[22].mxu0 }
 0x806   :  { %984 = vst [vmem:[#allocation4 + $0x6] sm:$0x3] %v978_v34  ;;  %v2366_v52 = vpop.f32.mrb[23].mxu0  ;;  %v985_v53 = vsel %vm399_vm2, %v978_v34, -inf }
 0x807   :  { %986 = vmax.xlane.f32.xlu0 %v985_v53  ;;  %v1961_v53 = vld [vmem:[%s3809_s3 + $0x6] sm:$0x3] }
 0x894   :  { %v987_v54 = vpop.xlane.xlu0 %986 }
 0x895   :  { %vm988_vm9 = vcmp.ge.f32.partialorder %v978_v34, %v987_v54 }
 0x896   :  { %v989_v55 = vsel %vm988_vm9, %v3109_v14, -128.0 }
 0x897   :  { %v990_v56 = vsel %vm399_vm2, %v989_v55, -inf }
 0x898   :  { %991 = vmax.xlane.f32.xlu1 %v990_v56 }
 0x925   :  { %v992_v11 = vpop.xlane.xlu1 %991 }
 0x926   :  { %v993_v12 = vsub.f32 0.0, %v992_v11 }
 0x928   :  { %vm994_vm10 = vcmp.eq.f32.partialorder %v3106_v13, %v993_v12 }
 0x929   :  { %vm3352_vm11 = vmpackc.low %vm994_vm10, %vm994_vm10 }
 0x92a   :  { %2384 = vmatmul.mubr.msk.bf16.vlgmr.msra.gmra.mrb[24].mxu0 %vm3352_vm11, %v2817_v26  ;;  %2404 = vmatmul.mubr.msk.bf16.vlgmr.msra.gmra.mrb[24].mxu1 %vm3352_vm11, %v2817_v26 }
 0x92b   :  { %2408 = vmatpush3.bf16.msra.mxu0 %v3130_v24  ;;  %2423 = vmatprep.mubr.msk.bf16.mxu0 %vm2816_vm0, %v2815_v1 }
 0x92c   :  { %2409 = vmatprep.subr.bf16.mxu0 %v2815_v1  ;;  %2428 = vmatpush3.bf16.msra.mxu1 %v2959_v9  ;;  %v1959_v9 = vld [vmem:[%s3807_s1 + $0x6] sm:$0x3] }
 0x92d   :  { %2429 = vmatprep.subr.bf16.mxu1 %v2815_v1  ;;  %2431 = vmatprep.mubr.msk.bf16.mxu1 %vm2816_vm0, %v2815_v1 }
 0x92f   :  { %2410 = vmatpush3.bf16.msra.mxu0 %v3147_v27 }
 0x930   :  { %2411 = vmatprep.subr.bf16.mxu0 %v2815_v1  ;;  %2430 = vmatpush3.bf16.msra.mxu1 %v2965_v10  ;;  %v1122_v10 = vstv %s1119_s22  ;;  %s1559_s22 = scvt.s32.f32 %s1986_s21 }
 0x931   :  { %2435 = vmatprep.subr.bf16.mxu1 %v2815_v1  ;;  %v1123_v18 = vmul.f32 %v1959_v9, %v1122_v10  ;;  %v1130_v42 = vmul.f32 %v1960_v21, %v1122_v10  ;;  %v1135_v55 = vmul.f32 %v1961_v53, %v1122_v10  ;;  %v3422_v10 = vld [vmem:[%s3819_s13] sm:$0x3] }
 0x932   :  { %s1564_s8 = ssub.f32 1.0, %s1559_s22 }
 0x933   :  { %2412 = vmatpush3.bf16.msra.mxu0 %v3160_v28 }
 0x934   :  { %2413 = vmatprep.subr.bf16.mxu0 %v2815_v1 }
 0x937   :  { %2414 = vmatpush3.bf16.msra.mxu0 %v3169_v29 }
 0x938   :  { %2415 = vmatprep.subr.bf16.mxu0 %v2815_v1 }
 0x93b   :  { %2416 = vmatpush3.bf16.msra.mxu0 %v3176_v30 }
 0x93c   :  { %2417 = vmatprep.subr.bf16.mxu0 %v2815_v1 }
 0x93f   :  { %2418 = vmatpush3.bf16.msra.mxu0 %v3183_v31 }
 0x940   :  { %2419 = vmatprep.subr.bf16.mxu0 %v2815_v1 }
 0x943   :  { %2420 = vmatpush3.bf16.msra.mxu0 %v3190_v32 }
 0x944   :  { %2421 = vmatprep.subr.bf16.mxu0 %v2815_v1 }
 0x947   :  { %2422 = vmatpush3.bf16.msra.mxu0 %v3197_v33 }
 0x948   :  { %2455 = vmatprep.subr.bf16.mxu0 %v2815_v1 }
 0x94a   :  { %2424 = vmatmul.mubr.msk.bf16.vlgmr.msra.gmra.mrb[28].mxu0 %vm3352_vm11, %v2817_v26 }
 0x94b   :  { %2456 = vmatpush3.bf16.msra.mxu0 %v3016_v58  ;;  %2471 = vmatprep.mubr.msk.bf16.mxu0 %vm2816_vm0, %v2815_v1 }
 0x94c   :  { %2457 = vmatprep.subr.bf16.mxu0 %v2815_v1 }
 0x94f   :  { %2458 = vmatpush3.bf16.msra.mxu0 %v3028_v60 }
 0x950   :  { %2459 = vmatprep.subr.bf16.mxu0 %v2815_v1 }
 0x953   :  { %2460 = vmatpush3.bf16.msra.mxu0 %v3042_v62 }
 0x954   :  { %2461 = vmatprep.subr.bf16.mxu0 %v2815_v1 }
 0x957   :  { %2462 = vmatpush3.bf16.msra.mxu0 %v3056_v0 }
 0x958   :  { %2463 = vmatprep.subr.bf16.mxu0 %v2815_v1 }
 0x95b   :  { %2464 = vmatpush3.bf16.msra.mxu0 %v3070_v4 }
 0x95c   :  { %2465 = vmatprep.subr.bf16.mxu0 %v2815_v1 }
 0x95f   :  { %2466 = vmatpush3.bf16.msra.mxu0 %v3084_v6 }
 0x960   :  { %2467 = vmatprep.subr.bf16.mxu0 %v2815_v1 }
 0x963   :  { %2468 = vmatpush3.bf16.msra.mxu0 %v3098_v8 }
 0x964   :  { %2469 = vmatprep.subr.bf16.mxu0 %v2815_v1 }
 0x967   :  { %2470 = vmatpush3.bf16.msra.mxu0 %v3121_v20 }
 0x968   :  { %2495 = vmatprep.subr.bf16.mxu0 %v2815_v1 }
 0x9fd   :  { %v1032_v23 = vpop.f32.mrb[24].mxu0  ;;  %v1072_v37 = vpop.f32.mrb[24].mxu1 }
 0x9fe   :  { %v1126_v39 = vmul.f32 %v1125_v17, %v1032_v23  ;;  %v2385_v40 = vpop.f32.mrb[25].mxu0  ;;  %v2405_v41 = vpop.f32.mrb[25].mxu1  ;;  %v1131_v43 = vmul.f32 %v1125_v17, %v1072_v37 }
 0x9ff   :  { %v1035_v44 = vpop.f32.mrb[26].mxu0  ;;  %v1075_v45 = vpop.f32.mrb[26].mxu1 }
 0xa00   :  { %v1127_v46 = vadd.f32 %v1126_v39, %v1123_v18  ;;  %v2386_v47 = vpop.f32.mrb[27].mxu0  ;;  %v2406_v48 = vpop.f32.mrb[27].mxu1  ;;  %v1132_v51 = vadd.f32 %v1131_v43, %v1130_v42 }
 0xa01   :  { %v3466_v48 = vld [vmem:[%s3820_s14] sm:$0xff]  }
 0xa02   :  { %v1138_v49 = vadd.f32 %v1127_v46, %v2979_v15  ;;  %v1145_v3 = vadd.f32 %v1132_v51, %v2985_v22 }
 0xa04   :  { %v1962_v25 = vmul.f32 -1.442695, %v1138_v49  ;;  %v1963_v34 = vmul.f32 -1.442695, %v1145_v3 }
 0xa06   :  { %2708 = vpow2.f32 %v1962_v25 }
 0xa07   :  { %2710 = vpow2.f32 %v1963_v34 }
 0xa10   :  { %v2709_v35 = vpop.eup %2708 }
 0xa11   :  { %v1142_v36 = vadd.f32 1.0, %v2709_v35  ;;  %v2711_v52 = vpop.eup %2710 }
 0xa12   :  { %v1149_v54 = vadd.f32 1.0, %v2711_v52 }
 0xa13   :  { %2712 = vrcp.f32 %v1142_v36 }
 0xa14   :  { %2714 = vrcp.f32 %v1149_v54 }
 0xa1d   :  { %v2713_v56 = vpop.eup %2712  ;;  %v1112_v11 = vpop.f32.mrb[28].mxu0 }
 0xa1e   :  { %v1136_v12 = vmul.f32 %v1125_v17, %v1112_v11  ;;  %v1152_v16 = vmul.f32 %v2713_v56, %v2991_v38  ;;  %v2425_v9 = vpop.f32.mrb[29].mxu0  ;;  %v2715_v39 = vpop.eup %2714 }
 0xa1f   :  { %v1115_v18 = vpop.f32.mrb[30].mxu0  ;;  %v1155_v40 = vsub.f32 1.0, %v2715_v39  ;;  %v1157_v17 = vmul.f32 %v3422_v10, %v2715_v39 }
 0xa20   :  { %v1137_v21 = vadd.f32 %v1136_v12, %v1135_v55  ;;  %v2426_v23 = vpop.f32.mrb[31].mxu0  ;;  %v1975_v55 = vld [vmem:[%s3809_s3 + $0x8] sm:$0x3] }
 0xa22   :  { %v1153_v37 = vadd.f32 %v1152_v16, %v1137_v21 }
 0xa24   :  { %2716 = vtanh.f32 %v1153_v37 }
 0xa2e   :  { %v2717_v41 = vpop.eup %2716 }
 0xa2f   :  { %v1156_v42 = vmul.f32 %v2717_v41, %v1155_v40 }
 0xa31   :  { %v1158_v43 = vadd.f32 %v1157_v17, %v1156_v42 }
 0xa33   :  { %v1159_v44 = vpack.c.bf16 %v1158_v43, %v1158_v43 }
 0xa35   :  { %2432 = vmatmul.mubr.msk.bf16.vlgmr.msra.gmra.mrb[28].mxu1 %vm84_vm1, %v1159_v44 }
 0xa36   :  { %2436 = vmatpush3.bf16.msra.mxu1 %v3011_v57  ;;  %2451 = vmatprep.mubr.msk.bf16.mxu1 %vm2816_vm0, %v2815_v1 }
 0xa37   :  { %2437 = vmatprep.subr.bf16.mxu1 %v2815_v1 }
 0xa3a   :  { %2438 = vmatpush3.bf16.msra.mxu1 %v3023_v59 }
 0xa3b   :  { %2439 = vmatprep.subr.bf16.mxu1 %v2815_v1 }
 0xa3e   :  { %2440 = vmatpush3.bf16.msra.mxu1 %v3037_v61 }
 0xa3f   :  { %2441 = vmatprep.subr.bf16.mxu1 %v2815_v1 }
 0xa42   :  { %2442 = vmatpush3.bf16.msra.mxu1 %v3051_v63 }
 0xa43   :  { %2443 = vmatprep.subr.bf16.mxu1 %v2815_v1 }
 0xa46   :  { %2444 = vmatpush3.bf16.msra.mxu1 %v3065_v2 }
 0xa47   :  { %2445 = vmatprep.subr.bf16.mxu1 %v2815_v1 }
 0xa4a   :  { %2446 = vmatpush3.bf16.msra.mxu1 %v3079_v5 }
 0xa4b   :  { %2447 = vmatprep.subr.bf16.mxu1 %v2815_v1 }
 0xa4e   :  { %2448 = vmatpush3.bf16.msra.mxu1 %v3093_v7 }
 0xa4f   :  { %2449 = vmatprep.subr.bf16.mxu1 %v2815_v1 }
 0xa52   :  { %2450 = vmatpush3.bf16.msra.mxu1 %v3116_v19 }
 0xa53   :  { %2475 = vmatprep.subr.bf16.mxu1 %v2815_v1 }
 0xb08   :  { %v1197_v57 = vpop.f32.mrb[28].mxu1 }
 0xb09   :  { %v1198_v59 = vadd.f32 %v3004_v50, %v1197_v57  ;;  %v2433_v61 = vpop.f32.mrb[29].mxu1  ;;  %v3589_v50 = vld [vmem:[%s3821_s15] ss:$0 sm:$0xff] }
 0xb0a   :  { %v1200_v63 = vpop.f32.mrb[30].mxu1  ;;  %v3531_v61 = vld [vmem:[%s3810_s4] sm:$0xff]  }
 0xb0b   :  { %1204 = vst [vmem:[#allocation4 + $0x8] sm:$0x3] %v1198_v59  ;;  %v2434_v2 = vpop.f32.mrb[31].mxu1  ;;  %v1205_v45 = vsel %vm399_vm2, %v1198_v59, -inf  ;;  %v3540_v63 = vld [vmem:[%s3810_s4 + $0x8] sm:$0xff]  }
 0xb0c   :  { %1206 = vmax.xlane.f32.xlu0 %v1205_v45  ;;  %v3547_v2 = vld [vmem:[%s3810_s4 + $0x10] sm:$0xff]   ;;  %v3554_v45 = vld [vmem:[%s3810_s4 + $0x18] sm:$0xff]  }
 0xb99   :  { %v1207_v5 = vpop.xlane.xlu0 %1206 }
 0xb9a   :  { %vm1208_vm12 = vcmp.ge.f32.partialorder %v1198_v59, %v1207_v5  ;;  %v3561_v5 = vld [vmem:[%s3810_s4 + $0x20] sm:$0xff]  }
 0xb9b   :  { %v1209_v7 = vsel %vm1208_vm12, %v3109_v14, -128.0 }
 0xb9c   :  { %v1210_v46 = vsel %vm399_vm2, %v1209_v7, -inf  ;;  %v3568_v7 = vld [vmem:[%s3810_s4 + $0x28] sm:$0xff]  }
 0xb9d   :  { %1211 = vmax.xlane.f32.xlu1 %v1210_v46  ;;  %v3575_v46 = vld [vmem:[%s3810_s4 + $0x30] sm:$0xff]  }
 0xc2a   :  { %v1212_v19 = vpop.xlane.xlu1 %1211 }
 0xc2b   :  { %v1213_v47 = vsub.f32 0.0, %v1212_v19  ;;  %v3582_v19 = vld [vmem:[%s3810_s4 + $0x38] sm:$0xff]  }
 0xc2d   :  { %vm1214_vm13 = vcmp.eq.f32.partialorder %v3106_v13, %v1213_v47 }
 0xc2e   :  { %vm3449_vm14 = vmpackc.low %vm1214_vm13, %vm1214_vm13 }
 0xc2f   :  { %2452 = vmatmul.mubr.msk.bf16.vlgmr.msra.gmra.mrb[32].mxu1 %vm3449_vm14, %v2817_v26  ;;  %2472 = vmatmul.mubr.msk.bf16.vlgmr.msra.gmra.mrb[32].mxu0 %vm3449_vm14, %v2817_v26 }
 0xc30   :  { %2476 = vmatpush3.bf16.msra.mxu1 %v3130_v24  ;;  %2491 = vmatprep.mubr.msk.bf16.mxu1 %vm2816_vm0, %v2815_v1  ;;  %v3477_v24 = vld [vmem:[%s3820_s14 + $0x8] sm:$0xff]   ;;  %s1972_s14 = sld [smem:[#allocation3 + $0x4]] }
 0xc31   :  { %2477 = vmatprep.subr.bf16.mxu1 %v2815_v1  ;;  %2496 = vmatpush3.bf16.msra.mxu0 %v3466_v48 }
 0xc32   :  { %2497 = vmatprep.subr.bf16.mxu0 %v2815_v1  ;;  %2499 = vmatprep.mubr.msk.bf16.mxu0 %vm2816_vm0, %v2815_v1 }
 0xc34   :  { %2478 = vmatpush3.bf16.msra.mxu1 %v3147_v27 }
 0xc35   :  { %2479 = vmatprep.subr.bf16.mxu1 %v2815_v1  ;;  %2498 = vmatpush3.bf16.msra.mxu0 %v3477_v24 }
 0xc36   :  { %2503 = vmatprep.subr.bf16.mxu0 %v2815_v1  ;;  %s1339_s11 = scvt.s32.f32 %s1972_s14 }
 0xc38   :  { %2480 = vmatpush3.bf16.msra.mxu1 %v3160_v28  ;;  %s1344_s17 = ssub.f32 1.0, %s1339_s11 }
 0xc39   :  { %2481 = vmatprep.subr.bf16.mxu1 %v2815_v1 }
 0xc3c   :  { %2482 = vmatpush3.bf16.msra.mxu1 %v3169_v29 }
 0xc3d   :  { %2483 = vmatprep.subr.bf16.mxu1 %v2815_v1 }
 0xc40   :  { %2484 = vmatpush3.bf16.msra.mxu1 %v3176_v30 }
 0xc41   :  { %2485 = vmatprep.subr.bf16.mxu1 %v2815_v1 }
 0xc44   :  { %2486 = vmatpush3.bf16.msra.mxu1 %v3183_v31 }
 0xc45   :  { %2487 = vmatprep.subr.bf16.mxu1 %v2815_v1 }
 0xc48   :  { %2488 = vmatpush3.bf16.msra.mxu1 %v3190_v32 }
 0xc49   :  { %2489 = vmatprep.subr.bf16.mxu1 %v2815_v1 }
 0xc4c   :  { %2490 = vmatpush3.bf16.msra.mxu1 %v3197_v33 }
 0xc4d   :  { %2523 = vmatprep.subr.bf16.mxu1 %v2815_v1 }
 0xc4f   :  { %2492 = vmatmul.mubr.msk.bf16.vlgmr.msra.gmra.mrb[36].mxu1 %vm3449_vm14, %v2817_v26 }
 0xc50   :  { %2524 = vmatpush3.bf16.msra.mxu1 %v3016_v58  ;;  %2539 = vmatprep.mubr.msk.bf16.mxu1 %vm2816_vm0, %v2815_v1  ;;  %v1973_v58 = vld [vmem:[%s3807_s1 + $0x8] sm:$0x3] }
 0xc51   :  { %2525 = vmatprep.subr.bf16.mxu1 %v2815_v1 }
 0xc54   :  { %2526 = vmatpush3.bf16.msra.mxu1 %v3028_v60  ;;  %v1342_v60 = vstv %s1339_s11 }
 0xc55   :  { %2527 = vmatprep.subr.bf16.mxu1 %v2815_v1  ;;  %v1355_v11 = vmul.f32 %v1975_v55, %v1342_v60  ;;  %v2774_v55 = vld [vmem:[%s3811_s5 + $0x30] sm:$0xff]  }
 0xc58   :  { %2528 = vmatpush3.bf16.msra.mxu1 %v3042_v62  ;;  %v1345_v62 = vstv %s1344_s17 }
 0xc59   :  { %2529 = vmatprep.subr.bf16.mxu1 %v2815_v1 }
 0xc5c   :  { %2530 = vmatpush3.bf16.msra.mxu1 %v3056_v0  ;;  %v1343_v0 = vmul.f32 %v1973_v58, %v1342_v60 }
 0xc5d   :  { %2531 = vmatprep.subr.bf16.mxu1 %v2815_v1 }
 0xc60   :  { %2532 = vmatpush3.bf16.msra.mxu1 %v3070_v4  ;;  %v1974_v4 = vld [vmem:[%s3808_s2 + $0x8] sm:$0x3] }
 0xc61   :  { %2533 = vmatprep.subr.bf16.mxu1 %v2815_v1  ;;  %v1350_v29 = vmul.f32 %v1974_v4, %v1342_v60 }
 0xc64   :  { %2534 = vmatpush3.bf16.msra.mxu1 %v3084_v6 }
 0xc65   :  { %2535 = vmatprep.subr.bf16.mxu1 %v2815_v1 }
 0xc68   :  { %2536 = vmatpush3.bf16.msra.mxu1 %v3098_v8 }
 0xc69   :  { %2537 = vmatprep.subr.bf16.mxu1 %v2815_v1 }
 0xc6c   :  { %2538 = vmatpush3.bf16.msra.mxu1 %v3121_v20 }
 0xc6d   :  { %2563 = vmatprep.subr.bf16.mxu1 %v2815_v1 }
 0xd02   :  { %v1252_v6 = vpop.f32.mrb[32].mxu1  ;;  %v1292_v8 = vpop.f32.mrb[32].mxu0 }
 0xd03   :  { %v1346_v27 = vmul.f32 %v1345_v62, %v1252_v6  ;;  %v2453_v20 = vpop.f32.mrb[33].mxu1  ;;  %v2473_v28 = vpop.f32.mrb[33].mxu0  ;;  %v1351_v30 = vmul.f32 %v1345_v62, %v1292_v8 }
 0xd04   :  { %v1255_v31 = vpop.f32.mrb[34].mxu1  ;;  %v1295_v32 = vpop.f32.mrb[34].mxu0 }
 0xd05   :  { %v1347_v33 = vadd.f32 %v1346_v27, %v1343_v0  ;;  %v2454_v49 = vpop.f32.mrb[35].mxu1  ;;  %v2474_v51 = vpop.f32.mrb[35].mxu0  ;;  %v1352_v3 = vadd.f32 %v1351_v30, %v1350_v29  ;;  %v3609_v30 = vld [vmem:[%s3827_s29] sm:$0xff]   ;;  %v3622_v31 = vld [vmem:[%s3827_s29 + $0x8] sm:$0xff]   ;;  %v3631_v32 = vld [vmem:[%s3827_s29 + $0x10] sm:$0xff]  }
 0xd06   :  { %v3645_v49 = vld [vmem:[%s3827_s29 + $0x20] sm:$0xff]   ;;  %v3652_v51 = vld [vmem:[%s3827_s29 + $0x28] sm:$0xff]  }
 0xd07   :  { %v1358_v25 = vadd.f32 %v1347_v33, %v2979_v15  ;;  %v1365_v35 = vadd.f32 %v1352_v3, %v2985_v22  ;;  %v3638_v33 = vld [vmem:[%s3827_s29 + $0x18] sm:$0xff]  }
 0xd08   :  { %v3666_v3 = vld [vmem:[%s3827_s29 + $0x38] sm:$0xff]  }
 0xd09   :  { %v1976_v34 = vmul.f32 -1.442695, %v1358_v25  ;;  %v1977_v36 = vmul.f32 -1.442695, %v1365_v35  ;;  %v3659_v25 = vld [vmem:[%s3827_s29 + $0x30] sm:$0xff]   ;;  %v2769_v35 = vld [vmem:[%s3811_s5 + $0x8] sm:$0xff]  }
 0xd0b   :  { %2718 = vpow2.f32 %v1976_v34  ;;  %v2768_v34 = vld [vmem:[%s3811_s5] sm:$0xff]  }
 0xd0c   :  { %2720 = vpow2.f32 %v1977_v36  ;;  %v2770_v36 = vld [vmem:[%s3811_s5 + $0x10] sm:$0xff]  }
 0xd15   :  { %v2719_v52 = vpop.eup %2718 }
 0xd16   :  { %v1362_v53 = vadd.f32 1.0, %v2719_v52  ;;  %v2721_v54 = vpop.eup %2720  ;;  %v2771_v52 = vld [vmem:[%s3811_s5 + $0x18] sm:$0xff]  }
 0xd17   :  { %v1369_v56 = vadd.f32 1.0, %v2721_v54  ;;  %v2773_v54 = vld [vmem:[%s3811_s5 + $0x28] sm:$0xff]  }
 0xd18   :  { %2722 = vrcp.f32 %v1362_v53  ;;  %v2772_v53 = vld [vmem:[%s3811_s5 + $0x20] sm:$0xff]  }
 0xd19   :  { %2724 = vrcp.f32 %v1369_v56  ;;  %v2775_v56 = vld [vmem:[%s3811_s5 + $0x38] sm:$0xff]  }
 0xd22   :  { %v2723_v12 = vpop.eup %2722  ;;  %v1332_v16 = vpop.f32.mrb[36].mxu1 }
 0xd23   :  { %v1356_v9 = vmul.f32 %v1345_v62, %v1332_v16  ;;  %v1372_v18 = vmul.f32 %v2723_v12, %v2991_v38  ;;  %v2493_v21 = vpop.f32.mrb[37].mxu1  ;;  %v2725_v41 = vpop.eup %2724  ;;  %v1562_v12 = vstv %s1559_s22  ;;  %v1565_v16 = vstv %s1564_s8 }
 0xd24   :  { %v1335_v23 = vpop.f32.mrb[38].mxu1  ;;  %v1375_v42 = vsub.f32 1.0, %v2725_v41  ;;  %v1377_v44 = vmul.f32 %v3422_v10, %v2725_v41 }
 0xd25   :  { %v1357_v37 = vadd.f32 %v1356_v9, %v1355_v11  ;;  %v2494_v39 = vpop.f32.mrb[39].mxu1  ;;  %v1987_v11 = vld [vmem:[%s3807_s1 + $0xa] sm:$0x3] }
 0xd26   :  { %v1563_v9 = vmul.f32 %v1987_v11, %v1562_v12 }
 0xd27   :  { %v1373_v40 = vadd.f32 %v1372_v18, %v1357_v37  ;;  %v1988_v18 = vld [vmem:[%s3808_s2 + $0xa] sm:$0x3] }
 0xd28   :  { %v1570_v41 = vmul.f32 %v1988_v18, %v1562_v12 }
 0xd29   :  { %2726 = vtanh.f32 %v1373_v40 }
 0xd33   :  { %v2727_v17 = vpop.eup %2726 }
 0xd34   :  { %v1376_v43 = vmul.f32 %v2727_v17, %v1375_v42 }
 0xd36   :  { %v1378_v57 = vadd.f32 %v1377_v44, %v1376_v43 }
 0xd38   :  { %v1379_v59 = vpack.c.bf16 %v1378_v57, %v1378_v57 }
 0xd3a   :  { %2500 = vmatmul.mubr.msk.bf16.vlgmr.msra.gmra.mrb[36].mxu0 %vm84_vm1, %v1379_v59 }
 0xd3b   :  { %2504 = vmatpush3.bf16.msra.mxu0 %v3531_v61  ;;  %2519 = vmatprep.mubr.msk.bf16.mxu0 %vm2816_vm0, %v2815_v1 }
 0xd3c   :  { %2505 = vmatprep.subr.bf16.mxu0 %v2815_v1 }
 0xd3f   :  { %2506 = vmatpush3.bf16.msra.mxu0 %v3540_v63 }
 0xd40   :  { %2507 = vmatprep.subr.bf16.mxu0 %v2815_v1 }
 0xd43   :  { %2508 = vmatpush3.bf16.msra.mxu0 %v3547_v2 }
 0xd44   :  { %2509 = vmatprep.subr.bf16.mxu0 %v2815_v1 }
 0xd47   :  { %2510 = vmatpush3.bf16.msra.mxu0 %v3554_v45 }
 0xd48   :  { %2511 = vmatprep.subr.bf16.mxu0 %v2815_v1 }
 0xd4b   :  { %2512 = vmatpush3.bf16.msra.mxu0 %v3561_v5 }
 0xd4c   :  { %2513 = vmatprep.subr.bf16.mxu0 %v2815_v1 }
 0xd4f   :  { %2514 = vmatpush3.bf16.msra.mxu0 %v3568_v7 }
 0xd50   :  { %2515 = vmatprep.subr.bf16.mxu0 %v2815_v1 }
 0xd53   :  { %2516 = vmatpush3.bf16.msra.mxu0 %v3575_v46 }
 0xd54   :  { %2517 = vmatprep.subr.bf16.mxu0 %v2815_v1 }
 0xd57   :  { %2518 = vmatpush3.bf16.msra.mxu0 %v3582_v19 }
 0xd58   :  { %2543 = vmatprep.subr.bf16.mxu0 %v2815_v1 }
 0xe0d   :  { %v1417_v47 = vpop.f32.mrb[36].mxu0 }
 0xe0e   :  { %v1418_v58 = vadd.f32 %v3589_v50, %v1417_v47  ;;  %v2501_v60 = vpop.f32.mrb[37].mxu0 }
 0xe0f   :  { %v1420_v62 = vpop.f32.mrb[38].mxu0 }
 0xe10   :  { %1424 = vst [vmem:[#allocation4 + $0xa] sm:$0x3] %v1418_v58  ;;  %v2502_v0 = vpop.f32.mrb[39].mxu0  ;;  %v1425_v4 = vsel %vm399_vm2, %v1418_v58, -inf }
 0xe11   :  { %1426 = vmax.xlane.f32.xlu0 %v1425_v4 }
 0xe9e   :  { %v1427_v6 = vpop.xlane.xlu0 %1426 }
 0xe9f   :  { %vm1428_vm15 = vcmp.ge.f32.partialorder %v1418_v58, %v1427_v6 }
 0xea0   :  { %v1429_v8 = vsel %vm1428_vm15, %v3109_v14, -128.0 }
 0xea1   :  { %v1430_v27 = vsel %vm399_vm2, %v1429_v8, -inf }
 0xea2   :  { %1431 = vmax.xlane.f32.xlu1 %v1430_v27  ;;  %v1989_v27 = vld [vmem:[%s3809_s3 + $0xa] sm:$0x3] }
 0xf2f   :  { %v1432_v20 = vpop.xlane.xlu1 %1431 }
 0xf30   :  { %v1433_v28 = vsub.f32 0.0, %v1432_v20 }
 0xf32   :  { %vm1434_vm3 = vcmp.eq.f32.partialorder %v3106_v13, %v1433_v28  ;;  %v1575_v28 = vmul.f32 %v1989_v27, %v1562_v12 }
 0xf33   :  { %vm3596_vm4 = vmpackc.low %vm1434_vm3, %vm1434_vm3 }
 0xf34   :  { %2520 = vmatmul.mubr.msk.bf16.vlgmr.msra.gmra.mrb[40].mxu0 %vm3596_vm4, %v2817_v26  ;;  %2540 = vmatmul.mubr.msk.bf16.vlgmr.msra.gmra.mrb[40].mxu1 %vm3596_vm4, %v2817_v26 }
 0xf35   :  { %2544 = vmatpush3.bf16.msra.mxu0 %v3609_v30  ;;  %2559 = vmatprep.mubr.msk.bf16.mxu0 %vm2816_vm0, %v2815_v1 }
 0xf36   :  { %2545 = vmatprep.subr.bf16.mxu0 %v2815_v1  ;;  %2564 = vmatpush3.bf16.msra.mxu1 %v3466_v48 }
 0xf37   :  { %2565 = vmatprep.subr.bf16.mxu1 %v2815_v1  ;;  %2567 = vmatprep.mubr.msk.bf16.mxu1 %vm2816_vm0, %v2815_v1 }
 0xf39   :  { %2546 = vmatpush3.bf16.msra.mxu0 %v3622_v31 }
 0xf3a   :  { %2547 = vmatprep.subr.bf16.mxu0 %v2815_v1  ;;  %2566 = vmatpush3.bf16.msra.mxu1 %v3477_v24 }
 0xf3b   :  { %2571 = vmatprep.subr.bf16.mxu1 %v2815_v1 }
 0xf3d   :  { %2548 = vmatpush3.bf16.msra.mxu0 %v3631_v32 }
 0xf3e   :  { %2549 = vmatprep.subr.bf16.mxu0 %v2815_v1 }
 0xf41   :  { %2550 = vmatpush3.bf16.msra.mxu0 %v3638_v33 }
 0xf42   :  { %2551 = vmatprep.subr.bf16.mxu0 %v2815_v1 }
 0xf45   :  { %2552 = vmatpush3.bf16.msra.mxu0 %v3645_v49 }
 0xf46   :  { %2553 = vmatprep.subr.bf16.mxu0 %v2815_v1 }
 0xf49   :  { %2554 = vmatpush3.bf16.msra.mxu0 %v3652_v51 }
 0xf4a   :  { %2555 = vmatprep.subr.bf16.mxu0 %v2815_v1 }
 0xf4d   :  { %2556 = vmatpush3.bf16.msra.mxu0 %v3659_v25 }
 0xf4e   :  { %2557 = vmatprep.subr.bf16.mxu0 %v2815_v1 }
 0xf51   :  { %2558 = vmatpush3.bf16.msra.mxu0 %v3666_v3 }
 0xf52   :  { %2591 = vmatprep.subr.bf16.mxu0 %v2815_v1 }
 0xf54   :  { %2560 = vmatmul.mubr.msk.bf16.vlgmr.msra.gmra.mrb[44].mxu0 %vm3596_vm4, %v2817_v26 }
 0xf55   :  { %2592 = vmatpush3.bf16.msra.mxu0 %v2768_v34  ;;  %2607 = vmatprep.mubr.msk.bf16.mxu0 %vm2816_vm0, %v2815_v1 }
 0xf56   :  { %2593 = vmatprep.subr.bf16.mxu0 %v2815_v1 }
 0xf59   :  { %2594 = vmatpush3.bf16.msra.mxu0 %v2769_v35 }
 0xf5a   :  { %2595 = vmatprep.subr.bf16.mxu0 %v2815_v1 }
 0xf5d   :  { %2596 = vmatpush3.bf16.msra.mxu0 %v2770_v36 }
 0xf5e   :  { %2597 = vmatprep.subr.bf16.mxu0 %v2815_v1 }
 0xf61   :  { %2598 = vmatpush3.bf16.msra.mxu0 %v2771_v52 }
 0xf62   :  { %2599 = vmatprep.subr.bf16.mxu0 %v2815_v1 }
 0xf65   :  { %2600 = vmatpush3.bf16.msra.mxu0 %v2772_v53 }
 0xf66   :  { %2601 = vmatprep.subr.bf16.mxu0 %v2815_v1 }
 0xf69   :  { %2602 = vmatpush3.bf16.msra.mxu0 %v2773_v54 }
 0xf6a   :  { %2603 = vmatprep.subr.bf16.mxu0 %v2815_v1 }
 0xf6d   :  { %2604 = vmatpush3.bf16.msra.mxu0 %v2774_v55 }
 0xf6e   :  { %2605 = vmatprep.subr.bf16.mxu0 %v2815_v1 }
 0xf71   :  { %2606 = vmatpush3.bf16.msra.mxu0 %v2775_v56 }
 0xf72   :  { %2631 = vmatprep.subr.bf16.mxu0 %v2815_v1 }
0x1007   :  { %v1472_v21 = vpop.f32.mrb[40].mxu0  ;;  %v1512_v23 = vpop.f32.mrb[40].mxu1 }
0x1008   :  { %v1566_v37 = vmul.f32 %v1565_v16, %v1472_v21  ;;  %v2521_v39 = vpop.f32.mrb[41].mxu0  ;;  %v2541_v40 = vpop.f32.mrb[41].mxu1  ;;  %v1571_v42 = vmul.f32 %v1565_v16, %v1512_v23 }
0x1009   :  { %v1475_v17 = vpop.f32.mrb[42].mxu0  ;;  %v1515_v43 = vpop.f32.mrb[42].mxu1 }
0x100a   :  { %v1567_v44 = vadd.f32 %v1566_v37, %v1563_v9  ;;  %v2522_v57 = vpop.f32.mrb[43].mxu0  ;;  %v2542_v59 = vpop.f32.mrb[43].mxu1  ;;  %v1572_v58 = vadd.f32 %v1571_v42, %v1570_v41 }
0x100c   :  { %v1578_v47 = vadd.f32 %v1567_v44, %v2979_v15  ;;  %v1585_v62 = vadd.f32 %v1572_v58, %v2985_v22 }
0x100e   :  { %v1990_v60 = vmul.f32 -1.442695, %v1578_v47  ;;  %v1991_v0 = vmul.f32 -1.442695, %v1585_v62 }
0x1010   :  { %2728 = vpow2.f32 %v1990_v60 }
0x1011   :  { %2730 = vpow2.f32 %v1991_v0 }
0x101a   :  { %v2729_v4 = vpop.eup %2728 }
0x101b   :  { %v1582_v6 = vadd.f32 1.0, %v2729_v4  ;;  %v2731_v8 = vpop.eup %2730  ;;  %v2003_v4 = vld [vmem:[%s3809_s3 + $0xc] sm:$0x3]  ;;  %s2818_s3 = smov [#allocation4]  }
0x101c   :  { %v1589_v20 = vadd.f32 1.0, %v2731_v8  ;;  %s1870_s10 = sshll.u32 %s2818_s3, 4  ;;  %s1871_s10 = int_to_ptr.vmem [resolvable:$true] %s1870_s10 }
0x101d   :  { %2732 = vrcp.f32 %v1582_v6  ;;  %s2788_s14 = scalar_lea.vmem %s1871_s10, 256  ;;  %p2793_p6 = scmp.lt.s32.totalorder %s1871_s10, %s1871_s10 }
0x101e   :  { %2734 = vrcp.f32 %v1589_v20  ;;  %p2789_p5 = scmp.ne.s32.totalorder %s1871_s10, %s2788_s14  ;;  %p2794_p7 = scmp.lt.s32.totalorder %s2788_s14, %s2788_s14 }
0x1020   :  { %p2795_p8 = por %p2794_p7, %p2793_p6 }
0x1022   :  { %p2796_p9 = pnand %p2795_p8, %p2789_p5 }
0x1027   :  { %v2733_v29 = vpop.eup %2732  ;;  %v1552_v34 = vpop.f32.mrb[44].mxu0 }
0x1028   :  { %v1576_v35 = vmul.f32 %v1565_v16, %v1552_v34  ;;  %v1592_v36 = vmul.f32 %v2733_v29, %v2991_v38  ;;  %v2561_v52 = vpop.f32.mrb[45].mxu0  ;;  %v2735_v11 = vpop.eup %2734 }
0x1029   :  { %v1555_v53 = vpop.f32.mrb[46].mxu0  ;;  %v1595_v9 = vsub.f32 1.0, %v2735_v11  ;;  %v1597_v23 = vmul.f32 %v3422_v10, %v2735_v11 }
0x102a   :  { %v1577_v54 = vadd.f32 %v1576_v35, %v1575_v28  ;;  %v2562_v55 = vpop.f32.mrb[47].mxu0 }
0x102c   :  { %v1593_v56 = vadd.f32 %v1592_v36, %v1577_v54 }
0x102e   :  { %2736 = vtanh.f32 %v1593_v56 }
0x1038   :  { %v2737_v18 = vpop.eup %2736 }
0x1039   :  { %v1596_v21 = vmul.f32 %v2737_v18, %v1595_v9 }
0x103b   :  { %v1598_v37 = vadd.f32 %v1597_v23, %v1596_v21 }
0x103d   :  { %v1599_v12 = vpack.c.bf16 %v1598_v37, %v1598_v37 }
0x103f   :  { %2568 = vmatmul.mubr.msk.bf16.vlgmr.msra.gmra.mrb[44].mxu1 %vm84_vm1, %v1599_v12 }
0x1040   :  { %2572 = vmatpush3.bf16.msra.mxu1 %v3531_v61  ;;  %2587 = vmatprep.mubr.msk.bf16.mxu1 %vm2816_vm0, %v2815_v1 }
0x1041   :  { %2573 = vmatprep.subr.bf16.mxu1 %v2815_v1 }
0x1044   :  { %2574 = vmatpush3.bf16.msra.mxu1 %v3540_v63 }
0x1045   :  { %2575 = vmatprep.subr.bf16.mxu1 %v2815_v1 }
0x1048   :  { %2576 = vmatpush3.bf16.msra.mxu1 %v3547_v2 }
0x1049   :  { %2577 = vmatprep.subr.bf16.mxu1 %v2815_v1 }
0x104c   :  { %2578 = vmatpush3.bf16.msra.mxu1 %v3554_v45 }
0x104d   :  { %2579 = vmatprep.subr.bf16.mxu1 %v2815_v1 }
0x1050   :  { %2580 = vmatpush3.bf16.msra.mxu1 %v3561_v5 }
0x1051   :  { %2581 = vmatprep.subr.bf16.mxu1 %v2815_v1 }
0x1054   :  { %2582 = vmatpush3.bf16.msra.mxu1 %v3568_v7 }
0x1055   :  { %2583 = vmatprep.subr.bf16.mxu1 %v2815_v1 }
0x1058   :  { %2584 = vmatpush3.bf16.msra.mxu1 %v3575_v46 }
0x1059   :  { %2585 = vmatprep.subr.bf16.mxu1 %v2815_v1 }
0x105c   :  { %2586 = vmatpush3.bf16.msra.mxu1 %v3582_v19 }
0x105d   :  { %2611 = vmatprep.subr.bf16.mxu1 %v2815_v1 }
0x1112   :  { %v1637_v61 = vpop.f32.mrb[44].mxu1 }
0x1113   :  { %v1638_v63 = vadd.f32 %v3589_v50, %v1637_v61  ;;  %v2569_v2 = vpop.f32.mrb[45].mxu1 }
0x1114   :  { %v1640_v45 = vpop.f32.mrb[46].mxu1 }
0x1115   :  { %1644 = vst [vmem:[#allocation4 + $0xc] sm:$0x3] %v1638_v63  ;;  %v2570_v5 = vpop.f32.mrb[47].mxu1  ;;  %v1645_v16 = vsel %vm399_vm2, %v1638_v63, -inf }
0x1116   :  { %1646 = vmax.xlane.f32.xlu0 %v1645_v16 }
0x11a3   :  { %v1647_v7 = vpop.xlane.xlu0 %1646 }
0x11a4   :  { %vm1648_vm5 = vcmp.ge.f32.partialorder %v1638_v63, %v1647_v7 }
0x11a5   :  { %v1649_v46 = vsel %vm1648_vm5, %v3109_v14, -128.0  ;;  %v1782_v14 = vstv %s1779_s28 }
0x11a6   :  { %v1650_v39 = vsel %vm399_vm2, %v1649_v46, -inf  ;;  %v1795_v8 = vmul.f32 %v2003_v4, %v1782_v14 }
0x11a7   :  { %1651 = vmax.xlane.f32.xlu1 %v1650_v39 }
0x1234   :  { %v1652_v19 = vpop.xlane.xlu1 %1651 }
0x1235   :  { %v1653_v40 = vsub.f32 0.0, %v1652_v19 }
0x1237   :  { %vm1654_vm6 = vcmp.eq.f32.partialorder %v3106_v13, %v1653_v40  ;;  %v2001_v13 = vld [vmem:[%s3807_s1 + $0xc] sm:$0x3] }
0x1238   :  { %vm3744_vm7 = vmpackc.low %vm1654_vm6, %vm1654_vm6 }
0x1239   :  { %2588 = vmatmul.mubr.msk.bf16.vlgmr.msra.gmra.mrb[48].mxu1 %vm3744_vm7, %v2817_v26  ;;  %2608 = vmatmul.mubr.msk.bf16.vlgmr.msra.gmra.mrb[48].mxu0 %vm3744_vm7, %v2817_v26 }
0x123a   :  { %2612 = vmatpush3.bf16.msra.mxu1 %v3609_v30  ;;  %2627 = vmatprep.mubr.msk.bf16.mxu1 %vm2816_vm0, %v2815_v1 }
0x123b   :  { %2613 = vmatprep.subr.bf16.mxu1 %v2815_v1  ;;  %2632 = vmatpush3.bf16.msra.mxu0 %v3466_v48  ;;  %v1785_v48 = vstv %s1784_s6 }
0x123c   :  { %2633 = vmatprep.subr.bf16.mxu0 %v2815_v1  ;;  %2635 = vmatprep.mubr.msk.bf16.mxu0 %vm2816_vm0, %v2815_v1 }
0x123e   :  { %2614 = vmatpush3.bf16.msra.mxu1 %v3622_v31 }
0x123f   :  { %2615 = vmatprep.subr.bf16.mxu1 %v2815_v1  ;;  %2634 = vmatpush3.bf16.msra.mxu0 %v3477_v24  ;;  %v1783_v24 = vmul.f32 %v2001_v13, %v1782_v14 }
0x1242   :  { %2616 = vmatpush3.bf16.msra.mxu1 %v3631_v32 }
0x1243   :  { %2617 = vmatprep.subr.bf16.mxu1 %v2815_v1 }
0x1246   :  { %2618 = vmatpush3.bf16.msra.mxu1 %v3638_v33 }
0x1247   :  { %2619 = vmatprep.subr.bf16.mxu1 %v2815_v1 }
0x124a   :  { %2620 = vmatpush3.bf16.msra.mxu1 %v3645_v49 }
0x124b   :  { %2621 = vmatprep.subr.bf16.mxu1 %v2815_v1 }
0x124e   :  { %2622 = vmatpush3.bf16.msra.mxu1 %v3652_v51 }
0x124f   :  { %2623 = vmatprep.subr.bf16.mxu1 %v2815_v1 }
0x1252   :  { %2624 = vmatpush3.bf16.msra.mxu1 %v3659_v25 }
0x1253   :  { %2625 = vmatprep.subr.bf16.mxu1 %v2815_v1  ;;  %v2002_v1 = vld [vmem:[%s3808_s2 + $0xc] sm:$0x3] }
0x1256   :  { %2626 = vmatpush3.bf16.msra.mxu1 %v3666_v3 }
0x1259   :  { %2628 = vmatmul.mubr.msk.bf16.vlgmr.msra.gmra.mrb[52].mxu1 %vm3744_vm7, %v2817_v26  ;;  %v1790_v26 = vmul.f32 %v2002_v1, %v1782_v14 }
0x130c   :  { %v1692_v30 = vpop.f32.mrb[48].mxu1  ;;  %v1732_v31 = vpop.f32.mrb[48].mxu0 }
0x130d   :  { %v1786_v32 = vmul.f32 %v1785_v48, %v1692_v30  ;;  %v2589_v33 = vpop.f32.mrb[49].mxu1  ;;  %v2609_v49 = vpop.f32.mrb[49].mxu0  ;;  %v1791_v51 = vmul.f32 %v1785_v48, %v1732_v31 }
0x130e   :  { %v1695_v25 = vpop.f32.mrb[50].mxu1  ;;  %v1735_v3 = vpop.f32.mrb[50].mxu0 }
0x130f   :  { %v1787_v42 = vadd.f32 %v1786_v32, %v1783_v24  ;;  %v2590_v17 = vpop.f32.mrb[51].mxu1  ;;  %v2610_v43 = vpop.f32.mrb[51].mxu0  ;;  %v1792_v57 = vadd.f32 %v1791_v51, %v1790_v26 }
0x1311   :  { %v1798_v44 = vadd.f32 %v1787_v42, %v2979_v15  ;;  %v1805_v47 = vadd.f32 %v1792_v57, %v2985_v22 }
0x1313   :  { %v2004_v59 = vmul.f32 -1.442695, %v1798_v44  ;;  %v2005_v58 = vmul.f32 -1.442695, %v1805_v47 }
0x1315   :  { %2738 = vpow2.f32 %v2004_v59 }
0x1316   :  { %2740 = vpow2.f32 %v2005_v58 }
0x131f   :  { %v2739_v60 = vpop.eup %2738 }
0x1320   :  { %v1802_v62 = vadd.f32 1.0, %v2739_v60  ;;  %v2741_v0 = vpop.eup %2740 }
0x1321   :  { %v1809_v6 = vadd.f32 1.0, %v2741_v0 }
0x1322   :  { %2742 = vrcp.f32 %v1802_v62 }
0x1323   :  { %2744 = vrcp.f32 %v1809_v6 }
0x132c   :  { %v2743_v27 = vpop.eup %2742  ;;  %v1772_v20 = vpop.f32.mrb[52].mxu1 }
0x132d   :  { %v1796_v15 = vmul.f32 %v1785_v48, %v1772_v20  ;;  %v1812_v28 = vmul.f32 %v2743_v27, %v2991_v38  ;;  %v2629_v29 = vpop.f32.mrb[53].mxu1  ;;  %v2745_v52 = vpop.eup %2744 }
0x132e   :  { %v1775_v34 = vpop.f32.mrb[54].mxu1  ;;  %v1815_v53 = vsub.f32 1.0, %v2745_v52  ;;  %v1817_v56 = vmul.f32 %v3422_v10, %v2745_v52 }
0x132f   :  { %v1797_v22 = vadd.f32 %v1796_v15, %v1795_v8  ;;  %v2630_v35 = vpop.f32.mrb[55].mxu1 }
0x1331   :  { %v1813_v36 = vadd.f32 %v1812_v28, %v1797_v22 }
0x1333   :  { %2746 = vtanh.f32 %v1813_v36 }
0x133d   :  { %v2747_v54 = vpop.eup %2746 }
0x133e   :  { %v1816_v55 = vmul.f32 %v2747_v54, %v1815_v53 }
0x1340   :  { %v1818_v11 = vadd.f32 %v1817_v56, %v1816_v55 }
0x1342   :  { %v1819_v9 = vpack.c.bf16 %v1818_v11, %v1818_v11 }
0x1344   :  { %2636 = vmatmul.mubr.msk.bf16.vlgmr.msra.gmra.mrb[52].mxu0 %vm84_vm1, %v1819_v9 }
0x1417   :  { %v1857_v38 = vpop.f32.mrb[52].mxu0 }
0x1418   :  { %v1858_v18 = vadd.f32 %v3589_v50, %v1857_v38  ;;  %v2637_v21 = vpop.f32.mrb[53].mxu0 }
0x1419   :  { %v1860_v23 = vpop.f32.mrb[54].mxu0 }
0x141a   :  { %1864 = vst [vmem:[#allocation4 + $0xe] sm:$0x3] %v1858_v18  ;;  %v2638_v37 = vpop.f32.mrb[55].mxu0 }
0x141b   :  { %2799 = shalt.err (!%p2796_p9)
}
0x141c   :  { %s2800_s7 = scalar_lea.hbm %s3822_s16, 256 }
0x141d   :  { %p2801_p10 = scmp.ne.s32.totalorder %s3822_s16, %s2800_s7  ;;  %p2804_p11 = scmp.lt.u32.totalorder %s2800_s7, %s3822_s16 }
0x141f   :  { %p2806_p12 = pnand %p2804_p11, %p2801_p10 }
0x1421   :  { %2809 = shalt.err (!%p2806_p12)
}
0x1422   :  { %s2819_s19 = smov 32   ;;  %s2820_s20 = smov 2  }
0x1423   :  { %1876 = dma.vmem_to_hbm [thread:$0]  %s1871_s10, 256, %s3822_s16, [#allocation5], %s2819_s19, %s2819_s19, %s2820_s20  }
0x1424   :  { %2812 = dma.done.wait [#allocation5], 256  }
0x1425   :  { %2813 = vsyncadd [#allocation5], 4294967040 }
0x1426   :  { %1880 = vsyncpa [#allocation5], 1 }

</bundles_post_ra>
